<compile_context>
chip_gen: v7x
topology: tpu7x:2x2x1
jax: 0.10.0
libtpu: 0.0.40
codegen_flags: <defaults>
</compile_context>

<pallas_src>
import numpy as np
import jax
import jax.numpy as jnp
from jax import lax
from jax.experimental import pallas as pl
from jax.experimental.pallas import tpu as pltpu

# --- "module parameters" (OptimizationEstimatorBase defaults + symmetric uniform quantizer)
NUM_CANDIDATES = 100            # num_candidates
RANGE_MARGIN = 0.5              # range_margin
N_BITS = 8                      # quantizer.n_bits
LEVELS = float(2 ** N_BITS - 1)
MAX_INT_SKEW = (2 ** N_BITS) // 4   # only used by the 2D / asymmetric path (not taken here)

# --- kernel layout constants
LANE = 128
SUBLANE = 8
CAND_CHUNK = 8                  # candidates whose partial sums ride in vregs per inner loop
C_PAD = 128                     # candidate slots in the accumulator block (100 used)
MAX_TILE_N = 4096               # data lanes per grid step (feedback: 1024 -> 4096)


def _round_up(a, b):
    return ((a + b - 1) // b) * b


def _make_mse_grid_kernel(tile_n, lo, hi, num_candidates):
    """Loss-accumulation kernel for one (8, tile_n) data tile.

    out_ref is a (1, C_PAD, 8, 128) lane-resident accumulator block that is revisited across
    the N (reduction) grid axis.  For every candidate c it holds the per-(row, lane-slot)
    partial sum of (q*c - x/delta_base)^2; the cross-lane reduction and the delta_base^2
    rescale happen in the wrapper.
    """
    n_groups = tile_n // LANE
    n_chunks = -(-num_candidates // CAND_CHUNK)
    unroll = 2 if n_groups >= 2 else 1

    def kernel(x_ref, scale_ref, out_ref):
        # The reduction axis is the last grid dim; init the resident block on its first visit.
        @pl.when(pl.program_id(1) == 0)
        def _init():
            out_ref[...] = jnp.zeros_like(out_ref)

        sc = scale_ref[...]                    # (8,128) f32: 1/delta_base, lane-replicated

        # Candidates are compile-time constants (delta_c = c * delta_base), so the hot loop is
        # pure VALU work against scalar immediates: no tables, no lane slicing, no relayouts.
        for ci in range(n_chunks):
            first = ci * CAND_CHUNK + 1
            cands = tuple(range(first, min(first + CAND_CHUNK, num_candidates + 1)))

            def g_body(g, accs, _cands=cands):
                off = pl.multiple_of(g * LANE, LANE)
                xg = x_ref[:, pl.ds(off, LANE)] * sc          # (8,128), data in base units
                new = []
                for j, c in enumerate(_cands):
                    q = jnp.clip(jnp.round(xg * (1.0 / float(c))), lo, hi)
                    err = q * float(c) - xg
                    new.append(accs[j] + err * err)
                return tuple(new)

            init = tuple(jnp.zeros((SUBLANE, LANE), jnp.float32) for _ in cands)
            accs = lax.fori_loop(0, n_groups, g_body, init, unroll=unroll)
            for j, c in enumerate(cands):
                # one full-width (8,128) vreg read-modify-write per candidate per grid step
                out_ref[0, c - 1] += accs[j]

    return kernel


def optimization_estimator_forward(data, per_channel=False):
    """Functional equivalent of OptimizationEstimatorBase.forward (grid / 1D search path)."""
    org_dtype = data.dtype
    C = NUM_CANDIDATES

    xf = data.astype(jnp.float32)                       # forward() casts to float32
    G = data.shape[0] if per_channel else 1
    x2 = xf.reshape(G, -1)

    # ---- global statistics straight off the (unpadded) data -----------------------------
    amax = np.asarray(jnp.max(jnp.abs(x2), axis=1), np.float32)        # (G,), exact
    one_sided = bool(np.asarray(jnp.min(x2)) >= 0.0)                   # one_sided_dist

    # ---- search range (host NumPy f32, identical arithmetic to the reference loop) ------
    max_pos = amax + RANGE_MARGIN                                      # max_pos_thr
    step_g = (max_pos / NUM_CANDIDATES).astype(np.float32)             # step_size, (G,)

    # ---- fold the data into a sublane-dense (rows, n_pad) slab, zero padded -------------
    #      a zero element fake-quants exactly to zero (no added loss) -> padding is neutral.
    if per_channel:
        rows = _round_up(G, SUBLANE)
        n_row = x2.shape[1]
        step_rows = np.concatenate([step_g, np.ones(rows - G, np.float32)])
    else:
        rows = 2 * SUBLANE    # >= 2 row blocks so the "parallel" grid axis feeds both v7x cores
        n_row = -(-x2.shape[1] // rows)
        step_rows = np.full(rows, step_g[0], np.float32)

    n_pad = _round_up(max(n_row, 1), LANE)
    k_blocks = -(-n_pad // MAX_TILE_N)
    tile_n = _round_up(-(-n_pad // k_blocks), LANE)
    n_pad = tile_n * k_blocks

    if per_channel:
        if x2.shape == (rows, n_pad):
            x_slab = x2
        else:
            x_slab = jnp.pad(x2, ((0, rows - G), (0, n_pad - x2.shape[1])))
    else:
        flat = x2.reshape(-1)
        total = rows * n_pad
        if total == flat.shape[0]:
            x_slab = flat.reshape(rows, n_pad)
        else:
            x_slab = jnp.pad(flat, (0, total - flat.shape[0])).reshape(rows, n_pad)

    # ---- symmetric uniform quantizer constants ------------------------------------------
    # delta_c = delta_base * c, delta_base = step*(1 or 2)/levels.  The zero point of the
    # symmetric range is exactly round(levels/2) = 2^(n_bits-1) (two-sided) or 0 (one-sided),
    # so the integer clip bounds are compile-time immediates (no on-device divisions).
    width = np.float32(1.0) if one_sided else np.float32(2.0)
    db_rows = ((step_rows * width) / np.float32(LEVELS)).astype(np.float32)     # (rows,)
    inv_db_rows = (np.float32(1.0) / db_rows).astype(np.float32)
    scale = jnp.asarray(np.repeat(inv_db_rows[:, None], LANE, axis=1))          # (rows, 128)
    if one_sided:
        lo, hi = 0.0, LEVELS
    else:
        zp = float(2 ** (N_BITS - 1))
        lo, hi = -zp, LEVELS - zp

    # ---- Pallas: stream N tiles, accumulate lane-resident per-candidate partial sums ----
    r_blocks = rows // SUBLANE
    acc = jax.jit(pl.pallas_call(
        _make_mse_grid_kernel(tile_n, lo, hi, C),
        out_shape=jax.ShapeDtypeStruct((r_blocks, C_PAD, SUBLANE, LANE), jnp.float32),
        grid=(r_blocks, n_pad // tile_n),
        in_specs=[
            pl.BlockSpec((SUBLANE, tile_n), lambda r, k: (r, k)),   # data tile
            pl.BlockSpec((SUBLANE, LANE), lambda r, k: (r, 0)),     # per-row 1/delta_base
        ],
        out_specs=pl.BlockSpec((1, C_PAD, SUBLANE, LANE), lambda r, k: (r, 0, 0, 0)),
        compiler_params=pltpu.CompilerParams(
            dimension_semantics=("parallel", "arbitrary")),
    ))(x_slab, scale)

    # ---- finalize (tiny, XLA): lane reduce, delta_base^2 rescale, argmin, ranges --------
    row_loss = jnp.sum(acc, axis=-1)                                   # (R, C_PAD, 8)
    row_loss = jnp.transpose(row_loss, (0, 2, 1)).reshape(rows, C_PAD)[:, :C]
    row_loss = row_loss * jnp.asarray((db_rows[:, None] ** 2).astype(np.float32))
    if per_channel:
        group_loss = row_loss[:G]                                      # (G, C)
    else:
        group_loss = jnp.sum(row_loss, axis=0, keepdims=True)          # (1, C)
    loss_array = jnp.concatenate(
        [jnp.full((G, 1), jnp.inf, jnp.float32), group_loss], axis=1)  # (G, C+1)
    min_cand = (jnp.argmin(group_loss, axis=1) + 1).astype(jnp.float32)  # 1-based candidate
    xmax = jnp.asarray(step_g) * min_cand
    xmin = jnp.zeros_like(xmax) if one_sided else -xmax
    # TODO(synk): stateful module bookkeeping (lazy buffers, cross-batch loss_array
    # accumulation / reset) and the 2D / golden-section (scipy) search paths are host-side
    # control flow, not kernel compute.
    return xmin.astype(org_dtype), xmax.astype(org_dtype), loss_array


def _reference_forward(data, per_channel=False):
    """Pure-NumPy reference mirroring the PyTorch _perform_1D_search candidate loop."""
    x = np.asarray(data, np.float32)
    x2 = x.reshape(x.shape[0], -1) if per_channel else x.reshape(1, -1)
    G = x2.shape[0]
    one_sided = bool(x2.min() >= 0)
    levels = np.float32(2 ** N_BITS - 1)
    max_pos = np.abs(x2).max(axis=1) + RANGE_MARGIN
    step = (max_pos / NUM_CANDIDATES).astype(np.float32)
    # Zero point of the symmetric-range uniform quantizer: round(-neg_thr/delta) evaluates
    # exactly to round(levels/2) = 2^(n_bits-1) for the two-sided case and 0 when one-sided.
    zp = np.float32(0.0) if one_sided else np.float32(2 ** (N_BITS - 1))
    loss = np.zeros((G, NUM_CANDIDATES + 1), np.float32)
    loss[:, 0] = np.inf
    for c in range(1, NUM_CANDIDATES + 1):
        pos = step * np.float32(c)
        neg = np.zeros_like(pos) if one_sided else -pos
        delta = (pos - neg) / levels
        xi = np.round(x2 / delta[:, None]) + zp
        xq = np.clip(xi, 0.0, levels)
        xdq = (xq - zp) * delta[:, None]
        loss[:, c] = ((xdq - x2) ** 2).sum(axis=1)
    min_cand = np.argmin(loss, axis=1)
    xmax = step * min_cand
    xmin = np.zeros_like(xmax) if one_sided else -xmax
    return xmin, xmax, loss


def _validate(tag, data, per_channel):
    xmin, xmax, loss = optimization_estimator_forward(data, per_channel=per_channel)
    jax.block_until_ready((xmin, xmax, loss))
    data_np = np.asarray(data)
    r_xmin, r_xmax, r_loss = _reference_forward(data_np, per_channel)

    loss_np = np.asarray(loss)
    assert np.allclose(loss_np, r_loss, rtol=2e-3, atol=1e-3), f"{tag}: loss mismatch"

    G = r_loss.shape[0]
    gidx = np.arange(G)
    k_cand = np.argmin(loss_np, axis=1)
    r_cand = np.argmin(r_loss, axis=1)
    # The kernel's pick must be (numerically) as good as the reference's pick on the
    # reference loss curve (guards against harmless ulp-level argmin ties).
    assert np.all(r_loss[gidx, k_cand] <= r_loss[gidx, r_cand] * (1.0 + 1e-3) + 1e-6), \
        f"{tag}: suboptimal candidate"
    step_ref = r_xmax / np.maximum(r_cand, 1)
    one_sided = bool(data_np.min() >= 0)
    exp_xmax = step_ref * k_cand
    exp_xmin = np.zeros_like(exp_xmax) if one_sided else -exp_xmax
    assert np.allclose(np.asarray(xmax), exp_xmax, rtol=1e-4, atol=1e-5), f"{tag}: xmax mismatch"
    assert np.allclose(np.asarray(xmin), exp_xmin, rtol=1e-4, atol=1e-5), f"{tag}: xmin mismatch"


if __name__ == "__main__":
    # Per-tensor estimation on an NCHW activation tensor (two-sided distribution).
    key = jax.random.PRNGKey(0)
    x = jax.random.normal(key, (2, 4, 16, 16), dtype=jnp.float32) * 2.0 + 0.3
    _validate("per-tensor", x, per_channel=False)

    # Per-channel estimation on a weight-shaped tensor (out_channels first).
    w = jax.random.normal(jax.random.PRNGKey(1), (4, 8, 4, 4), dtype=jnp.float32)
    _validate("per-channel", w, per_channel=True)

    # One-sided (non-negative) per-tensor path, e.g. a post-ReLU activation.
    x_pos = jnp.abs(x) * 0.5
    _validate("one-sided", x_pos, per_channel=False)

    print("KERNEL_OK")
</pallas_src>

<mosaic_0001>
module attributes {stable_mosaic.version = 11 : i64} {
  func.func @kernel(%arg0: i32, %arg1: i32, %arg2: memref<8x128xf32, #tpu.memory_space<vmem>>, %arg3: memref<8x128xf32, #tpu.memory_space<vmem>>, %arg4: memref<1x128x8x128xf32, #tpu.memory_space<vmem>>) attributes {dimension_semantics = [#tpu.dimension_semantics<parallel>, #tpu.dimension_semantics<arbitrary>], iteration_bounds = array<i64: 2, 1>, scalar_prefetch = 0 : i64, scratch_operands = 0 : i64, tpu.core_type = #tpu.core_type<tc>, window_params = [{transform_indices = @transform_0, window_bounds = array<i64: 8, 128>}, {transform_indices = @transform_1, window_bounds = array<i64: 8, 128>}, {transform_indices = @transform_2, window_bounds = array<i64: 1, 128, 8, 128>}]} {
    %c0_i32 = arith.constant 0 : i32
    %0 = arith.cmpi eq, %arg1, %c0_i32 : i32
    %1 = arith.extui %0 : i1 to i32
    %c0_i32_0 = arith.constant 0 : i32
    %2 = arith.cmpi ne, %1, %c0_i32_0 : i32
    scf.if %2 {
      %cst_1252 = arith.constant 0.000000e+00 : f32
      %1969 = vector.broadcast %cst_1252 : f32 to vector<1x128x8x128xf32>
      %c0_1253 = arith.constant 0 : index
      %c0_1254 = arith.constant 0 : index
      %c0_1255 = arith.constant 0 : index
      %c0_1256 = arith.constant 0 : index
      %1970 = vector.load %arg4[%c0_1253, %c0_1254, %c0_1255, %c0_1256] : memref<1x128x8x128xf32, #tpu.memory_space<vmem>>, vector<1x128x8x128xf32>
      tpu.vector_store %arg4[%c0_1253, %c0_1254, %c0_1255, %c0_1256], %1969 {strides = array<i32>} : memref<1x128x8x128xf32, #tpu.memory_space<vmem>>, vector<1x128x8x128xf32>,
    } else {
    }
    %c0 = arith.constant 0 : index
    %c0_1 = arith.constant 0 : index
    %3 = vector.load %arg3[%c0, %c0_1] : memref<8x128xf32, #tpu.memory_space<vmem>>, vector<8x128xf32>
    %cst = arith.constant 0.000000e+00 : f32
    %4 = vector.broadcast %cst : f32 to vector<8x128xf32>
    %cst_2 = arith.constant 0.000000e+00 : f32
    %5 = vector.broadcast %cst_2 : f32 to vector<8x128xf32>
    %cst_3 = arith.constant 0.000000e+00 : f32
    %6 = vector.broadcast %cst_3 : f32 to vector<8x128xf32>
    %cst_4 = arith.constant 0.000000e+00 : f32
    %7 = vector.broadcast %cst_4 : f32 to vector<8x128xf32>
    %cst_5 = arith.constant 0.000000e+00 : f32
    %8 = vector.broadcast %cst_5 : f32 to vector<8x128xf32>
    %cst_6 = arith.constant 0.000000e+00 : f32
    %9 = vector.broadcast %cst_6 : f32 to vector<8x128xf32>
    %cst_7 = arith.constant 0.000000e+00 : f32
    %10 = vector.broadcast %cst_7 : f32 to vector<8x128xf32>
    %cst_8 = arith.constant 0.000000e+00 : f32
    %11 = vector.broadcast %cst_8 : f32 to vector<8x128xf32>
    %c0_i32_9 = arith.constant 0 : i32
    %c128_i32 = arith.constant 128 : i32
    %12 = arith.muli %c0_i32_9, %c128_i32 : i32
    %13 = tpu.assume_multiple %12, 128 : i32
    %c0_10 = arith.constant 0 : index
    %14 = arith.index_cast %13 : i32 to index
    %15 = vector.load %arg2[%c0_10, %14] : memref<8x128xf32, #tpu.memory_space<vmem>>, vector<8x128xf32>
    %16 = arith.mulf %15, %3 : vector<8x128xf32>
    %cst_11 = arith.constant 1.000000e+00 : f32
    %17 = vector.broadcast %cst_11 : f32 to vector<8x128xf32>
    %18 = arith.mulf %16, %17 : vector<8x128xf32>
    %19 = math.roundeven %18 : vector<8x128xf32>
    %cst_12 = arith.constant -1.280000e+02 : f32
    %cst_13 = arith.constant 1.270000e+02 : f32
    %20 = vector.broadcast %cst_12 : f32 to vector<8x128xf32>
    %21 = arith.maximumf %20, %19 : vector<8x128xf32>
    %22 = vector.broadcast %cst_13 : f32 to vector<8x128xf32>
    %23 = arith.minimumf %22, %21 : vector<8x128xf32>
    %cst_14 = arith.constant 1.000000e+00 : f32
    %24 = vector.broadcast %cst_14 : f32 to vector<8x128xf32>
    %25 = arith.mulf %23, %24 : vector<8x128xf32>
    %26 = arith.subf %25, %16 : vector<8x128xf32>
    %27 = arith.mulf %26, %26 : vector<8x128xf32>
    %28 = arith.addf %4, %27 : vector<8x128xf32>
    %cst_15 = arith.constant 5.000000e-01 : f32
    %29 = vector.broadcast %cst_15 : f32 to vector<8x128xf32>
    %30 = arith.mulf %16, %29 : vector<8x128xf32>
    %31 = math.roundeven %30 : vector<8x128xf32>
    %cst_16 = arith.constant -1.280000e+02 : f32
    %cst_17 = arith.constant 1.270000e+02 : f32
    %32 = vector.broadcast %cst_16 : f32 to vector<8x128xf32>
    %33 = arith.maximumf %32, %31 : vector<8x128xf32>
    %34 = vector.broadcast %cst_17 : f32 to vector<8x128xf32>
    %35 = arith.minimumf %34, %33 : vector<8x128xf32>
    %cst_18 = arith.constant 2.000000e+00 : f32
    %36 = vector.broadcast %cst_18 : f32 to vector<8x128xf32>
    %37 = arith.mulf %35, %36 : vector<8x128xf32>
    %38 = arith.subf %37, %16 : vector<8x128xf32>
    %39 = arith.mulf %38, %38 : vector<8x128xf32>
    %40 = arith.addf %5, %39 : vector<8x128xf32>
    %cst_19 = arith.constant 0.333333343 : f32
    %41 = vector.broadcast %cst_19 : f32 to vector<8x128xf32>
    %42 = arith.mulf %16, %41 : vector<8x128xf32>
    %43 = math.roundeven %42 : vector<8x128xf32>
    %cst_20 = arith.constant -1.280000e+02 : f32
    %cst_21 = arith.constant 1.270000e+02 : f32
    %44 = vector.broadcast %cst_20 : f32 to vector<8x128xf32>
    %45 = arith.maximumf %44, %43 : vector<8x128xf32>
    %46 = vector.broadcast %cst_21 : f32 to vector<8x128xf32>
    %47 = arith.minimumf %46, %45 : vector<8x128xf32>
    %cst_22 = arith.constant 3.000000e+00 : f32
    %48 = vector.broadcast %cst_22 : f32 to vector<8x128xf32>
    %49 = arith.mulf %47, %48 : vector<8x128xf32>
    %50 = arith.subf %49, %16 : vector<8x128xf32>
    %51 = arith.mulf %50, %50 : vector<8x128xf32>
    %52 = arith.addf %6, %51 : vector<8x128xf32>
    %cst_23 = arith.constant 2.500000e-01 : f32
    %53 = vector.broadcast %cst_23 : f32 to vector<8x128xf32>
    %54 = arith.mulf %16, %53 : vector<8x128xf32>
    %55 = math.roundeven %54 : vector<8x128xf32>
    %cst_24 = arith.constant -1.280000e+02 : f32
    %cst_25 = arith.constant 1.270000e+02 : f32
    %56 = vector.broadcast %cst_24 : f32 to vector<8x128xf32>
    %57 = arith.maximumf %56, %55 : vector<8x128xf32>
    %58 = vector.broadcast %cst_25 : f32 to vector<8x128xf32>
    %59 = arith.minimumf %58, %57 : vector<8x128xf32>
    %cst_26 = arith.constant 4.000000e+00 : f32
    %60 = vector.broadcast %cst_26 : f32 to vector<8x128xf32>
    %61 = arith.mulf %59, %60 : vector<8x128xf32>
    %62 = arith.subf %61, %16 : vector<8x128xf32>
    %63 = arith.mulf %62, %62 : vector<8x128xf32>
    %64 = arith.addf %7, %63 : vector<8x128xf32>
    %cst_27 = arith.constant 2.000000e-01 : f32
    %65 = vector.broadcast %cst_27 : f32 to vector<8x128xf32>
    %66 = arith.mulf %16, %65 : vector<8x128xf32>
    %67 = math.roundeven %66 : vector<8x128xf32>
    %cst_28 = arith.constant -1.280000e+02 : f32
    %cst_29 = arith.constant 1.270000e+02 : f32
    %68 = vector.broadcast %cst_28 : f32 to vector<8x128xf32>
    %69 = arith.maximumf %68, %67 : vector<8x128xf32>
    %70 = vector.broadcast %cst_29 : f32 to vector<8x128xf32>
    %71 = arith.minimumf %70, %69 : vector<8x128xf32>
    %cst_30 = arith.constant 5.000000e+00 : f32
    %72 = vector.broadcast %cst_30 : f32 to vector<8x128xf32>
    %73 = arith.mulf %71, %72 : vector<8x128xf32>
    %74 = arith.subf %73, %16 : vector<8x128xf32>
    %75 = arith.mulf %74, %74 : vector<8x128xf32>
    %76 = arith.addf %8, %75 : vector<8x128xf32>
    %cst_31 = arith.constant 0.166666672 : f32
    %77 = vector.broadcast %cst_31 : f32 to vector<8x128xf32>
    %78 = arith.mulf %16, %77 : vector<8x128xf32>
    %79 = math.roundeven %78 : vector<8x128xf32>
    %cst_32 = arith.constant -1.280000e+02 : f32
    %cst_33 = arith.constant 1.270000e+02 : f32
    %80 = vector.broadcast %cst_32 : f32 to vector<8x128xf32>
    %81 = arith.maximumf %80, %79 : vector<8x128xf32>
    %82 = vector.broadcast %cst_33 : f32 to vector<8x128xf32>
    %83 = arith.minimumf %82, %81 : vector<8x128xf32>
    %cst_34 = arith.constant 6.000000e+00 : f32
    %84 = vector.broadcast %cst_34 : f32 to vector<8x128xf32>
    %85 = arith.mulf %83, %84 : vector<8x128xf32>
    %86 = arith.subf %85, %16 : vector<8x128xf32>
    %87 = arith.mulf %86, %86 : vector<8x128xf32>
    %88 = arith.addf %9, %87 : vector<8x128xf32>
    %cst_35 = arith.constant 0.142857149 : f32
    %89 = vector.broadcast %cst_35 : f32 to vector<8x128xf32>
    %90 = arith.mulf %16, %89 : vector<8x128xf32>
    %91 = math.roundeven %90 : vector<8x128xf32>
    %cst_36 = arith.constant -1.280000e+02 : f32
    %cst_37 = arith.constant 1.270000e+02 : f32
    %92 = vector.broadcast %cst_36 : f32 to vector<8x128xf32>
    %93 = arith.maximumf %92, %91 : vector<8x128xf32>
    %94 = vector.broadcast %cst_37 : f32 to vector<8x128xf32>
    %95 = arith.minimumf %94, %93 : vector<8x128xf32>
    %cst_38 = arith.constant 7.000000e+00 : f32
    %96 = vector.broadcast %cst_38 : f32 to vector<8x128xf32>
    %97 = arith.mulf %95, %96 : vector<8x128xf32>
    %98 = arith.subf %97, %16 : vector<8x128xf32>
    %99 = arith.mulf %98, %98 : vector<8x128xf32>
    %100 = arith.addf %10, %99 : vector<8x128xf32>
    %cst_39 = arith.constant 1.250000e-01 : f32
    %101 = vector.broadcast %cst_39 : f32 to vector<8x128xf32>
    %102 = arith.mulf %16, %101 : vector<8x128xf32>
    %103 = math.roundeven %102 : vector<8x128xf32>
    %cst_40 = arith.constant -1.280000e+02 : f32
    %cst_41 = arith.constant 1.270000e+02 : f32
    %104 = vector.broadcast %cst_40 : f32 to vector<8x128xf32>
    %105 = arith.maximumf %104, %103 : vector<8x128xf32>
    %106 = vector.broadcast %cst_41 : f32 to vector<8x128xf32>
    %107 = arith.minimumf %106, %105 : vector<8x128xf32>
    %cst_42 = arith.constant 8.000000e+00 : f32
    %108 = vector.broadcast %cst_42 : f32 to vector<8x128xf32>
    %109 = arith.mulf %107, %108 : vector<8x128xf32>
    %110 = arith.subf %109, %16 : vector<8x128xf32>
    %111 = arith.mulf %110, %110 : vector<8x128xf32>
    %112 = arith.addf %11, %111 : vector<8x128xf32>
    %c1_i32 = arith.constant 1 : i32
    %c0_43 = arith.constant 0 : index
    %c0_44 = arith.constant 0 : index
    %c0_45 = arith.constant 0 : index
    %c0_46 = arith.constant 0 : index
    %113 = vector.load %arg4[%c0_43, %c0_44, %c0_45, %c0_46] : memref<1x128x8x128xf32, #tpu.memory_space<vmem>>, vector<1x1x8x128xf32>
    %114 = vector.shape_cast %113 : vector<1x1x8x128xf32> to vector<8x128xf32>
    %115 = arith.addf %114, %28 : vector<8x128xf32>
    %c0_47 = arith.constant 0 : index
    %c0_48 = arith.constant 0 : index
    %c0_49 = arith.constant 0 : index
    %c0_50 = arith.constant 0 : index
    %116 = vector.load %arg4[%c0_47, %c0_48, %c0_49, %c0_50] : memref<1x128x8x128xf32, #tpu.memory_space<vmem>>, vector<1x1x8x128xf32>
    %117 = vector.shape_cast %116 : vector<1x1x8x128xf32> to vector<8x128xf32>
    %118 = vector.shape_cast %115 : vector<8x128xf32> to vector<1x1x8x128xf32>
    tpu.vector_store %arg4[%c0_47, %c0_48, %c0_49, %c0_50], %118 {strides = array<i32>} : memref<1x128x8x128xf32, #tpu.memory_space<vmem>>, vector<1x1x8x128xf32>,
    %c0_51 = arith.constant 0 : index
    %c1 = arith.constant 1 : index
    %c0_52 = arith.constant 0 : index
    %c0_53 = arith.constant 0 : index
    %119 = vector.load %arg4[%c0_51, %c1, %c0_52, %c0_53] : memref<1x128x8x128xf32, #tpu.memory_space<vmem>>, vector<1x1x8x128xf32>
    %120 = vector.shape_cast %119 : vector<1x1x8x128xf32> to vector<8x128xf32>
    %121 = arith.addf %120, %40 : vector<8x128xf32>
    %c0_54 = arith.constant 0 : index
    %c1_55 = arith.constant 1 : index
    %c0_56 = arith.constant 0 : index
    %c0_57 = arith.constant 0 : index
    %122 = vector.load %arg4[%c0_54, %c1_55, %c0_56, %c0_57] : memref<1x128x8x128xf32, #tpu.memory_space<vmem>>, vector<1x1x8x128xf32>
    %123 = vector.shape_cast %122 : vector<1x1x8x128xf32> to vector<8x128xf32>
    %124 = vector.shape_cast %121 : vector<8x128xf32> to vector<1x1x8x128xf32>
    tpu.vector_store %arg4[%c0_54, %c1_55, %c0_56, %c0_57], %124 {strides = array<i32>} : memref<1x128x8x128xf32, #tpu.memory_space<vmem>>, vector<1x1x8x128xf32>,
    %c0_58 = arith.constant 0 : index
    %c2 = arith.constant 2 : index
    %c0_59 = arith.constant 0 : index
    %c0_60 = arith.constant 0 : index
    %125 = vector.load %arg4[%c0_58, %c2, %c0_59, %c0_60] : memref<1x128x8x128xf32, #tpu.memory_space<vmem>>, vector<1x1x8x128xf32>
    %126 = vector.shape_cast %125 : vector<1x1x8x128xf32> to vector<8x128xf32>
    %127 = arith.addf %126, %52 : vector<8x128xf32>
    %c0_61 = arith.constant 0 : index
    %c2_62 = arith.constant 2 : index
    %c0_63 = arith.constant 0 : index
    %c0_64 = arith.constant 0 : index
    %128 = vector.load %arg4[%c0_61, %c2_62, %c0_63, %c0_64] : memref<1x128x8x128xf32, #tpu.memory_space<vmem>>, vector<1x1x8x128xf32>
    %129 = vector.shape_cast %128 : vector<1x1x8x128xf32> to vector<8x128xf32>
    %130 = vector.shape_cast %127 : vector<8x128xf32> to vector<1x1x8x128xf32>
    tpu.vector_store %arg4[%c0_61, %c2_62, %c0_63, %c0_64], %130 {strides = array<i32>} : memref<1x128x8x128xf32, #tpu.memory_space<vmem>>, vector<1x1x8x128xf32>,
    %c0_65 = arith.constant 0 : index
    %c3 = arith.constant 3 : index
    %c0_66 = arith.constant 0 : index
    %c0_67 = arith.constant 0 : index
    %131 = vector.load %arg4[%c0_65, %c3, %c0_66, %c0_67] : memref<1x128x8x128xf32, #tpu.memory_space<vmem>>, vector<1x1x8x128xf32>
    %132 = vector.shape_cast %131 : vector<1x1x8x128xf32> to vector<8x128xf32>
    %133 = arith.addf %132, %64 : vector<8x128xf32>
    %c0_68 = arith.constant 0 : index
    %c3_69 = arith.constant 3 : index
    %c0_70 = arith.constant 0 : index
    %c0_71 = arith.constant 0 : index
    %134 = vector.load %arg4[%c0_68, %c3_69, %c0_70, %c0_71] : memref<1x128x8x128xf32, #tpu.memory_space<vmem>>, vector<1x1x8x128xf32>
    %135 = vector.shape_cast %134 : vector<1x1x8x128xf32> to vector<8x128xf32>
    %136 = vector.shape_cast %133 : vector<8x128xf32> to vector<1x1x8x128xf32>
    tpu.vector_store %arg4[%c0_68, %c3_69, %c0_70, %c0_71], %136 {strides = array<i32>} : memref<1x128x8x128xf32, #tpu.memory_space<vmem>>, vector<1x1x8x128xf32>,
    %c0_72 = arith.constant 0 : index
    %c4 = arith.constant 4 : index
    %c0_73 = arith.constant 0 : index
    %c0_74 = arith.constant 0 : index
    %137 = vector.load %arg4[%c0_72, %c4, %c0_73, %c0_74] : memref<1x128x8x128xf32, #tpu.memory_space<vmem>>, vector<1x1x8x128xf32>
    %138 = vector.shape_cast %137 : vector<1x1x8x128xf32> to vector<8x128xf32>
    %139 = arith.addf %138, %76 : vector<8x128xf32>
    %c0_75 = arith.constant 0 : index
    %c4_76 = arith.constant 4 : index
    %c0_77 = arith.constant 0 : index
    %c0_78 = arith.constant 0 : index
    %140 = vector.load %arg4[%c0_75, %c4_76, %c0_77, %c0_78] : memref<1x128x8x128xf32, #tpu.memory_space<vmem>>, vector<1x1x8x128xf32>
    %141 = vector.shape_cast %140 : vector<1x1x8x128xf32> to vector<8x128xf32>
    %142 = vector.shape_cast %139 : vector<8x128xf32> to vector<1x1x8x128xf32>
    tpu.vector_store %arg4[%c0_75, %c4_76, %c0_77, %c0_78], %142 {strides = array<i32>} : memref<1x128x8x128xf32, #tpu.memory_space<vmem>>, vector<1x1x8x128xf32>,
    %c0_79 = arith.constant 0 : index
    %c5 = arith.constant 5 : index
    %c0_80 = arith.constant 0 : index
    %c0_81 = arith.constant 0 : index
    %143 = vector.load %arg4[%c0_79, %c5, %c0_80, %c0_81] : memref<1x128x8x128xf32, #tpu.memory_space<vmem>>, vector<1x1x8x128xf32>
    %144 = vector.shape_cast %143 : vector<1x1x8x128xf32> to vector<8x128xf32>
    %145 = arith.addf %144, %88 : vector<8x128xf32>
    %c0_82 = arith.constant 0 : index
    %c5_83 = arith.constant 5 : index
    %c0_84 = arith.constant 0 : index
    %c0_85 = arith.constant 0 : index
    %146 = vector.load %arg4[%c0_82, %c5_83, %c0_84, %c0_85] : memref<1x128x8x128xf32, #tpu.memory_space<vmem>>, vector<1x1x8x128xf32>
    %147 = vector.shape_cast %146 : vector<1x1x8x128xf32> to vector<8x128xf32>
    %148 = vector.shape_cast %145 : vector<8x128xf32> to vector<1x1x8x128xf32>
    tpu.vector_store %arg4[%c0_82, %c5_83, %c0_84, %c0_85], %148 {strides = array<i32>} : memref<1x128x8x128xf32, #tpu.memory_space<vmem>>, vector<1x1x8x128xf32>,
    %c0_86 = arith.constant 0 : index
    %c6 = arith.constant 6 : index
    %c0_87 = arith.constant 0 : index
    %c0_88 = arith.constant 0 : index
    %149 = vector.load %arg4[%c0_86, %c6, %c0_87, %c0_88] : memref<1x128x8x128xf32, #tpu.memory_space<vmem>>, vector<1x1x8x128xf32>
    %150 = vector.shape_cast %149 : vector<1x1x8x128xf32> to vector<8x128xf32>
    %151 = arith.addf %150, %100 : vector<8x128xf32>
    %c0_89 = arith.constant 0 : index
    %c6_90 = arith.constant 6 : index
    %c0_91 = arith.constant 0 : index
    %c0_92 = arith.constant 0 : index
    %152 = vector.load %arg4[%c0_89, %c6_90, %c0_91, %c0_92] : memref<1x128x8x128xf32, #tpu.memory_space<vmem>>, vector<1x1x8x128xf32>
    %153 = vector.shape_cast %152 : vector<1x1x8x128xf32> to vector<8x128xf32>
    %154 = vector.shape_cast %151 : vector<8x128xf32> to vector<1x1x8x128xf32>
    tpu.vector_store %arg4[%c0_89, %c6_90, %c0_91, %c0_92], %154 {strides = array<i32>} : memref<1x128x8x128xf32, #tpu.memory_space<vmem>>, vector<1x1x8x128xf32>,
    %c0_93 = arith.constant 0 : index
    %c7 = arith.constant 7 : index
    %c0_94 = arith.constant 0 : index
    %c0_95 = arith.constant 0 : index
    %155 = vector.load %arg4[%c0_93, %c7, %c0_94, %c0_95] : memref<1x128x8x128xf32, #tpu.memory_space<vmem>>, vector<1x1x8x128xf32>
    %156 = vector.shape_cast %155 : vector<1x1x8x128xf32> to vector<8x128xf32>
    %157 = arith.addf %156, %112 : vector<8x128xf32>
    %c0_96 = arith.constant 0 : index
    %c7_97 = arith.constant 7 : index
    %c0_98 = arith.constant 0 : index
    %c0_99 = arith.constant 0 : index
    %158 = vector.load %arg4[%c0_96, %c7_97, %c0_98, %c0_99] : memref<1x128x8x128xf32, #tpu.memory_space<vmem>>, vector<1x1x8x128xf32>
    %159 = vector.shape_cast %158 : vector<1x1x8x128xf32> to vector<8x128xf32>
    %160 = vector.shape_cast %157 : vector<8x128xf32> to vector<1x1x8x128xf32>
    tpu.vector_store %arg4[%c0_96, %c7_97, %c0_98, %c0_99], %160 {strides = array<i32>} : memref<1x128x8x128xf32, #tpu.memory_space<vmem>>, vector<1x1x8x128xf32>,
    %cst_100 = arith.constant 0.000000e+00 : f32
    %161 = vector.broadcast %cst_100 : f32 to vector<8x128xf32>
    %cst_101 = arith.constant 0.000000e+00 : f32
    %162 = vector.broadcast %cst_101 : f32 to vector<8x128xf32>
    %cst_102 = arith.constant 0.000000e+00 : f32
    %163 = vector.broadcast %cst_102 : f32 to vector<8x128xf32>
    %cst_103 = arith.constant 0.000000e+00 : f32
    %164 = vector.broadcast %cst_103 : f32 to vector<8x128xf32>
    %cst_104 = arith.constant 0.000000e+00 : f32
    %165 = vector.broadcast %cst_104 : f32 to vector<8x128xf32>
    %cst_105 = arith.constant 0.000000e+00 : f32
    %166 = vector.broadcast %cst_105 : f32 to vector<8x128xf32>
    %cst_106 = arith.constant 0.000000e+00 : f32
    %167 = vector.broadcast %cst_106 : f32 to vector<8x128xf32>
    %cst_107 = arith.constant 0.000000e+00 : f32
    %168 = vector.broadcast %cst_107 : f32 to vector<8x128xf32>
    %c0_i32_108 = arith.constant 0 : i32
    %c128_i32_109 = arith.constant 128 : i32
    %169 = arith.muli %c0_i32_108, %c128_i32_109 : i32
    %170 = tpu.assume_multiple %169, 128 : i32
    %c0_110 = arith.constant 0 : index
    %171 = arith.index_cast %170 : i32 to index
    %172 = vector.load %arg2[%c0_110, %171] : memref<8x128xf32, #tpu.memory_space<vmem>>, vector<8x128xf32>
    %173 = arith.mulf %172, %3 : vector<8x128xf32>
    %cst_111 = arith.constant 0.111111112 : f32
    %174 = vector.broadcast %cst_111 : f32 to vector<8x128xf32>
    %175 = arith.mulf %173, %174 : vector<8x128xf32>
    %176 = math.roundeven %175 : vector<8x128xf32>
    %cst_112 = arith.constant -1.280000e+02 : f32
    %cst_113 = arith.constant 1.270000e+02 : f32
    %177 = vector.broadcast %cst_112 : f32 to vector<8x128xf32>
    %178 = arith.maximumf %177, %176 : vector<8x128xf32>
    %179 = vector.broadcast %cst_113 : f32 to vector<8x128xf32>
    %180 = arith.minimumf %179, %178 : vector<8x128xf32>
    %cst_114 = arith.constant 9.000000e+00 : f32
    %181 = vector.broadcast %cst_114 : f32 to vector<8x128xf32>
    %182 = arith.mulf %180, %181 : vector<8x128xf32>
    %183 = arith.subf %182, %173 : vector<8x128xf32>
    %184 = arith.mulf %183, %183 : vector<8x128xf32>
    %185 = arith.addf %161, %184 : vector<8x128xf32>
    %cst_115 = arith.constant 1.000000e-01 : f32
    %186 = vector.broadcast %cst_115 : f32 to vector<8x128xf32>
    %187 = arith.mulf %173, %186 : vector<8x128xf32>
    %188 = math.roundeven %187 : vector<8x128xf32>
    %cst_116 = arith.constant -1.280000e+02 : f32
    %cst_117 = arith.constant 1.270000e+02 : f32
    %189 = vector.broadcast %cst_116 : f32 to vector<8x128xf32>
    %190 = arith.maximumf %189, %188 : vector<8x128xf32>
    %191 = vector.broadcast %cst_117 : f32 to vector<8x128xf32>
    %192 = arith.minimumf %191, %190 : vector<8x128xf32>
    %cst_118 = arith.constant 1.000000e+01 : f32
    %193 = vector.broadcast %cst_118 : f32 to vector<8x128xf32>
    %194 = arith.mulf %192, %193 : vector<8x128xf32>
    %195 = arith.subf %194, %173 : vector<8x128xf32>
    %196 = arith.mulf %195, %195 : vector<8x128xf32>
    %197 = arith.addf %162, %196 : vector<8x128xf32>
    %cst_119 = arith.constant 0.0909090936 : f32
    %198 = vector.broadcast %cst_119 : f32 to vector<8x128xf32>
    %199 = arith.mulf %173, %198 : vector<8x128xf32>
    %200 = math.roundeven %199 : vector<8x128xf32>
    %cst_120 = arith.constant -1.280000e+02 : f32
    %cst_121 = arith.constant 1.270000e+02 : f32
    %201 = vector.broadcast %cst_120 : f32 to vector<8x128xf32>
    %202 = arith.maximumf %201, %200 : vector<8x128xf32>
    %203 = vector.broadcast %cst_121 : f32 to vector<8x128xf32>
    %204 = arith.minimumf %203, %202 : vector<8x128xf32>
    %cst_122 = arith.constant 1.100000e+01 : f32
    %205 = vector.broadcast %cst_122 : f32 to vector<8x128xf32>
    %206 = arith.mulf %204, %205 : vector<8x128xf32>
    %207 = arith.subf %206, %173 : vector<8x128xf32>
    %208 = arith.mulf %207, %207 : vector<8x128xf32>
    %209 = arith.addf %163, %208 : vector<8x128xf32>
    %cst_123 = arith.constant 0.0833333358 : f32
    %210 = vector.broadcast %cst_123 : f32 to vector<8x128xf32>
    %211 = arith.mulf %173, %210 : vector<8x128xf32>
    %212 = math.roundeven %211 : vector<8x128xf32>
    %cst_124 = arith.constant -1.280000e+02 : f32
    %cst_125 = arith.constant 1.270000e+02 : f32
    %213 = vector.broadcast %cst_124 : f32 to vector<8x128xf32>
    %214 = arith.maximumf %213, %212 : vector<8x128xf32>
    %215 = vector.broadcast %cst_125 : f32 to vector<8x128xf32>
    %216 = arith.minimumf %215, %214 : vector<8x128xf32>
    %cst_126 = arith.constant 1.200000e+01 : f32
    %217 = vector.broadcast %cst_126 : f32 to vector<8x128xf32>
    %218 = arith.mulf %216, %217 : vector<8x128xf32>
    %219 = arith.subf %218, %173 : vector<8x128xf32>
    %220 = arith.mulf %219, %219 : vector<8x128xf32>
    %221 = arith.addf %164, %220 : vector<8x128xf32>
    %cst_127 = arith.constant 0.0769230798 : f32
    %222 = vector.broadcast %cst_127 : f32 to vector<8x128xf32>
    %223 = arith.mulf %173, %222 : vector<8x128xf32>
    %224 = math.roundeven %223 : vector<8x128xf32>
    %cst_128 = arith.constant -1.280000e+02 : f32
    %cst_129 = arith.constant 1.270000e+02 : f32
    %225 = vector.broadcast %cst_128 : f32 to vector<8x128xf32>
    %226 = arith.maximumf %225, %224 : vector<8x128xf32>
    %227 = vector.broadcast %cst_129 : f32 to vector<8x128xf32>
    %228 = arith.minimumf %227, %226 : vector<8x128xf32>
    %cst_130 = arith.constant 1.300000e+01 : f32
    %229 = vector.broadcast %cst_130 : f32 to vector<8x128xf32>
    %230 = arith.mulf %228, %229 : vector<8x128xf32>
    %231 = arith.subf %230, %173 : vector<8x128xf32>
    %232 = arith.mulf %231, %231 : vector<8x128xf32>
    %233 = arith.addf %165, %232 : vector<8x128xf32>
    %cst_131 = arith.constant 0.0714285746 : f32
    %234 = vector.broadcast %cst_131 : f32 to vector<8x128xf32>
    %235 = arith.mulf %173, %234 : vector<8x128xf32>
    %236 = math.roundeven %235 : vector<8x128xf32>
    %cst_132 = arith.constant -1.280000e+02 : f32
    %cst_133 = arith.constant 1.270000e+02 : f32
    %237 = vector.broadcast %cst_132 : f32 to vector<8x128xf32>
    %238 = arith.maximumf %237, %236 : vector<8x128xf32>
    %239 = vector.broadcast %cst_133 : f32 to vector<8x128xf32>
    %240 = arith.minimumf %239, %238 : vector<8x128xf32>
    %cst_134 = arith.constant 1.400000e+01 : f32
    %241 = vector.broadcast %cst_134 : f32 to vector<8x128xf32>
    %242 = arith.mulf %240, %241 : vector<8x128xf32>
    %243 = arith.subf %242, %173 : vector<8x128xf32>
    %244 = arith.mulf %243, %243 : vector<8x128xf32>
    %245 = arith.addf %166, %244 : vector<8x128xf32>
    %cst_135 = arith.constant 0.0666666701 : f32
    %246 = vector.broadcast %cst_135 : f32 to vector<8x128xf32>
    %247 = arith.mulf %173, %246 : vector<8x128xf32>
    %248 = math.roundeven %247 : vector<8x128xf32>
    %cst_136 = arith.constant -1.280000e+02 : f32
    %cst_137 = arith.constant 1.270000e+02 : f32
    %249 = vector.broadcast %cst_136 : f32 to vector<8x128xf32>
    %250 = arith.maximumf %249, %248 : vector<8x128xf32>
    %251 = vector.broadcast %cst_137 : f32 to vector<8x128xf32>
    %252 = arith.minimumf %251, %250 : vector<8x128xf32>
    %cst_138 = arith.constant 1.500000e+01 : f32
    %253 = vector.broadcast %cst_138 : f32 to vector<8x128xf32>
    %254 = arith.mulf %252, %253 : vector<8x128xf32>
    %255 = arith.subf %254, %173 : vector<8x128xf32>
    %256 = arith.mulf %255, %255 : vector<8x128xf32>
    %257 = arith.addf %167, %256 : vector<8x128xf32>
    %cst_139 = arith.constant 6.250000e-02 : f32
    %258 = vector.broadcast %cst_139 : f32 to vector<8x128xf32>
    %259 = arith.mulf %173, %258 : vector<8x128xf32>
    %260 = math.roundeven %259 : vector<8x128xf32>
    %cst_140 = arith.constant -1.280000e+02 : f32
    %cst_141 = arith.constant 1.270000e+02 : f32
    %261 = vector.broadcast %cst_140 : f32 to vector<8x128xf32>
    %262 = arith.maximumf %261, %260 : vector<8x128xf32>
    %263 = vector.broadcast %cst_141 : f32 to vector<8x128xf32>
    %264 = arith.minimumf %263, %262 : vector<8x128xf32>
    %cst_142 = arith.constant 1.600000e+01 : f32
    %265 = vector.broadcast %cst_142 : f32 to vector<8x128xf32>
    %266 = arith.mulf %264, %265 : vector<8x128xf32>
    %267 = arith.subf %266, %173 : vector<8x128xf32>
    %268 = arith.mulf %267, %267 : vector<8x128xf32>
    %269 = arith.addf %168, %268 : vector<8x128xf32>
    %c1_i32_143 = arith.constant 1 : i32
    %c0_144 = arith.constant 0 : index
    %c8 = arith.constant 8 : index
    %c0_145 = arith.constant 0 : index
    %c0_146 = arith.constant 0 : index
    %270 = vector.load %arg4[%c0_144, %c8, %c0_145, %c0_146] : memref<1x128x8x128xf32, #tpu.memory_space<vmem>>, vector<1x1x8x128xf32>
    %271 = vector.shape_cast %270 : vector<1x1x8x128xf32> to vector<8x128xf32>
    %272 = arith.addf %271, %185 : vector<8x128xf32>
    %c0_147 = arith.constant 0 : index
    %c8_148 = arith.constant 8 : index
    %c0_149 = arith.constant 0 : index
    %c0_150 = arith.constant 0 : index
    %273 = vector.load %arg4[%c0_147, %c8_148, %c0_149, %c0_150] : memref<1x128x8x128xf32, #tpu.memory_space<vmem>>, vector<1x1x8x128xf32>
    %274 = vector.shape_cast %273 : vector<1x1x8x128xf32> to vector<8x128xf32>
    %275 = vector.shape_cast %272 : vector<8x128xf32> to vector<1x1x8x128xf32>
    tpu.vector_store %arg4[%c0_147, %c8_148, %c0_149, %c0_150], %275 {strides = array<i32>} : memref<1x128x8x128xf32, #tpu.memory_space<vmem>>, vector<1x1x8x128xf32>,
    %c0_151 = arith.constant 0 : index
    %c9 = arith.constant 9 : index
    %c0_152 = arith.constant 0 : index
    %c0_153 = arith.constant 0 : index
    %276 = vector.load %arg4[%c0_151, %c9, %c0_152, %c0_153] : memref<1x128x8x128xf32, #tpu.memory_space<vmem>>, vector<1x1x8x128xf32>
    %277 = vector.shape_cast %276 : vector<1x1x8x128xf32> to vector<8x128xf32>
    %278 = arith.addf %277, %197 : vector<8x128xf32>
    %c0_154 = arith.constant 0 : index
    %c9_155 = arith.constant 9 : index
    %c0_156 = arith.constant 0 : index
    %c0_157 = arith.constant 0 : index
    %279 = vector.load %arg4[%c0_154, %c9_155, %c0_156, %c0_157] : memref<1x128x8x128xf32, #tpu.memory_space<vmem>>, vector<1x1x8x128xf32>
    %280 = vector.shape_cast %279 : vector<1x1x8x128xf32> to vector<8x128xf32>
    %281 = vector.shape_cast %278 : vector<8x128xf32> to vector<1x1x8x128xf32>
    tpu.vector_store %arg4[%c0_154, %c9_155, %c0_156, %c0_157], %281 {strides = array<i32>} : memref<1x128x8x128xf32, #tpu.memory_space<vmem>>, vector<1x1x8x128xf32>,
    %c0_158 = arith.constant 0 : index
    %c10 = arith.constant 10 : index
    %c0_159 = arith.constant 0 : index
    %c0_160 = arith.constant 0 : index
    %282 = vector.load %arg4[%c0_158, %c10, %c0_159, %c0_160] : memref<1x128x8x128xf32, #tpu.memory_space<vmem>>, vector<1x1x8x128xf32>
    %283 = vector.shape_cast %282 : vector<1x1x8x128xf32> to vector<8x128xf32>
    %284 = arith.addf %283, %209 : vector<8x128xf32>
    %c0_161 = arith.constant 0 : index
    %c10_162 = arith.constant 10 : index
    %c0_163 = arith.constant 0 : index
    %c0_164 = arith.constant 0 : index
    %285 = vector.load %arg4[%c0_161, %c10_162, %c0_163, %c0_164] : memref<1x128x8x128xf32, #tpu.memory_space<vmem>>, vector<1x1x8x128xf32>
    %286 = vector.shape_cast %285 : vector<1x1x8x128xf32> to vector<8x128xf32>
    %287 = vector.shape_cast %284 : vector<8x128xf32> to vector<1x1x8x128xf32>
    tpu.vector_store %arg4[%c0_161, %c10_162, %c0_163, %c0_164], %287 {strides = array<i32>} : memref<1x128x8x128xf32, #tpu.memory_space<vmem>>, vector<1x1x8x128xf32>,
    %c0_165 = arith.constant 0 : index
    %c11 = arith.constant 11 : index
    %c0_166 = arith.constant 0 : index
    %c0_167 = arith.constant 0 : index
    %288 = vector.load %arg4[%c0_165, %c11, %c0_166, %c0_167] : memref<1x128x8x128xf32, #tpu.memory_space<vmem>>, vector<1x1x8x128xf32>
    %289 = vector.shape_cast %288 : vector<1x1x8x128xf32> to vector<8x128xf32>
    %290 = arith.addf %289, %221 : vector<8x128xf32>
    %c0_168 = arith.constant 0 : index
    %c11_169 = arith.constant 11 : index
    %c0_170 = arith.constant 0 : index
    %c0_171 = arith.constant 0 : index
    %291 = vector.load %arg4[%c0_168, %c11_169, %c0_170, %c0_171] : memref<1x128x8x128xf32, #tpu.memory_space<vmem>>, vector<1x1x8x128xf32>
    %292 = vector.shape_cast %291 : vector<1x1x8x128xf32> to vector<8x128xf32>
    %293 = vector.shape_cast %290 : vector<8x128xf32> to vector<1x1x8x128xf32>
    tpu.vector_store %arg4[%c0_168, %c11_169, %c0_170, %c0_171], %293 {strides = array<i32>} : memref<1x128x8x128xf32, #tpu.memory_space<vmem>>, vector<1x1x8x128xf32>,
    %c0_172 = arith.constant 0 : index
    %c12 = arith.constant 12 : index
    %c0_173 = arith.constant 0 : index
    %c0_174 = arith.constant 0 : index
    %294 = vector.load %arg4[%c0_172, %c12, %c0_173, %c0_174] : memref<1x128x8x128xf32, #tpu.memory_space<vmem>>, vector<1x1x8x128xf32>
    %295 = vector.shape_cast %294 : vector<1x1x8x128xf32> to vector<8x128xf32>
    %296 = arith.addf %295, %233 : vector<8x128xf32>
    %c0_175 = arith.constant 0 : index
    %c12_176 = arith.constant 12 : index
    %c0_177 = arith.constant 0 : index
    %c0_178 = arith.constant 0 : index
    %297 = vector.load %arg4[%c0_175, %c12_176, %c0_177, %c0_178] : memref<1x128x8x128xf32, #tpu.memory_space<vmem>>, vector<1x1x8x128xf32>
    %298 = vector.shape_cast %297 : vector<1x1x8x128xf32> to vector<8x128xf32>
    %299 = vector.shape_cast %296 : vector<8x128xf32> to vector<1x1x8x128xf32>
    tpu.vector_store %arg4[%c0_175, %c12_176, %c0_177, %c0_178], %299 {strides = array<i32>} : memref<1x128x8x128xf32, #tpu.memory_space<vmem>>, vector<1x1x8x128xf32>,
    %c0_179 = arith.constant 0 : index
    %c13 = arith.constant 13 : index
    %c0_180 = arith.constant 0 : index
    %c0_181 = arith.constant 0 : index
    %300 = vector.load %arg4[%c0_179, %c13, %c0_180, %c0_181] : memref<1x128x8x128xf32, #tpu.memory_space<vmem>>, vector<1x1x8x128xf32>
    %301 = vector.shape_cast %300 : vector<1x1x8x128xf32> to vector<8x128xf32>
    %302 = arith.addf %301, %245 : vector<8x128xf32>
    %c0_182 = arith.constant 0 : index
    %c13_183 = arith.constant 13 : index
    %c0_184 = arith.constant 0 : index
    %c0_185 = arith.constant 0 : index
    %303 = vector.load %arg4[%c0_182, %c13_183, %c0_184, %c0_185] : memref<1x128x8x128xf32, #tpu.memory_space<vmem>>, vector<1x1x8x128xf32>
    %304 = vector.shape_cast %303 : vector<1x1x8x128xf32> to vector<8x128xf32>
    %305 = vector.shape_cast %302 : vector<8x128xf32> to vector<1x1x8x128xf32>
    tpu.vector_store %arg4[%c0_182, %c13_183, %c0_184, %c0_185], %305 {strides = array<i32>} : memref<1x128x8x128xf32, #tpu.memory_space<vmem>>, vector<1x1x8x128xf32>,
    %c0_186 = arith.constant 0 : index
    %c14 = arith.constant 14 : index
    %c0_187 = arith.constant 0 : index
    %c0_188 = arith.constant 0 : index
    %306 = vector.load %arg4[%c0_186, %c14, %c0_187, %c0_188] : memref<1x128x8x128xf32, #tpu.memory_space<vmem>>, vector<1x1x8x128xf32>
    %307 = vector.shape_cast %306 : vector<1x1x8x128xf32> to vector<8x128xf32>
    %308 = arith.addf %307, %257 : vector<8x128xf32>
    %c0_189 = arith.constant 0 : index
    %c14_190 = arith.constant 14 : index
    %c0_191 = arith.constant 0 : index
    %c0_192 = arith.constant 0 : index
    %309 = vector.load %arg4[%c0_189, %c14_190, %c0_191, %c0_192] : memref<1x128x8x128xf32, #tpu.memory_space<vmem>>, vector<1x1x8x128xf32>
    %310 = vector.shape_cast %309 : vector<1x1x8x128xf32> to vector<8x128xf32>
    %311 = vector.shape_cast %308 : vector<8x128xf32> to vector<1x1x8x128xf32>
    tpu.vector_store %arg4[%c0_189, %c14_190, %c0_191, %c0_192], %311 {strides = array<i32>} : memref<1x128x8x128xf32, #tpu.memory_space<vmem>>, vector<1x1x8x128xf32>,
    %c0_193 = arith.constant 0 : index
    %c15 = arith.constant 15 : index
    %c0_194 = arith.constant 0 : index
    %c0_195 = arith.constant 0 : index
    %312 = vector.load %arg4[%c0_193, %c15, %c0_194, %c0_195] : memref<1x128x8x128xf32, #tpu.memory_space<vmem>>, vector<1x1x8x128xf32>
    %313 = vector.shape_cast %312 : vector<1x1x8x128xf32> to vector<8x128xf32>
    %314 = arith.addf %313, %269 : vector<8x128xf32>
    %c0_196 = arith.constant 0 : index
    %c15_197 = arith.constant 15 : index
    %c0_198 = arith.constant 0 : index
    %c0_199 = arith.constant 0 : index
    %315 = vector.load %arg4[%c0_196, %c15_197, %c0_198, %c0_199] : memref<1x128x8x128xf32, #tpu.memory_space<vmem>>, vector<1x1x8x128xf32>
    %316 = vector.shape_cast %315 : vector<1x1x8x128xf32> to vector<8x128xf32>
    %317 = vector.shape_cast %314 : vector<8x128xf32> to vector<1x1x8x128xf32>
    tpu.vector_store %arg4[%c0_196, %c15_197, %c0_198, %c0_199], %317 {strides = array<i32>} : memref<1x128x8x128xf32, #tpu.memory_space<vmem>>, vector<1x1x8x128xf32>,
    %cst_200 = arith.constant 0.000000e+00 : f32
    %318 = vector.broadcast %cst_200 : f32 to vector<8x128xf32>
    %cst_201 = arith.constant 0.000000e+00 : f32
    %319 = vector.broadcast %cst_201 : f32 to vector<8x128xf32>
    %cst_202 = arith.constant 0.000000e+00 : f32
    %320 = vector.broadcast %cst_202 : f32 to vector<8x128xf32>
    %cst_203 = arith.constant 0.000000e+00 : f32
    %321 = vector.broadcast %cst_203 : f32 to vector<8x128xf32>
    %cst_204 = arith.constant 0.000000e+00 : f32
    %322 = vector.broadcast %cst_204 : f32 to vector<8x128xf32>
    %cst_205 = arith.constant 0.000000e+00 : f32
    %323 = vector.broadcast %cst_205 : f32 to vector<8x128xf32>
    %cst_206 = arith.constant 0.000000e+00 : f32
    %324 = vector.broadcast %cst_206 : f32 to vector<8x128xf32>
    %cst_207 = arith.constant 0.000000e+00 : f32
    %325 = vector.broadcast %cst_207 : f32 to vector<8x128xf32>
    %c0_i32_208 = arith.constant 0 : i32
    %c128_i32_209 = arith.constant 128 : i32
    %326 = arith.muli %c0_i32_208, %c128_i32_209 : i32
    %327 = tpu.assume_multiple %326, 128 : i32
    %c0_210 = arith.constant 0 : index
    %328 = arith.index_cast %327 : i32 to index
    %329 = vector.load %arg2[%c0_210, %328] : memref<8x128xf32, #tpu.memory_space<vmem>>, vector<8x128xf32>
    %330 = arith.mulf %329, %3 : vector<8x128xf32>
    %cst_211 = arith.constant 0.0588235296 : f32
    %331 = vector.broadcast %cst_211 : f32 to vector<8x128xf32>
    %332 = arith.mulf %330, %331 : vector<8x128xf32>
    %333 = math.roundeven %332 : vector<8x128xf32>
    %cst_212 = arith.constant -1.280000e+02 : f32
    %cst_213 = arith.constant 1.270000e+02 : f32
    %334 = vector.broadcast %cst_212 : f32 to vector<8x128xf32>
    %335 = arith.maximumf %334, %333 : vector<8x128xf32>
    %336 = vector.broadcast %cst_213 : f32 to vector<8x128xf32>
    %337 = arith.minimumf %336, %335 : vector<8x128xf32>
    %cst_214 = arith.constant 1.700000e+01 : f32
    %338 = vector.broadcast %cst_214 : f32 to vector<8x128xf32>
    %339 = arith.mulf %337, %338 : vector<8x128xf32>
    %340 = arith.subf %339, %330 : vector<8x128xf32>
    %341 = arith.mulf %340, %340 : vector<8x128xf32>
    %342 = arith.addf %318, %341 : vector<8x128xf32>
    %cst_215 = arith.constant 0.055555556 : f32
    %343 = vector.broadcast %cst_215 : f32 to vector<8x128xf32>
    %344 = arith.mulf %330, %343 : vector<8x128xf32>
    %345 = math.roundeven %344 : vector<8x128xf32>
    %cst_216 = arith.constant -1.280000e+02 : f32
    %cst_217 = arith.constant 1.270000e+02 : f32
    %346 = vector.broadcast %cst_216 : f32 to vector<8x128xf32>
    %347 = arith.maximumf %346, %345 : vector<8x128xf32>
    %348 = vector.broadcast %cst_217 : f32 to vector<8x128xf32>
    %349 = arith.minimumf %348, %347 : vector<8x128xf32>
    %cst_218 = arith.constant 1.800000e+01 : f32
    %350 = vector.broadcast %cst_218 : f32 to vector<8x128xf32>
    %351 = arith.mulf %349, %350 : vector<8x128xf32>
    %352 = arith.subf %351, %330 : vector<8x128xf32>
    %353 = arith.mulf %352, %352 : vector<8x128xf32>
    %354 = arith.addf %319, %353 : vector<8x128xf32>
    %cst_219 = arith.constant 0.0526315793 : f32
    %355 = vector.broadcast %cst_219 : f32 to vector<8x128xf32>
    %356 = arith.mulf %330, %355 : vector<8x128xf32>
    %357 = math.roundeven %356 : vector<8x128xf32>
    %cst_220 = arith.constant -1.280000e+02 : f32
    %cst_221 = arith.constant 1.270000e+02 : f32
    %358 = vector.broadcast %cst_220 : f32 to vector<8x128xf32>
    %359 = arith.maximumf %358, %357 : vector<8x128xf32>
    %360 = vector.broadcast %cst_221 : f32 to vector<8x128xf32>
    %361 = arith.minimumf %360, %359 : vector<8x128xf32>
    %cst_222 = arith.constant 1.900000e+01 : f32
    %362 = vector.broadcast %cst_222 : f32 to vector<8x128xf32>
    %363 = arith.mulf %361, %362 : vector<8x128xf32>
    %364 = arith.subf %363, %330 : vector<8x128xf32>
    %365 = arith.mulf %364, %364 : vector<8x128xf32>
    %366 = arith.addf %320, %365 : vector<8x128xf32>
    %cst_223 = arith.constant 5.000000e-02 : f32
    %367 = vector.broadcast %cst_223 : f32 to vector<8x128xf32>
    %368 = arith.mulf %330, %367 : vector<8x128xf32>
    %369 = math.roundeven %368 : vector<8x128xf32>
    %cst_224 = arith.constant -1.280000e+02 : f32
    %cst_225 = arith.constant 1.270000e+02 : f32
    %370 = vector.broadcast %cst_224 : f32 to vector<8x128xf32>
    %371 = arith.maximumf %370, %369 : vector<8x128xf32>
    %372 = vector.broadcast %cst_225 : f32 to vector<8x128xf32>
    %373 = arith.minimumf %372, %371 : vector<8x128xf32>
    %cst_226 = arith.constant 2.000000e+01 : f32
    %374 = vector.broadcast %cst_226 : f32 to vector<8x128xf32>
    %375 = arith.mulf %373, %374 : vector<8x128xf32>
    %376 = arith.subf %375, %330 : vector<8x128xf32>
    %377 = arith.mulf %376, %376 : vector<8x128xf32>
    %378 = arith.addf %321, %377 : vector<8x128xf32>
    %cst_227 = arith.constant 0.0476190485 : f32
    %379 = vector.broadcast %cst_227 : f32 to vector<8x128xf32>
    %380 = arith.mulf %330, %379 : vector<8x128xf32>
    %381 = math.roundeven %380 : vector<8x128xf32>
    %cst_228 = arith.constant -1.280000e+02 : f32
    %cst_229 = arith.constant 1.270000e+02 : f32
    %382 = vector.broadcast %cst_228 : f32 to vector<8x128xf32>
    %383 = arith.maximumf %382, %381 : vector<8x128xf32>
    %384 = vector.broadcast %cst_229 : f32 to vector<8x128xf32>
    %385 = arith.minimumf %384, %383 : vector<8x128xf32>
    %cst_230 = arith.constant 2.100000e+01 : f32
    %386 = vector.broadcast %cst_230 : f32 to vector<8x128xf32>
    %387 = arith.mulf %385, %386 : vector<8x128xf32>
    %388 = arith.subf %387, %330 : vector<8x128xf32>
    %389 = arith.mulf %388, %388 : vector<8x128xf32>
    %390 = arith.addf %322, %389 : vector<8x128xf32>
    %cst_231 = arith.constant 0.0454545468 : f32
    %391 = vector.broadcast %cst_231 : f32 to vector<8x128xf32>
    %392 = arith.mulf %330, %391 : vector<8x128xf32>
    %393 = math.roundeven %392 : vector<8x128xf32>
    %cst_232 = arith.constant -1.280000e+02 : f32
    %cst_233 = arith.constant 1.270000e+02 : f32
    %394 = vector.broadcast %cst_232 : f32 to vector<8x128xf32>
    %395 = arith.maximumf %394, %393 : vector<8x128xf32>
    %396 = vector.broadcast %cst_233 : f32 to vector<8x128xf32>
    %397 = arith.minimumf %396, %395 : vector<8x128xf32>
    %cst_234 = arith.constant 2.200000e+01 : f32
    %398 = vector.broadcast %cst_234 : f32 to vector<8x128xf32>
    %399 = arith.mulf %397, %398 : vector<8x128xf32>
    %400 = arith.subf %399, %330 : vector<8x128xf32>
    %401 = arith.mulf %400, %400 : vector<8x128xf32>
    %402 = arith.addf %323, %401 : vector<8x128xf32>
    %cst_235 = arith.constant 0.0434782617 : f32
    %403 = vector.broadcast %cst_235 : f32 to vector<8x128xf32>
    %404 = arith.mulf %330, %403 : vector<8x128xf32>
    %405 = math.roundeven %404 : vector<8x128xf32>
    %cst_236 = arith.constant -1.280000e+02 : f32
    %cst_237 = arith.constant 1.270000e+02 : f32
    %406 = vector.broadcast %cst_236 : f32 to vector<8x128xf32>
    %407 = arith.maximumf %406, %405 : vector<8x128xf32>
    %408 = vector.broadcast %cst_237 : f32 to vector<8x128xf32>
    %409 = arith.minimumf %408, %407 : vector<8x128xf32>
    %cst_238 = arith.constant 2.300000e+01 : f32
    %410 = vector.broadcast %cst_238 : f32 to vector<8x128xf32>
    %411 = arith.mulf %409, %410 : vector<8x128xf32>
    %412 = arith.subf %411, %330 : vector<8x128xf32>
    %413 = arith.mulf %412, %412 : vector<8x128xf32>
    %414 = arith.addf %324, %413 : vector<8x128xf32>
    %cst_239 = arith.constant 0.0416666679 : f32
    %415 = vector.broadcast %cst_239 : f32 to vector<8x128xf32>
    %416 = arith.mulf %330, %415 : vector<8x128xf32>
    %417 = math.roundeven %416 : vector<8x128xf32>
    %cst_240 = arith.constant -1.280000e+02 : f32
    %cst_241 = arith.constant 1.270000e+02 : f32
    %418 = vector.broadcast %cst_240 : f32 to vector<8x128xf32>
    %419 = arith.maximumf %418, %417 : vector<8x128xf32>
    %420 = vector.broadcast %cst_241 : f32 to vector<8x128xf32>
    %421 = arith.minimumf %420, %419 : vector<8x128xf32>
    %cst_242 = arith.constant 2.400000e+01 : f32
    %422 = vector.broadcast %cst_242 : f32 to vector<8x128xf32>
    %423 = arith.mulf %421, %422 : vector<8x128xf32>
    %424 = arith.subf %423, %330 : vector<8x128xf32>
    %425 = arith.mulf %424, %424 : vector<8x128xf32>
    %426 = arith.addf %325, %425 : vector<8x128xf32>
    %c1_i32_243 = arith.constant 1 : i32
    %c0_244 = arith.constant 0 : index
    %c16 = arith.constant 16 : index
    %c0_245 = arith.constant 0 : index
    %c0_246 = arith.constant 0 : index
    %427 = vector.load %arg4[%c0_244, %c16, %c0_245, %c0_246] : memref<1x128x8x128xf32, #tpu.memory_space<vmem>>, vector<1x1x8x128xf32>
    %428 = vector.shape_cast %427 : vector<1x1x8x128xf32> to vector<8x128xf32>
    %429 = arith.addf %428, %342 : vector<8x128xf32>
    %c0_247 = arith.constant 0 : index
    %c16_248 = arith.constant 16 : index
    %c0_249 = arith.constant 0 : index
    %c0_250 = arith.constant 0 : index
    %430 = vector.load %arg4[%c0_247, %c16_248, %c0_249, %c0_250] : memref<1x128x8x128xf32, #tpu.memory_space<vmem>>, vector<1x1x8x128xf32>
    %431 = vector.shape_cast %430 : vector<1x1x8x128xf32> to vector<8x128xf32>
    %432 = vector.shape_cast %429 : vector<8x128xf32> to vector<1x1x8x128xf32>
    tpu.vector_store %arg4[%c0_247, %c16_248, %c0_249, %c0_250], %432 {strides = array<i32>} : memref<1x128x8x128xf32, #tpu.memory_space<vmem>>, vector<1x1x8x128xf32>,
    %c0_251 = arith.constant 0 : index
    %c17 = arith.constant 17 : index
    %c0_252 = arith.constant 0 : index
    %c0_253 = arith.constant 0 : index
    %433 = vector.load %arg4[%c0_251, %c17, %c0_252, %c0_253] : memref<1x128x8x128xf32, #tpu.memory_space<vmem>>, vector<1x1x8x128xf32>
    %434 = vector.shape_cast %433 : vector<1x1x8x128xf32> to vector<8x128xf32>
    %435 = arith.addf %434, %354 : vector<8x128xf32>
    %c0_254 = arith.constant 0 : index
    %c17_255 = arith.constant 17 : index
    %c0_256 = arith.constant 0 : index
    %c0_257 = arith.constant 0 : index
    %436 = vector.load %arg4[%c0_254, %c17_255, %c0_256, %c0_257] : memref<1x128x8x128xf32, #tpu.memory_space<vmem>>, vector<1x1x8x128xf32>
    %437 = vector.shape_cast %436 : vector<1x1x8x128xf32> to vector<8x128xf32>
    %438 = vector.shape_cast %435 : vector<8x128xf32> to vector<1x1x8x128xf32>
    tpu.vector_store %arg4[%c0_254, %c17_255, %c0_256, %c0_257], %438 {strides = array<i32>} : memref<1x128x8x128xf32, #tpu.memory_space<vmem>>, vector<1x1x8x128xf32>,
    %c0_258 = arith.constant 0 : index
    %c18 = arith.constant 18 : index
    %c0_259 = arith.constant 0 : index
    %c0_260 = arith.constant 0 : index
    %439 = vector.load %arg4[%c0_258, %c18, %c0_259, %c0_260] : memref<1x128x8x128xf32, #tpu.memory_space<vmem>>, vector<1x1x8x128xf32>
    %440 = vector.shape_cast %439 : vector<1x1x8x128xf32> to vector<8x128xf32>
    %441 = arith.addf %440, %366 : vector<8x128xf32>
    %c0_261 = arith.constant 0 : index
    %c18_262 = arith.constant 18 : index
    %c0_263 = arith.constant 0 : index
    %c0_264 = arith.constant 0 : index
    %442 = vector.load %arg4[%c0_261, %c18_262, %c0_263, %c0_264] : memref<1x128x8x128xf32, #tpu.memory_space<vmem>>, vector<1x1x8x128xf32>
    %443 = vector.shape_cast %442 : vector<1x1x8x128xf32> to vector<8x128xf32>
    %444 = vector.shape_cast %441 : vector<8x128xf32> to vector<1x1x8x128xf32>
    tpu.vector_store %arg4[%c0_261, %c18_262, %c0_263, %c0_264], %444 {strides = array<i32>} : memref<1x128x8x128xf32, #tpu.memory_space<vmem>>, vector<1x1x8x128xf32>,
    %c0_265 = arith.constant 0 : index
    %c19 = arith.constant 19 : index
    %c0_266 = arith.constant 0 : index
    %c0_267 = arith.constant 0 : index
    %445 = vector.load %arg4[%c0_265, %c19, %c0_266, %c0_267] : memref<1x128x8x128xf32, #tpu.memory_space<vmem>>, vector<1x1x8x128xf32>
    %446 = vector.shape_cast %445 : vector<1x1x8x128xf32> to vector<8x128xf32>
    %447 = arith.addf %446, %378 : vector<8x128xf32>
    %c0_268 = arith.constant 0 : index
    %c19_269 = arith.constant 19 : index
    %c0_270 = arith.constant 0 : index
    %c0_271 = arith.constant 0 : index
    %448 = vector.load %arg4[%c0_268, %c19_269, %c0_270, %c0_271] : memref<1x128x8x128xf32, #tpu.memory_space<vmem>>, vector<1x1x8x128xf32>
    %449 = vector.shape_cast %448 : vector<1x1x8x128xf32> to vector<8x128xf32>
    %450 = vector.shape_cast %447 : vector<8x128xf32> to vector<1x1x8x128xf32>
    tpu.vector_store %arg4[%c0_268, %c19_269, %c0_270, %c0_271], %450 {strides = array<i32>} : memref<1x128x8x128xf32, #tpu.memory_space<vmem>>, vector<1x1x8x128xf32>,
    %c0_272 = arith.constant 0 : index
    %c20 = arith.constant 20 : index
    %c0_273 = arith.constant 0 : index
    %c0_274 = arith.constant 0 : index
    %451 = vector.load %arg4[%c0_272, %c20, %c0_273, %c0_274] : memref<1x128x8x128xf32, #tpu.memory_space<vmem>>, vector<1x1x8x128xf32>
    %452 = vector.shape_cast %451 : vector<1x1x8x128xf32> to vector<8x128xf32>
    %453 = arith.addf %452, %390 : vector<8x128xf32>
    %c0_275 = arith.constant 0 : index
    %c20_276 = arith.constant 20 : index
    %c0_277 = arith.constant 0 : index
    %c0_278 = arith.constant 0 : index
    %454 = vector.load %arg4[%c0_275, %c20_276, %c0_277, %c0_278] : memref<1x128x8x128xf32, #tpu.memory_space<vmem>>, vector<1x1x8x128xf32>
    %455 = vector.shape_cast %454 : vector<1x1x8x128xf32> to vector<8x128xf32>
    %456 = vector.shape_cast %453 : vector<8x128xf32> to vector<1x1x8x128xf32>
    tpu.vector_store %arg4[%c0_275, %c20_276, %c0_277, %c0_278], %456 {strides = array<i32>} : memref<1x128x8x128xf32, #tpu.memory_space<vmem>>, vector<1x1x8x128xf32>,
    %c0_279 = arith.constant 0 : index
    %c21 = arith.constant 21 : index
    %c0_280 = arith.constant 0 : index
    %c0_281 = arith.constant 0 : index
    %457 = vector.load %arg4[%c0_279, %c21, %c0_280, %c0_281] : memref<1x128x8x128xf32, #tpu.memory_space<vmem>>, vector<1x1x8x128xf32>
    %458 = vector.shape_cast %457 : vector<1x1x8x128xf32> to vector<8x128xf32>
    %459 = arith.addf %458, %402 : vector<8x128xf32>
    %c0_282 = arith.constant 0 : index
    %c21_283 = arith.constant 21 : index
    %c0_284 = arith.constant 0 : index
    %c0_285 = arith.constant 0 : index
    %460 = vector.load %arg4[%c0_282, %c21_283, %c0_284, %c0_285] : memref<1x128x8x128xf32, #tpu.memory_space<vmem>>, vector<1x1x8x128xf32>
    %461 = vector.shape_cast %460 : vector<1x1x8x128xf32> to vector<8x128xf32>
    %462 = vector.shape_cast %459 : vector<8x128xf32> to vector<1x1x8x128xf32>
    tpu.vector_store %arg4[%c0_282, %c21_283, %c0_284, %c0_285], %462 {strides = array<i32>} : memref<1x128x8x128xf32, #tpu.memory_space<vmem>>, vector<1x1x8x128xf32>,
    %c0_286 = arith.constant 0 : index
    %c22 = arith.constant 22 : index
    %c0_287 = arith.constant 0 : index
    %c0_288 = arith.constant 0 : index
    %463 = vector.load %arg4[%c0_286, %c22, %c0_287, %c0_288] : memref<1x128x8x128xf32, #tpu.memory_space<vmem>>, vector<1x1x8x128xf32>
    %464 = vector.shape_cast %463 : vector<1x1x8x128xf32> to vector<8x128xf32>
    %465 = arith.addf %464, %414 : vector<8x128xf32>
    %c0_289 = arith.constant 0 : index
    %c22_290 = arith.constant 22 : index
    %c0_291 = arith.constant 0 : index
    %c0_292 = arith.constant 0 : index
    %466 = vector.load %arg4[%c0_289, %c22_290, %c0_291, %c0_292] : memref<1x128x8x128xf32, #tpu.memory_space<vmem>>, vector<1x1x8x128xf32>
    %467 = vector.shape_cast %466 : vector<1x1x8x128xf32> to vector<8x128xf32>
    %468 = vector.shape_cast %465 : vector<8x128xf32> to vector<1x1x8x128xf32>
    tpu.vector_store %arg4[%c0_289, %c22_290, %c0_291, %c0_292], %468 {strides = array<i32>} : memref<1x128x8x128xf32, #tpu.memory_space<vmem>>, vector<1x1x8x128xf32>,
    %c0_293 = arith.constant 0 : index
    %c23 = arith.constant 23 : index
    %c0_294 = arith.constant 0 : index
    %c0_295 = arith.constant 0 : index
    %469 = vector.load %arg4[%c0_293, %c23, %c0_294, %c0_295] : memref<1x128x8x128xf32, #tpu.memory_space<vmem>>, vector<1x1x8x128xf32>
    %470 = vector.shape_cast %469 : vector<1x1x8x128xf32> to vector<8x128xf32>
    %471 = arith.addf %470, %426 : vector<8x128xf32>
    %c0_296 = arith.constant 0 : index
    %c23_297 = arith.constant 23 : index
    %c0_298 = arith.constant 0 : index
    %c0_299 = arith.constant 0 : index
    %472 = vector.load %arg4[%c0_296, %c23_297, %c0_298, %c0_299] : memref<1x128x8x128xf32, #tpu.memory_space<vmem>>, vector<1x1x8x128xf32>
    %473 = vector.shape_cast %472 : vector<1x1x8x128xf32> to vector<8x128xf32>
    %474 = vector.shape_cast %471 : vector<8x128xf32> to vector<1x1x8x128xf32>
    tpu.vector_store %arg4[%c0_296, %c23_297, %c0_298, %c0_299], %474 {strides = array<i32>} : memref<1x128x8x128xf32, #tpu.memory_space<vmem>>, vector<1x1x8x128xf32>,
    %cst_300 = arith.constant 0.000000e+00 : f32
    %475 = vector.broadcast %cst_300 : f32 to vector<8x128xf32>
    %cst_301 = arith.constant 0.000000e+00 : f32
    %476 = vector.broadcast %cst_301 : f32 to vector<8x128xf32>
    %cst_302 = arith.constant 0.000000e+00 : f32
    %477 = vector.broadcast %cst_302 : f32 to vector<8x128xf32>
    %cst_303 = arith.constant 0.000000e+00 : f32
    %478 = vector.broadcast %cst_303 : f32 to vector<8x128xf32>
    %cst_304 = arith.constant 0.000000e+00 : f32
    %479 = vector.broadcast %cst_304 : f32 to vector<8x128xf32>
    %cst_305 = arith.constant 0.000000e+00 : f32
    %480 = vector.broadcast %cst_305 : f32 to vector<8x128xf32>
    %cst_306 = arith.constant 0.000000e+00 : f32
    %481 = vector.broadcast %cst_306 : f32 to vector<8x128xf32>
    %cst_307 = arith.constant 0.000000e+00 : f32
    %482 = vector.broadcast %cst_307 : f32 to vector<8x128xf32>
    %c0_i32_308 = arith.constant 0 : i32
    %c128_i32_309 = arith.constant 128 : i32
    %483 = arith.muli %c0_i32_308, %c128_i32_309 : i32
    %484 = tpu.assume_multiple %483, 128 : i32
    %c0_310 = arith.constant 0 : index
    %485 = arith.index_cast %484 : i32 to index
    %486 = vector.load %arg2[%c0_310, %485] : memref<8x128xf32, #tpu.memory_space<vmem>>, vector<8x128xf32>
    %487 = arith.mulf %486, %3 : vector<8x128xf32>
    %cst_311 = arith.constant 4.000000e-02 : f32
    %488 = vector.broadcast %cst_311 : f32 to vector<8x128xf32>
    %489 = arith.mulf %487, %488 : vector<8x128xf32>
    %490 = math.roundeven %489 : vector<8x128xf32>
    %cst_312 = arith.constant -1.280000e+02 : f32
    %cst_313 = arith.constant 1.270000e+02 : f32
    %491 = vector.broadcast %cst_312 : f32 to vector<8x128xf32>
    %492 = arith.maximumf %491, %490 : vector<8x128xf32>
    %493 = vector.broadcast %cst_313 : f32 to vector<8x128xf32>
    %494 = arith.minimumf %493, %492 : vector<8x128xf32>
    %cst_314 = arith.constant 2.500000e+01 : f32
    %495 = vector.broadcast %cst_314 : f32 to vector<8x128xf32>
    %496 = arith.mulf %494, %495 : vector<8x128xf32>
    %497 = arith.subf %496, %487 : vector<8x128xf32>
    %498 = arith.mulf %497, %497 : vector<8x128xf32>
    %499 = arith.addf %475, %498 : vector<8x128xf32>
    %cst_315 = arith.constant 0.0384615399 : f32
    %500 = vector.broadcast %cst_315 : f32 to vector<8x128xf32>
    %501 = arith.mulf %487, %500 : vector<8x128xf32>
    %502 = math.roundeven %501 : vector<8x128xf32>
    %cst_316 = arith.constant -1.280000e+02 : f32
    %cst_317 = arith.constant 1.270000e+02 : f32
    %503 = vector.broadcast %cst_316 : f32 to vector<8x128xf32>
    %504 = arith.maximumf %503, %502 : vector<8x128xf32>
    %505 = vector.broadcast %cst_317 : f32 to vector<8x128xf32>
    %506 = arith.minimumf %505, %504 : vector<8x128xf32>
    %cst_318 = arith.constant 2.600000e+01 : f32
    %507 = vector.broadcast %cst_318 : f32 to vector<8x128xf32>
    %508 = arith.mulf %506, %507 : vector<8x128xf32>
    %509 = arith.subf %508, %487 : vector<8x128xf32>
    %510 = arith.mulf %509, %509 : vector<8x128xf32>
    %511 = arith.addf %476, %510 : vector<8x128xf32>
    %cst_319 = arith.constant 0.0370370373 : f32
    %512 = vector.broadcast %cst_319 : f32 to vector<8x128xf32>
    %513 = arith.mulf %487, %512 : vector<8x128xf32>
    %514 = math.roundeven %513 : vector<8x128xf32>
    %cst_320 = arith.constant -1.280000e+02 : f32
    %cst_321 = arith.constant 1.270000e+02 : f32
    %515 = vector.broadcast %cst_320 : f32 to vector<8x128xf32>
    %516 = arith.maximumf %515, %514 : vector<8x128xf32>
    %517 = vector.broadcast %cst_321 : f32 to vector<8x128xf32>
    %518 = arith.minimumf %517, %516 : vector<8x128xf32>
    %cst_322 = arith.constant 2.700000e+01 : f32
    %519 = vector.broadcast %cst_322 : f32 to vector<8x128xf32>
    %520 = arith.mulf %518, %519 : vector<8x128xf32>
    %521 = arith.subf %520, %487 : vector<8x128xf32>
    %522 = arith.mulf %521, %521 : vector<8x128xf32>
    %523 = arith.addf %477, %522 : vector<8x128xf32>
    %cst_323 = arith.constant 0.0357142873 : f32
    %524 = vector.broadcast %cst_323 : f32 to vector<8x128xf32>
    %525 = arith.mulf %487, %524 : vector<8x128xf32>
    %526 = math.roundeven %525 : vector<8x128xf32>
    %cst_324 = arith.constant -1.280000e+02 : f32
    %cst_325 = arith.constant 1.270000e+02 : f32
    %527 = vector.broadcast %cst_324 : f32 to vector<8x128xf32>
    %528 = arith.maximumf %527, %526 : vector<8x128xf32>
    %529 = vector.broadcast %cst_325 : f32 to vector<8x128xf32>
    %530 = arith.minimumf %529, %528 : vector<8x128xf32>
    %cst_326 = arith.constant 2.800000e+01 : f32
    %531 = vector.broadcast %cst_326 : f32 to vector<8x128xf32>
    %532 = arith.mulf %530, %531 : vector<8x128xf32>
    %533 = arith.subf %532, %487 : vector<8x128xf32>
    %534 = arith.mulf %533, %533 : vector<8x128xf32>
    %535 = arith.addf %478, %534 : vector<8x128xf32>
    %cst_327 = arith.constant 0.0344827585 : f32
    %536 = vector.broadcast %cst_327 : f32 to vector<8x128xf32>
    %537 = arith.mulf %487, %536 : vector<8x128xf32>
    %538 = math.roundeven %537 : vector<8x128xf32>
    %cst_328 = arith.constant -1.280000e+02 : f32
    %cst_329 = arith.constant 1.270000e+02 : f32
    %539 = vector.broadcast %cst_328 : f32 to vector<8x128xf32>
    %540 = arith.maximumf %539, %538 : vector<8x128xf32>
    %541 = vector.broadcast %cst_329 : f32 to vector<8x128xf32>
    %542 = arith.minimumf %541, %540 : vector<8x128xf32>
    %cst_330 = arith.constant 2.900000e+01 : f32
    %543 = vector.broadcast %cst_330 : f32 to vector<8x128xf32>
    %544 = arith.mulf %542, %543 : vector<8x128xf32>
    %545 = arith.subf %544, %487 : vector<8x128xf32>
    %546 = arith.mulf %545, %545 : vector<8x128xf32>
    %547 = arith.addf %479, %546 : vector<8x128xf32>
    %cst_331 = arith.constant 0.0333333351 : f32
    %548 = vector.broadcast %cst_331 : f32 to vector<8x128xf32>
    %549 = arith.mulf %487, %548 : vector<8x128xf32>
    %550 = math.roundeven %549 : vector<8x128xf32>
    %cst_332 = arith.constant -1.280000e+02 : f32
    %cst_333 = arith.constant 1.270000e+02 : f32
    %551 = vector.broadcast %cst_332 : f32 to vector<8x128xf32>
    %552 = arith.maximumf %551, %550 : vector<8x128xf32>
    %553 = vector.broadcast %cst_333 : f32 to vector<8x128xf32>
    %554 = arith.minimumf %553, %552 : vector<8x128xf32>
    %cst_334 = arith.constant 3.000000e+01 : f32
    %555 = vector.broadcast %cst_334 : f32 to vector<8x128xf32>
    %556 = arith.mulf %554, %555 : vector<8x128xf32>
    %557 = arith.subf %556, %487 : vector<8x128xf32>
    %558 = arith.mulf %557, %557 : vector<8x128xf32>
    %559 = arith.addf %480, %558 : vector<8x128xf32>
    %cst_335 = arith.constant 0.0322580636 : f32
    %560 = vector.broadcast %cst_335 : f32 to vector<8x128xf32>
    %561 = arith.mulf %487, %560 : vector<8x128xf32>
    %562 = math.roundeven %561 : vector<8x128xf32>
    %cst_336 = arith.constant -1.280000e+02 : f32
    %cst_337 = arith.constant 1.270000e+02 : f32
    %563 = vector.broadcast %cst_336 : f32 to vector<8x128xf32>
    %564 = arith.maximumf %563, %562 : vector<8x128xf32>
    %565 = vector.broadcast %cst_337 : f32 to vector<8x128xf32>
    %566 = arith.minimumf %565, %564 : vector<8x128xf32>
    %cst_338 = arith.constant 3.100000e+01 : f32
    %567 = vector.broadcast %cst_338 : f32 to vector<8x128xf32>
    %568 = arith.mulf %566, %567 : vector<8x128xf32>
    %569 = arith.subf %568, %487 : vector<8x128xf32>
    %570 = arith.mulf %569, %569 : vector<8x128xf32>
    %571 = arith.addf %481, %570 : vector<8x128xf32>
    %cst_339 = arith.constant 3.125000e-02 : f32
    %572 = vector.broadcast %cst_339 : f32 to vector<8x128xf32>
    %573 = arith.mulf %487, %572 : vector<8x128xf32>
    %574 = math.roundeven %573 : vector<8x128xf32>
    %cst_340 = arith.constant -1.280000e+02 : f32
    %cst_341 = arith.constant 1.270000e+02 : f32
    %575 = vector.broadcast %cst_340 : f32 to vector<8x128xf32>
    %576 = arith.maximumf %575, %574 : vector<8x128xf32>
    %577 = vector.broadcast %cst_341 : f32 to vector<8x128xf32>
    %578 = arith.minimumf %577, %576 : vector<8x128xf32>
    %cst_342 = arith.constant 3.200000e+01 : f32
    %579 = vector.broadcast %cst_342 : f32 to vector<8x128xf32>
    %580 = arith.mulf %578, %579 : vector<8x128xf32>
    %581 = arith.subf %580, %487 : vector<8x128xf32>
    %582 = arith.mulf %581, %581 : vector<8x128xf32>
    %583 = arith.addf %482, %582 : vector<8x128xf32>
    %c1_i32_343 = arith.constant 1 : i32
    %c0_344 = arith.constant 0 : index
    %c24 = arith.constant 24 : index
    %c0_345 = arith.constant 0 : index
    %c0_346 = arith.constant 0 : index
    %584 = vector.load %arg4[%c0_344, %c24, %c0_345, %c0_346] : memref<1x128x8x128xf32, #tpu.memory_space<vmem>>, vector<1x1x8x128xf32>
    %585 = vector.shape_cast %584 : vector<1x1x8x128xf32> to vector<8x128xf32>
    %586 = arith.addf %585, %499 : vector<8x128xf32>
    %c0_347 = arith.constant 0 : index
    %c24_348 = arith.constant 24 : index
    %c0_349 = arith.constant 0 : index
    %c0_350 = arith.constant 0 : index
    %587 = vector.load %arg4[%c0_347, %c24_348, %c0_349, %c0_350] : memref<1x128x8x128xf32, #tpu.memory_space<vmem>>, vector<1x1x8x128xf32>
    %588 = vector.shape_cast %587 : vector<1x1x8x128xf32> to vector<8x128xf32>
    %589 = vector.shape_cast %586 : vector<8x128xf32> to vector<1x1x8x128xf32>
    tpu.vector_store %arg4[%c0_347, %c24_348, %c0_349, %c0_350], %589 {strides = array<i32>} : memref<1x128x8x128xf32, #tpu.memory_space<vmem>>, vector<1x1x8x128xf32>,
    %c0_351 = arith.constant 0 : index
    %c25 = arith.constant 25 : index
    %c0_352 = arith.constant 0 : index
    %c0_353 = arith.constant 0 : index
    %590 = vector.load %arg4[%c0_351, %c25, %c0_352, %c0_353] : memref<1x128x8x128xf32, #tpu.memory_space<vmem>>, vector<1x1x8x128xf32>
    %591 = vector.shape_cast %590 : vector<1x1x8x128xf32> to vector<8x128xf32>
    %592 = arith.addf %591, %511 : vector<8x128xf32>
    %c0_354 = arith.constant 0 : index
    %c25_355 = arith.constant 25 : index
    %c0_356 = arith.constant 0 : index
    %c0_357 = arith.constant 0 : index
    %593 = vector.load %arg4[%c0_354, %c25_355, %c0_356, %c0_357] : memref<1x128x8x128xf32, #tpu.memory_space<vmem>>, vector<1x1x8x128xf32>
    %594 = vector.shape_cast %593 : vector<1x1x8x128xf32> to vector<8x128xf32>
    %595 = vector.shape_cast %592 : vector<8x128xf32> to vector<1x1x8x128xf32>
    tpu.vector_store %arg4[%c0_354, %c25_355, %c0_356, %c0_357], %595 {strides = array<i32>} : memref<1x128x8x128xf32, #tpu.memory_space<vmem>>, vector<1x1x8x128xf32>,
    %c0_358 = arith.constant 0 : index
    %c26 = arith.constant 26 : index
    %c0_359 = arith.constant 0 : index
    %c0_360 = arith.constant 0 : index
    %596 = vector.load %arg4[%c0_358, %c26, %c0_359, %c0_360] : memref<1x128x8x128xf32, #tpu.memory_space<vmem>>, vector<1x1x8x128xf32>
    %597 = vector.shape_cast %596 : vector<1x1x8x128xf32> to vector<8x128xf32>
    %598 = arith.addf %597, %523 : vector<8x128xf32>
    %c0_361 = arith.constant 0 : index
    %c26_362 = arith.constant 26 : index
    %c0_363 = arith.constant 0 : index
    %c0_364 = arith.constant 0 : index
    %599 = vector.load %arg4[%c0_361, %c26_362, %c0_363, %c0_364] : memref<1x128x8x128xf32, #tpu.memory_space<vmem>>, vector<1x1x8x128xf32>
    %600 = vector.shape_cast %599 : vector<1x1x8x128xf32> to vector<8x128xf32>
    %601 = vector.shape_cast %598 : vector<8x128xf32> to vector<1x1x8x128xf32>
    tpu.vector_store %arg4[%c0_361, %c26_362, %c0_363, %c0_364], %601 {strides = array<i32>} : memref<1x128x8x128xf32, #tpu.memory_space<vmem>>, vector<1x1x8x128xf32>,
    %c0_365 = arith.constant 0 : index
    %c27 = arith.constant 27 : index
    %c0_366 = arith.constant 0 : index
    %c0_367 = arith.constant 0 : index
    %602 = vector.load %arg4[%c0_365, %c27, %c0_366, %c0_367] : memref<1x128x8x128xf32, #tpu.memory_space<vmem>>, vector<1x1x8x128xf32>
    %603 = vector.shape_cast %602 : vector<1x1x8x128xf32> to vector<8x128xf32>
    %604 = arith.addf %603, %535 : vector<8x128xf32>
    %c0_368 = arith.constant 0 : index
    %c27_369 = arith.constant 27 : index
    %c0_370 = arith.constant 0 : index
    %c0_371 = arith.constant 0 : index
    %605 = vector.load %arg4[%c0_368, %c27_369, %c0_370, %c0_371] : memref<1x128x8x128xf32, #tpu.memory_space<vmem>>, vector<1x1x8x128xf32>
    %606 = vector.shape_cast %605 : vector<1x1x8x128xf32> to vector<8x128xf32>
    %607 = vector.shape_cast %604 : vector<8x128xf32> to vector<1x1x8x128xf32>
    tpu.vector_store %arg4[%c0_368, %c27_369, %c0_370, %c0_371], %607 {strides = array<i32>} : memref<1x128x8x128xf32, #tpu.memory_space<vmem>>, vector<1x1x8x128xf32>,
    %c0_372 = arith.constant 0 : index
    %c28 = arith.constant 28 : index
    %c0_373 = arith.constant 0 : index
    %c0_374 = arith.constant 0 : index
    %608 = vector.load %arg4[%c0_372, %c28, %c0_373, %c0_374] : memref<1x128x8x128xf32, #tpu.memory_space<vmem>>, vector<1x1x8x128xf32>
    %609 = vector.shape_cast %608 : vector<1x1x8x128xf32> to vector<8x128xf32>
    %610 = arith.addf %609, %547 : vector<8x128xf32>
    %c0_375 = arith.constant 0 : index
    %c28_376 = arith.constant 28 : index
    %c0_377 = arith.constant 0 : index
    %c0_378 = arith.constant 0 : index
    %611 = vector.load %arg4[%c0_375, %c28_376, %c0_377, %c0_378] : memref<1x128x8x128xf32, #tpu.memory_space<vmem>>, vector<1x1x8x128xf32>
    %612 = vector.shape_cast %611 : vector<1x1x8x128xf32> to vector<8x128xf32>
    %613 = vector.shape_cast %610 : vector<8x128xf32> to vector<1x1x8x128xf32>
    tpu.vector_store %arg4[%c0_375, %c28_376, %c0_377, %c0_378], %613 {strides = array<i32>} : memref<1x128x8x128xf32, #tpu.memory_space<vmem>>, vector<1x1x8x128xf32>,
    %c0_379 = arith.constant 0 : index
    %c29 = arith.constant 29 : index
    %c0_380 = arith.constant 0 : index
    %c0_381 = arith.constant 0 : index
    %614 = vector.load %arg4[%c0_379, %c29, %c0_380, %c0_381] : memref<1x128x8x128xf32, #tpu.memory_space<vmem>>, vector<1x1x8x128xf32>
    %615 = vector.shape_cast %614 : vector<1x1x8x128xf32> to vector<8x128xf32>
    %616 = arith.addf %615, %559 : vector<8x128xf32>
    %c0_382 = arith.constant 0 : index
    %c29_383 = arith.constant 29 : index
    %c0_384 = arith.constant 0 : index
    %c0_385 = arith.constant 0 : index
    %617 = vector.load %arg4[%c0_382, %c29_383, %c0_384, %c0_385] : memref<1x128x8x128xf32, #tpu.memory_space<vmem>>, vector<1x1x8x128xf32>
    %618 = vector.shape_cast %617 : vector<1x1x8x128xf32> to vector<8x128xf32>
    %619 = vector.shape_cast %616 : vector<8x128xf32> to vector<1x1x8x128xf32>
    tpu.vector_store %arg4[%c0_382, %c29_383, %c0_384, %c0_385], %619 {strides = array<i32>} : memref<1x128x8x128xf32, #tpu.memory_space<vmem>>, vector<1x1x8x128xf32>,
    %c0_386 = arith.constant 0 : index
    %c30 = arith.constant 30 : index
    %c0_387 = arith.constant 0 : index
    %c0_388 = arith.constant 0 : index
    %620 = vector.load %arg4[%c0_386, %c30, %c0_387, %c0_388] : memref<1x128x8x128xf32, #tpu.memory_space<vmem>>, vector<1x1x8x128xf32>
    %621 = vector.shape_cast %620 : vector<1x1x8x128xf32> to vector<8x128xf32>
    %622 = arith.addf %621, %571 : vector<8x128xf32>
    %c0_389 = arith.constant 0 : index
    %c30_390 = arith.constant 30 : index
    %c0_391 = arith.constant 0 : index
    %c0_392 = arith.constant 0 : index
    %623 = vector.load %arg4[%c0_389, %c30_390, %c0_391, %c0_392] : memref<1x128x8x128xf32, #tpu.memory_space<vmem>>, vector<1x1x8x128xf32>
    %624 = vector.shape_cast %623 : vector<1x1x8x128xf32> to vector<8x128xf32>
    %625 = vector.shape_cast %622 : vector<8x128xf32> to vector<1x1x8x128xf32>
    tpu.vector_store %arg4[%c0_389, %c30_390, %c0_391, %c0_392], %625 {strides = array<i32>} : memref<1x128x8x128xf32, #tpu.memory_space<vmem>>, vector<1x1x8x128xf32>,
    %c0_393 = arith.constant 0 : index
    %c31 = arith.constant 31 : index
    %c0_394 = arith.constant 0 : index
    %c0_395 = arith.constant 0 : index
    %626 = vector.load %arg4[%c0_393, %c31, %c0_394, %c0_395] : memref<1x128x8x128xf32, #tpu.memory_space<vmem>>, vector<1x1x8x128xf32>
    %627 = vector.shape_cast %626 : vector<1x1x8x128xf32> to vector<8x128xf32>
    %628 = arith.addf %627, %583 : vector<8x128xf32>
    %c0_396 = arith.constant 0 : index
    %c31_397 = arith.constant 31 : index
    %c0_398 = arith.constant 0 : index
    %c0_399 = arith.constant 0 : index
    %629 = vector.load %arg4[%c0_396, %c31_397, %c0_398, %c0_399] : memref<1x128x8x128xf32, #tpu.memory_space<vmem>>, vector<1x1x8x128xf32>
    %630 = vector.shape_cast %629 : vector<1x1x8x128xf32> to vector<8x128xf32>
    %631 = vector.shape_cast %628 : vector<8x128xf32> to vector<1x1x8x128xf32>
    tpu.vector_store %arg4[%c0_396, %c31_397, %c0_398, %c0_399], %631 {strides = array<i32>} : memref<1x128x8x128xf32, #tpu.memory_space<vmem>>, vector<1x1x8x128xf32>,
    %cst_400 = arith.constant 0.000000e+00 : f32
    %632 = vector.broadcast %cst_400 : f32 to vector<8x128xf32>
    %cst_401 = arith.constant 0.000000e+00 : f32
    %633 = vector.broadcast %cst_401 : f32 to vector<8x128xf32>
    %cst_402 = arith.constant 0.000000e+00 : f32
    %634 = vector.broadcast %cst_402 : f32 to vector<8x128xf32>
    %cst_403 = arith.constant 0.000000e+00 : f32
    %635 = vector.broadcast %cst_403 : f32 to vector<8x128xf32>
    %cst_404 = arith.constant 0.000000e+00 : f32
    %636 = vector.broadcast %cst_404 : f32 to vector<8x128xf32>
    %cst_405 = arith.constant 0.000000e+00 : f32
    %637 = vector.broadcast %cst_405 : f32 to vector<8x128xf32>
    %cst_406 = arith.constant 0.000000e+00 : f32
    %638 = vector.broadcast %cst_406 : f32 to vector<8x128xf32>
    %cst_407 = arith.constant 0.000000e+00 : f32
    %639 = vector.broadcast %cst_407 : f32 to vector<8x128xf32>
    %c0_i32_408 = arith.constant 0 : i32
    %c128_i32_409 = arith.constant 128 : i32
    %640 = arith.muli %c0_i32_408, %c128_i32_409 : i32
    %641 = tpu.assume_multiple %640, 128 : i32
    %c0_410 = arith.constant 0 : index
    %642 = arith.index_cast %641 : i32 to index
    %643 = vector.load %arg2[%c0_410, %642] : memref<8x128xf32, #tpu.memory_space<vmem>>, vector<8x128xf32>
    %644 = arith.mulf %643, %3 : vector<8x128xf32>
    %cst_411 = arith.constant 0.0303030312 : f32
    %645 = vector.broadcast %cst_411 : f32 to vector<8x128xf32>
    %646 = arith.mulf %644, %645 : vector<8x128xf32>
    %647 = math.roundeven %646 : vector<8x128xf32>
    %cst_412 = arith.constant -1.280000e+02 : f32
    %cst_413 = arith.constant 1.270000e+02 : f32
    %648 = vector.broadcast %cst_412 : f32 to vector<8x128xf32>
    %649 = arith.maximumf %648, %647 : vector<8x128xf32>
    %650 = vector.broadcast %cst_413 : f32 to vector<8x128xf32>
    %651 = arith.minimumf %650, %649 : vector<8x128xf32>
    %cst_414 = arith.constant 3.300000e+01 : f32
    %652 = vector.broadcast %cst_414 : f32 to vector<8x128xf32>
    %653 = arith.mulf %651, %652 : vector<8x128xf32>
    %654 = arith.subf %653, %644 : vector<8x128xf32>
    %655 = arith.mulf %654, %654 : vector<8x128xf32>
    %656 = arith.addf %632, %655 : vector<8x128xf32>
    %cst_415 = arith.constant 0.0294117648 : f32
    %657 = vector.broadcast %cst_415 : f32 to vector<8x128xf32>
    %658 = arith.mulf %644, %657 : vector<8x128xf32>
    %659 = math.roundeven %658 : vector<8x128xf32>
    %cst_416 = arith.constant -1.280000e+02 : f32
    %cst_417 = arith.constant 1.270000e+02 : f32
    %660 = vector.broadcast %cst_416 : f32 to vector<8x128xf32>
    %661 = arith.maximumf %660, %659 : vector<8x128xf32>
    %662 = vector.broadcast %cst_417 : f32 to vector<8x128xf32>
    %663 = arith.minimumf %662, %661 : vector<8x128xf32>
    %cst_418 = arith.constant 3.400000e+01 : f32
    %664 = vector.broadcast %cst_418 : f32 to vector<8x128xf32>
    %665 = arith.mulf %663, %664 : vector<8x128xf32>
    %666 = arith.subf %665, %644 : vector<8x128xf32>
    %667 = arith.mulf %666, %666 : vector<8x128xf32>
    %668 = arith.addf %633, %667 : vector<8x128xf32>
    %cst_419 = arith.constant 0.0285714287 : f32
    %669 = vector.broadcast %cst_419 : f32 to vector<8x128xf32>
    %670 = arith.mulf %644, %669 : vector<8x128xf32>
    %671 = math.roundeven %670 : vector<8x128xf32>
    %cst_420 = arith.constant -1.280000e+02 : f32
    %cst_421 = arith.constant 1.270000e+02 : f32
    %672 = vector.broadcast %cst_420 : f32 to vector<8x128xf32>
    %673 = arith.maximumf %672, %671 : vector<8x128xf32>
    %674 = vector.broadcast %cst_421 : f32 to vector<8x128xf32>
    %675 = arith.minimumf %674, %673 : vector<8x128xf32>
    %cst_422 = arith.constant 3.500000e+01 : f32
    %676 = vector.broadcast %cst_422 : f32 to vector<8x128xf32>
    %677 = arith.mulf %675, %676 : vector<8x128xf32>
    %678 = arith.subf %677, %644 : vector<8x128xf32>
    %679 = arith.mulf %678, %678 : vector<8x128xf32>
    %680 = arith.addf %634, %679 : vector<8x128xf32>
    %cst_423 = arith.constant 0.027777778 : f32
    %681 = vector.broadcast %cst_423 : f32 to vector<8x128xf32>
    %682 = arith.mulf %644, %681 : vector<8x128xf32>
    %683 = math.roundeven %682 : vector<8x128xf32>
    %cst_424 = arith.constant -1.280000e+02 : f32
    %cst_425 = arith.constant 1.270000e+02 : f32
    %684 = vector.broadcast %cst_424 : f32 to vector<8x128xf32>
    %685 = arith.maximumf %684, %683 : vector<8x128xf32>
    %686 = vector.broadcast %cst_425 : f32 to vector<8x128xf32>
    %687 = arith.minimumf %686, %685 : vector<8x128xf32>
    %cst_426 = arith.constant 3.600000e+01 : f32
    %688 = vector.broadcast %cst_426 : f32 to vector<8x128xf32>
    %689 = arith.mulf %687, %688 : vector<8x128xf32>
    %690 = arith.subf %689, %644 : vector<8x128xf32>
    %691 = arith.mulf %690, %690 : vector<8x128xf32>
    %692 = arith.addf %635, %691 : vector<8x128xf32>
    %cst_427 = arith.constant 0.0270270277 : f32
    %693 = vector.broadcast %cst_427 : f32 to vector<8x128xf32>
    %694 = arith.mulf %644, %693 : vector<8x128xf32>
    %695 = math.roundeven %694 : vector<8x128xf32>
    %cst_428 = arith.constant -1.280000e+02 : f32
    %cst_429 = arith.constant 1.270000e+02 : f32
    %696 = vector.broadcast %cst_428 : f32 to vector<8x128xf32>
    %697 = arith.maximumf %696, %695 : vector<8x128xf32>
    %698 = vector.broadcast %cst_429 : f32 to vector<8x128xf32>
    %699 = arith.minimumf %698, %697 : vector<8x128xf32>
    %cst_430 = arith.constant 3.700000e+01 : f32
    %700 = vector.broadcast %cst_430 : f32 to vector<8x128xf32>
    %701 = arith.mulf %699, %700 : vector<8x128xf32>
    %702 = arith.subf %701, %644 : vector<8x128xf32>
    %703 = arith.mulf %702, %702 : vector<8x128xf32>
    %704 = arith.addf %636, %703 : vector<8x128xf32>
    %cst_431 = arith.constant 0.0263157897 : f32
    %705 = vector.broadcast %cst_431 : f32 to vector<8x128xf32>
    %706 = arith.mulf %644, %705 : vector<8x128xf32>
    %707 = math.roundeven %706 : vector<8x128xf32>
    %cst_432 = arith.constant -1.280000e+02 : f32
    %cst_433 = arith.constant 1.270000e+02 : f32
    %708 = vector.broadcast %cst_432 : f32 to vector<8x128xf32>
    %709 = arith.maximumf %708, %707 : vector<8x128xf32>
    %710 = vector.broadcast %cst_433 : f32 to vector<8x128xf32>
    %711 = arith.minimumf %710, %709 : vector<8x128xf32>
    %cst_434 = arith.constant 3.800000e+01 : f32
    %712 = vector.broadcast %cst_434 : f32 to vector<8x128xf32>
    %713 = arith.mulf %711, %712 : vector<8x128xf32>
    %714 = arith.subf %713, %644 : vector<8x128xf32>
    %715 = arith.mulf %714, %714 : vector<8x128xf32>
    %716 = arith.addf %637, %715 : vector<8x128xf32>
    %cst_435 = arith.constant 0.025641026 : f32
    %717 = vector.broadcast %cst_435 : f32 to vector<8x128xf32>
    %718 = arith.mulf %644, %717 : vector<8x128xf32>
    %719 = math.roundeven %718 : vector<8x128xf32>
    %cst_436 = arith.constant -1.280000e+02 : f32
    %cst_437 = arith.constant 1.270000e+02 : f32
    %720 = vector.broadcast %cst_436 : f32 to vector<8x128xf32>
    %721 = arith.maximumf %720, %719 : vector<8x128xf32>
    %722 = vector.broadcast %cst_437 : f32 to vector<8x128xf32>
    %723 = arith.minimumf %722, %721 : vector<8x128xf32>
    %cst_438 = arith.constant 3.900000e+01 : f32
    %724 = vector.broadcast %cst_438 : f32 to vector<8x128xf32>
    %725 = arith.mulf %723, %724 : vector<8x128xf32>
    %726 = arith.subf %725, %644 : vector<8x128xf32>
    %727 = arith.mulf %726, %726 : vector<8x128xf32>
    %728 = arith.addf %638, %727 : vector<8x128xf32>
    %cst_439 = arith.constant 2.500000e-02 : f32
    %729 = vector.broadcast %cst_439 : f32 to vector<8x128xf32>
    %730 = arith.mulf %644, %729 : vector<8x128xf32>
    %731 = math.roundeven %730 : vector<8x128xf32>
    %cst_440 = arith.constant -1.280000e+02 : f32
    %cst_441 = arith.constant 1.270000e+02 : f32
    %732 = vector.broadcast %cst_440 : f32 to vector<8x128xf32>
    %733 = arith.maximumf %732, %731 : vector<8x128xf32>
    %734 = vector.broadcast %cst_441 : f32 to vector<8x128xf32>
    %735 = arith.minimumf %734, %733 : vector<8x128xf32>
    %cst_442 = arith.constant 4.000000e+01 : f32
    %736 = vector.broadcast %cst_442 : f32 to vector<8x128xf32>
    %737 = arith.mulf %735, %736 : vector<8x128xf32>
    %738 = arith.subf %737, %644 : vector<8x128xf32>
    %739 = arith.mulf %738, %738 : vector<8x128xf32>
    %740 = arith.addf %639, %739 : vector<8x128xf32>
    %c1_i32_443 = arith.constant 1 : i32
    %c0_444 = arith.constant 0 : index
    %c32 = arith.constant 32 : index
    %c0_445 = arith.constant 0 : index
    %c0_446 = arith.constant 0 : index
    %741 = vector.load %arg4[%c0_444, %c32, %c0_445, %c0_446] : memref<1x128x8x128xf32, #tpu.memory_space<vmem>>, vector<1x1x8x128xf32>
    %742 = vector.shape_cast %741 : vector<1x1x8x128xf32> to vector<8x128xf32>
    %743 = arith.addf %742, %656 : vector<8x128xf32>
    %c0_447 = arith.constant 0 : index
    %c32_448 = arith.constant 32 : index
    %c0_449 = arith.constant 0 : index
    %c0_450 = arith.constant 0 : index
    %744 = vector.load %arg4[%c0_447, %c32_448, %c0_449, %c0_450] : memref<1x128x8x128xf32, #tpu.memory_space<vmem>>, vector<1x1x8x128xf32>
    %745 = vector.shape_cast %744 : vector<1x1x8x128xf32> to vector<8x128xf32>
    %746 = vector.shape_cast %743 : vector<8x128xf32> to vector<1x1x8x128xf32>
    tpu.vector_store %arg4[%c0_447, %c32_448, %c0_449, %c0_450], %746 {strides = array<i32>} : memref<1x128x8x128xf32, #tpu.memory_space<vmem>>, vector<1x1x8x128xf32>,
    %c0_451 = arith.constant 0 : index
    %c33 = arith.constant 33 : index
    %c0_452 = arith.constant 0 : index
    %c0_453 = arith.constant 0 : index
    %747 = vector.load %arg4[%c0_451, %c33, %c0_452, %c0_453] : memref<1x128x8x128xf32, #tpu.memory_space<vmem>>, vector<1x1x8x128xf32>
    %748 = vector.shape_cast %747 : vector<1x1x8x128xf32> to vector<8x128xf32>
    %749 = arith.addf %748, %668 : vector<8x128xf32>
    %c0_454 = arith.constant 0 : index
    %c33_455 = arith.constant 33 : index
    %c0_456 = arith.constant 0 : index
    %c0_457 = arith.constant 0 : index
    %750 = vector.load %arg4[%c0_454, %c33_455, %c0_456, %c0_457] : memref<1x128x8x128xf32, #tpu.memory_space<vmem>>, vector<1x1x8x128xf32>
    %751 = vector.shape_cast %750 : vector<1x1x8x128xf32> to vector<8x128xf32>
    %752 = vector.shape_cast %749 : vector<8x128xf32> to vector<1x1x8x128xf32>
    tpu.vector_store %arg4[%c0_454, %c33_455, %c0_456, %c0_457], %752 {strides = array<i32>} : memref<1x128x8x128xf32, #tpu.memory_space<vmem>>, vector<1x1x8x128xf32>,
    %c0_458 = arith.constant 0 : index
    %c34 = arith.constant 34 : index
    %c0_459 = arith.constant 0 : index
    %c0_460 = arith.constant 0 : index
    %753 = vector.load %arg4[%c0_458, %c34, %c0_459, %c0_460] : memref<1x128x8x128xf32, #tpu.memory_space<vmem>>, vector<1x1x8x128xf32>
    %754 = vector.shape_cast %753 : vector<1x1x8x128xf32> to vector<8x128xf32>
    %755 = arith.addf %754, %680 : vector<8x128xf32>
    %c0_461 = arith.constant 0 : index
    %c34_462 = arith.constant 34 : index
    %c0_463 = arith.constant 0 : index
    %c0_464 = arith.constant 0 : index
    %756 = vector.load %arg4[%c0_461, %c34_462, %c0_463, %c0_464] : memref<1x128x8x128xf32, #tpu.memory_space<vmem>>, vector<1x1x8x128xf32>
    %757 = vector.shape_cast %756 : vector<1x1x8x128xf32> to vector<8x128xf32>
    %758 = vector.shape_cast %755 : vector<8x128xf32> to vector<1x1x8x128xf32>
    tpu.vector_store %arg4[%c0_461, %c34_462, %c0_463, %c0_464], %758 {strides = array<i32>} : memref<1x128x8x128xf32, #tpu.memory_space<vmem>>, vector<1x1x8x128xf32>,
    %c0_465 = arith.constant 0 : index
    %c35 = arith.constant 35 : index
    %c0_466 = arith.constant 0 : index
    %c0_467 = arith.constant 0 : index
    %759 = vector.load %arg4[%c0_465, %c35, %c0_466, %c0_467] : memref<1x128x8x128xf32, #tpu.memory_space<vmem>>, vector<1x1x8x128xf32>
    %760 = vector.shape_cast %759 : vector<1x1x8x128xf32> to vector<8x128xf32>
    %761 = arith.addf %760, %692 : vector<8x128xf32>
    %c0_468 = arith.constant 0 : index
    %c35_469 = arith.constant 35 : index
    %c0_470 = arith.constant 0 : index
    %c0_471 = arith.constant 0 : index
    %762 = vector.load %arg4[%c0_468, %c35_469, %c0_470, %c0_471] : memref<1x128x8x128xf32, #tpu.memory_space<vmem>>, vector<1x1x8x128xf32>
    %763 = vector.shape_cast %762 : vector<1x1x8x128xf32> to vector<8x128xf32>
    %764 = vector.shape_cast %761 : vector<8x128xf32> to vector<1x1x8x128xf32>
    tpu.vector_store %arg4[%c0_468, %c35_469, %c0_470, %c0_471], %764 {strides = array<i32>} : memref<1x128x8x128xf32, #tpu.memory_space<vmem>>, vector<1x1x8x128xf32>,
    %c0_472 = arith.constant 0 : index
    %c36 = arith.constant 36 : index
    %c0_473 = arith.constant 0 : index
    %c0_474 = arith.constant 0 : index
    %765 = vector.load %arg4[%c0_472, %c36, %c0_473, %c0_474] : memref<1x128x8x128xf32, #tpu.memory_space<vmem>>, vector<1x1x8x128xf32>
    %766 = vector.shape_cast %765 : vector<1x1x8x128xf32> to vector<8x128xf32>
    %767 = arith.addf %766, %704 : vector<8x128xf32>
    %c0_475 = arith.constant 0 : index
    %c36_476 = arith.constant 36 : index
    %c0_477 = arith.constant 0 : index
    %c0_478 = arith.constant 0 : index
    %768 = vector.load %arg4[%c0_475, %c36_476, %c0_477, %c0_478] : memref<1x128x8x128xf32, #tpu.memory_space<vmem>>, vector<1x1x8x128xf32>
    %769 = vector.shape_cast %768 : vector<1x1x8x128xf32> to vector<8x128xf32>
    %770 = vector.shape_cast %767 : vector<8x128xf32> to vector<1x1x8x128xf32>
    tpu.vector_store %arg4[%c0_475, %c36_476, %c0_477, %c0_478], %770 {strides = array<i32>} : memref<1x128x8x128xf32, #tpu.memory_space<vmem>>, vector<1x1x8x128xf32>,
    %c0_479 = arith.constant 0 : index
    %c37 = arith.constant 37 : index
    %c0_480 = arith.constant 0 : index
    %c0_481 = arith.constant 0 : index
    %771 = vector.load %arg4[%c0_479, %c37, %c0_480, %c0_481] : memref<1x128x8x128xf32, #tpu.memory_space<vmem>>, vector<1x1x8x128xf32>
    %772 = vector.shape_cast %771 : vector<1x1x8x128xf32> to vector<8x128xf32>
    %773 = arith.addf %772, %716 : vector<8x128xf32>
    %c0_482 = arith.constant 0 : index
    %c37_483 = arith.constant 37 : index
    %c0_484 = arith.constant 0 : index
    %c0_485 = arith.constant 0 : index
    %774 = vector.load %arg4[%c0_482, %c37_483, %c0_484, %c0_485] : memref<1x128x8x128xf32, #tpu.memory_space<vmem>>, vector<1x1x8x128xf32>
    %775 = vector.shape_cast %774 : vector<1x1x8x128xf32> to vector<8x128xf32>
    %776 = vector.shape_cast %773 : vector<8x128xf32> to vector<1x1x8x128xf32>
    tpu.vector_store %arg4[%c0_482, %c37_483, %c0_484, %c0_485], %776 {strides = array<i32>} : memref<1x128x8x128xf32, #tpu.memory_space<vmem>>, vector<1x1x8x128xf32>,
    %c0_486 = arith.constant 0 : index
    %c38 = arith.constant 38 : index
    %c0_487 = arith.constant 0 : index
    %c0_488 = arith.constant 0 : index
    %777 = vector.load %arg4[%c0_486, %c38, %c0_487, %c0_488] : memref<1x128x8x128xf32, #tpu.memory_space<vmem>>, vector<1x1x8x128xf32>
    %778 = vector.shape_cast %777 : vector<1x1x8x128xf32> to vector<8x128xf32>
    %779 = arith.addf %778, %728 : vector<8x128xf32>
    %c0_489 = arith.constant 0 : index
    %c38_490 = arith.constant 38 : index
    %c0_491 = arith.constant 0 : index
    %c0_492 = arith.constant 0 : index
    %780 = vector.load %arg4[%c0_489, %c38_490, %c0_491, %c0_492] : memref<1x128x8x128xf32, #tpu.memory_space<vmem>>, vector<1x1x8x128xf32>
    %781 = vector.shape_cast %780 : vector<1x1x8x128xf32> to vector<8x128xf32>
    %782 = vector.shape_cast %779 : vector<8x128xf32> to vector<1x1x8x128xf32>
    tpu.vector_store %arg4[%c0_489, %c38_490, %c0_491, %c0_492], %782 {strides = array<i32>} : memref<1x128x8x128xf32, #tpu.memory_space<vmem>>, vector<1x1x8x128xf32>,
    %c0_493 = arith.constant 0 : index
    %c39 = arith.constant 39 : index
    %c0_494 = arith.constant 0 : index
    %c0_495 = arith.constant 0 : index
    %783 = vector.load %arg4[%c0_493, %c39, %c0_494, %c0_495] : memref<1x128x8x128xf32, #tpu.memory_space<vmem>>, vector<1x1x8x128xf32>
    %784 = vector.shape_cast %783 : vector<1x1x8x128xf32> to vector<8x128xf32>
    %785 = arith.addf %784, %740 : vector<8x128xf32>
    %c0_496 = arith.constant 0 : index
    %c39_497 = arith.constant 39 : index
    %c0_498 = arith.constant 0 : index
    %c0_499 = arith.constant 0 : index
    %786 = vector.load %arg4[%c0_496, %c39_497, %c0_498, %c0_499] : memref<1x128x8x128xf32, #tpu.memory_space<vmem>>, vector<1x1x8x128xf32>
    %787 = vector.shape_cast %786 : vector<1x1x8x128xf32> to vector<8x128xf32>
    %788 = vector.shape_cast %785 : vector<8x128xf32> to vector<1x1x8x128xf32>
    tpu.vector_store %arg4[%c0_496, %c39_497, %c0_498, %c0_499], %788 {strides = array<i32>} : memref<1x128x8x128xf32, #tpu.memory_space<vmem>>, vector<1x1x8x128xf32>,
    %cst_500 = arith.constant 0.000000e+00 : f32
    %789 = vector.broadcast %cst_500 : f32 to vector<8x128xf32>
    %cst_501 = arith.constant 0.000000e+00 : f32
    %790 = vector.broadcast %cst_501 : f32 to vector<8x128xf32>
    %cst_502 = arith.constant 0.000000e+00 : f32
    %791 = vector.broadcast %cst_502 : f32 to vector<8x128xf32>
    %cst_503 = arith.constant 0.000000e+00 : f32
    %792 = vector.broadcast %cst_503 : f32 to vector<8x128xf32>
    %cst_504 = arith.constant 0.000000e+00 : f32
    %793 = vector.broadcast %cst_504 : f32 to vector<8x128xf32>
    %cst_505 = arith.constant 0.000000e+00 : f32
    %794 = vector.broadcast %cst_505 : f32 to vector<8x128xf32>
    %cst_506 = arith.constant 0.000000e+00 : f32
    %795 = vector.broadcast %cst_506 : f32 to vector<8x128xf32>
    %cst_507 = arith.constant 0.000000e+00 : f32
    %796 = vector.broadcast %cst_507 : f32 to vector<8x128xf32>
    %c0_i32_508 = arith.constant 0 : i32
    %c128_i32_509 = arith.constant 128 : i32
    %797 = arith.muli %c0_i32_508, %c128_i32_509 : i32
    %798 = tpu.assume_multiple %797, 128 : i32
    %c0_510 = arith.constant 0 : index
    %799 = arith.index_cast %798 : i32 to index
    %800 = vector.load %arg2[%c0_510, %799] : memref<8x128xf32, #tpu.memory_space<vmem>>, vector<8x128xf32>
    %801 = arith.mulf %800, %3 : vector<8x128xf32>
    %cst_511 = arith.constant 0.024390243 : f32
    %802 = vector.broadcast %cst_511 : f32 to vector<8x128xf32>
    %803 = arith.mulf %801, %802 : vector<8x128xf32>
    %804 = math.roundeven %803 : vector<8x128xf32>
    %cst_512 = arith.constant -1.280000e+02 : f32
    %cst_513 = arith.constant 1.270000e+02 : f32
    %805 = vector.broadcast %cst_512 : f32 to vector<8x128xf32>
    %806 = arith.maximumf %805, %804 : vector<8x128xf32>
    %807 = vector.broadcast %cst_513 : f32 to vector<8x128xf32>
    %808 = arith.minimumf %807, %806 : vector<8x128xf32>
    %cst_514 = arith.constant 4.100000e+01 : f32
    %809 = vector.broadcast %cst_514 : f32 to vector<8x128xf32>
    %810 = arith.mulf %808, %809 : vector<8x128xf32>
    %811 = arith.subf %810, %801 : vector<8x128xf32>
    %812 = arith.mulf %811, %811 : vector<8x128xf32>
    %813 = arith.addf %789, %812 : vector<8x128xf32>
    %cst_515 = arith.constant 0.0238095243 : f32
    %814 = vector.broadcast %cst_515 : f32 to vector<8x128xf32>
    %815 = arith.mulf %801, %814 : vector<8x128xf32>
    %816 = math.roundeven %815 : vector<8x128xf32>
    %cst_516 = arith.constant -1.280000e+02 : f32
    %cst_517 = arith.constant 1.270000e+02 : f32
    %817 = vector.broadcast %cst_516 : f32 to vector<8x128xf32>
    %818 = arith.maximumf %817, %816 : vector<8x128xf32>
    %819 = vector.broadcast %cst_517 : f32 to vector<8x128xf32>
    %820 = arith.minimumf %819, %818 : vector<8x128xf32>
    %cst_518 = arith.constant 4.200000e+01 : f32
    %821 = vector.broadcast %cst_518 : f32 to vector<8x128xf32>
    %822 = arith.mulf %820, %821 : vector<8x128xf32>
    %823 = arith.subf %822, %801 : vector<8x128xf32>
    %824 = arith.mulf %823, %823 : vector<8x128xf32>
    %825 = arith.addf %790, %824 : vector<8x128xf32>
    %cst_519 = arith.constant 0.0232558139 : f32
    %826 = vector.broadcast %cst_519 : f32 to vector<8x128xf32>
    %827 = arith.mulf %801, %826 : vector<8x128xf32>
    %828 = math.roundeven %827 : vector<8x128xf32>
    %cst_520 = arith.constant -1.280000e+02 : f32
    %cst_521 = arith.constant 1.270000e+02 : f32
    %829 = vector.broadcast %cst_520 : f32 to vector<8x128xf32>
    %830 = arith.maximumf %829, %828 : vector<8x128xf32>
    %831 = vector.broadcast %cst_521 : f32 to vector<8x128xf32>
    %832 = arith.minimumf %831, %830 : vector<8x128xf32>
    %cst_522 = arith.constant 4.300000e+01 : f32
    %833 = vector.broadcast %cst_522 : f32 to vector<8x128xf32>
    %834 = arith.mulf %832, %833 : vector<8x128xf32>
    %835 = arith.subf %834, %801 : vector<8x128xf32>
    %836 = arith.mulf %835, %835 : vector<8x128xf32>
    %837 = arith.addf %791, %836 : vector<8x128xf32>
    %cst_523 = arith.constant 0.0227272734 : f32
    %838 = vector.broadcast %cst_523 : f32 to vector<8x128xf32>
    %839 = arith.mulf %801, %838 : vector<8x128xf32>
    %840 = math.roundeven %839 : vector<8x128xf32>
    %cst_524 = arith.constant -1.280000e+02 : f32
    %cst_525 = arith.constant 1.270000e+02 : f32
    %841 = vector.broadcast %cst_524 : f32 to vector<8x128xf32>
    %842 = arith.maximumf %841, %840 : vector<8x128xf32>
    %843 = vector.broadcast %cst_525 : f32 to vector<8x128xf32>
    %844 = arith.minimumf %843, %842 : vector<8x128xf32>
    %cst_526 = arith.constant 4.400000e+01 : f32
    %845 = vector.broadcast %cst_526 : f32 to vector<8x128xf32>
    %846 = arith.mulf %844, %845 : vector<8x128xf32>
    %847 = arith.subf %846, %801 : vector<8x128xf32>
    %848 = arith.mulf %847, %847 : vector<8x128xf32>
    %849 = arith.addf %792, %848 : vector<8x128xf32>
    %cst_527 = arith.constant 0.0222222228 : f32
    %850 = vector.broadcast %cst_527 : f32 to vector<8x128xf32>
    %851 = arith.mulf %801, %850 : vector<8x128xf32>
    %852 = math.roundeven %851 : vector<8x128xf32>
    %cst_528 = arith.constant -1.280000e+02 : f32
    %cst_529 = arith.constant 1.270000e+02 : f32
    %853 = vector.broadcast %cst_528 : f32 to vector<8x128xf32>
    %854 = arith.maximumf %853, %852 : vector<8x128xf32>
    %855 = vector.broadcast %cst_529 : f32 to vector<8x128xf32>
    %856 = arith.minimumf %855, %854 : vector<8x128xf32>
    %cst_530 = arith.constant 4.500000e+01 : f32
    %857 = vector.broadcast %cst_530 : f32 to vector<8x128xf32>
    %858 = arith.mulf %856, %857 : vector<8x128xf32>
    %859 = arith.subf %858, %801 : vector<8x128xf32>
    %860 = arith.mulf %859, %859 : vector<8x128xf32>
    %861 = arith.addf %793, %860 : vector<8x128xf32>
    %cst_531 = arith.constant 0.0217391308 : f32
    %862 = vector.broadcast %cst_531 : f32 to vector<8x128xf32>
    %863 = arith.mulf %801, %862 : vector<8x128xf32>
    %864 = math.roundeven %863 : vector<8x128xf32>
    %cst_532 = arith.constant -1.280000e+02 : f32
    %cst_533 = arith.constant 1.270000e+02 : f32
    %865 = vector.broadcast %cst_532 : f32 to vector<8x128xf32>
    %866 = arith.maximumf %865, %864 : vector<8x128xf32>
    %867 = vector.broadcast %cst_533 : f32 to vector<8x128xf32>
    %868 = arith.minimumf %867, %866 : vector<8x128xf32>
    %cst_534 = arith.constant 4.600000e+01 : f32
    %869 = vector.broadcast %cst_534 : f32 to vector<8x128xf32>
    %870 = arith.mulf %868, %869 : vector<8x128xf32>
    %871 = arith.subf %870, %801 : vector<8x128xf32>
    %872 = arith.mulf %871, %871 : vector<8x128xf32>
    %873 = arith.addf %794, %872 : vector<8x128xf32>
    %cst_535 = arith.constant 0.0212765951 : f32
    %874 = vector.broadcast %cst_535 : f32 to vector<8x128xf32>
    %875 = arith.mulf %801, %874 : vector<8x128xf32>
    %876 = math.roundeven %875 : vector<8x128xf32>
    %cst_536 = arith.constant -1.280000e+02 : f32
    %cst_537 = arith.constant 1.270000e+02 : f32
    %877 = vector.broadcast %cst_536 : f32 to vector<8x128xf32>
    %878 = arith.maximumf %877, %876 : vector<8x128xf32>
    %879 = vector.broadcast %cst_537 : f32 to vector<8x128xf32>
    %880 = arith.minimumf %879, %878 : vector<8x128xf32>
    %cst_538 = arith.constant 4.700000e+01 : f32
    %881 = vector.broadcast %cst_538 : f32 to vector<8x128xf32>
    %882 = arith.mulf %880, %881 : vector<8x128xf32>
    %883 = arith.subf %882, %801 : vector<8x128xf32>
    %884 = arith.mulf %883, %883 : vector<8x128xf32>
    %885 = arith.addf %795, %884 : vector<8x128xf32>
    %cst_539 = arith.constant 0.020833334 : f32
    %886 = vector.broadcast %cst_539 : f32 to vector<8x128xf32>
    %887 = arith.mulf %801, %886 : vector<8x128xf32>
    %888 = math.roundeven %887 : vector<8x128xf32>
    %cst_540 = arith.constant -1.280000e+02 : f32
    %cst_541 = arith.constant 1.270000e+02 : f32
    %889 = vector.broadcast %cst_540 : f32 to vector<8x128xf32>
    %890 = arith.maximumf %889, %888 : vector<8x128xf32>
    %891 = vector.broadcast %cst_541 : f32 to vector<8x128xf32>
    %892 = arith.minimumf %891, %890 : vector<8x128xf32>
    %cst_542 = arith.constant 4.800000e+01 : f32
    %893 = vector.broadcast %cst_542 : f32 to vector<8x128xf32>
    %894 = arith.mulf %892, %893 : vector<8x128xf32>
    %895 = arith.subf %894, %801 : vector<8x128xf32>
    %896 = arith.mulf %895, %895 : vector<8x128xf32>
    %897 = arith.addf %796, %896 : vector<8x128xf32>
    %c1_i32_543 = arith.constant 1 : i32
    %c0_544 = arith.constant 0 : index
    %c40 = arith.constant 40 : index
    %c0_545 = arith.constant 0 : index
    %c0_546 = arith.constant 0 : index
    %898 = vector.load %arg4[%c0_544, %c40, %c0_545, %c0_546] : memref<1x128x8x128xf32, #tpu.memory_space<vmem>>, vector<1x1x8x128xf32>
    %899 = vector.shape_cast %898 : vector<1x1x8x128xf32> to vector<8x128xf32>
    %900 = arith.addf %899, %813 : vector<8x128xf32>
    %c0_547 = arith.constant 0 : index
    %c40_548 = arith.constant 40 : index
    %c0_549 = arith.constant 0 : index
    %c0_550 = arith.constant 0 : index
    %901 = vector.load %arg4[%c0_547, %c40_548, %c0_549, %c0_550] : memref<1x128x8x128xf32, #tpu.memory_space<vmem>>, vector<1x1x8x128xf32>
    %902 = vector.shape_cast %901 : vector<1x1x8x128xf32> to vector<8x128xf32>
    %903 = vector.shape_cast %900 : vector<8x128xf32> to vector<1x1x8x128xf32>
    tpu.vector_store %arg4[%c0_547, %c40_548, %c0_549, %c0_550], %903 {strides = array<i32>} : memref<1x128x8x128xf32, #tpu.memory_space<vmem>>, vector<1x1x8x128xf32>,
    %c0_551 = arith.constant 0 : index
    %c41 = arith.constant 41 : index
    %c0_552 = arith.constant 0 : index
    %c0_553 = arith.constant 0 : index
    %904 = vector.load %arg4[%c0_551, %c41, %c0_552, %c0_553] : memref<1x128x8x128xf32, #tpu.memory_space<vmem>>, vector<1x1x8x128xf32>
    %905 = vector.shape_cast %904 : vector<1x1x8x128xf32> to vector<8x128xf32>
    %906 = arith.addf %905, %825 : vector<8x128xf32>
    %c0_554 = arith.constant 0 : index
    %c41_555 = arith.constant 41 : index
    %c0_556 = arith.constant 0 : index
    %c0_557 = arith.constant 0 : index
    %907 = vector.load %arg4[%c0_554, %c41_555, %c0_556, %c0_557] : memref<1x128x8x128xf32, #tpu.memory_space<vmem>>, vector<1x1x8x128xf32>
    %908 = vector.shape_cast %907 : vector<1x1x8x128xf32> to vector<8x128xf32>
    %909 = vector.shape_cast %906 : vector<8x128xf32> to vector<1x1x8x128xf32>
    tpu.vector_store %arg4[%c0_554, %c41_555, %c0_556, %c0_557], %909 {strides = array<i32>} : memref<1x128x8x128xf32, #tpu.memory_space<vmem>>, vector<1x1x8x128xf32>,
    %c0_558 = arith.constant 0 : index
    %c42 = arith.constant 42 : index
    %c0_559 = arith.constant 0 : index
    %c0_560 = arith.constant 0 : index
    %910 = vector.load %arg4[%c0_558, %c42, %c0_559, %c0_560] : memref<1x128x8x128xf32, #tpu.memory_space<vmem>>, vector<1x1x8x128xf32>
    %911 = vector.shape_cast %910 : vector<1x1x8x128xf32> to vector<8x128xf32>
    %912 = arith.addf %911, %837 : vector<8x128xf32>
    %c0_561 = arith.constant 0 : index
    %c42_562 = arith.constant 42 : index
    %c0_563 = arith.constant 0 : index
    %c0_564 = arith.constant 0 : index
    %913 = vector.load %arg4[%c0_561, %c42_562, %c0_563, %c0_564] : memref<1x128x8x128xf32, #tpu.memory_space<vmem>>, vector<1x1x8x128xf32>
    %914 = vector.shape_cast %913 : vector<1x1x8x128xf32> to vector<8x128xf32>
    %915 = vector.shape_cast %912 : vector<8x128xf32> to vector<1x1x8x128xf32>
    tpu.vector_store %arg4[%c0_561, %c42_562, %c0_563, %c0_564], %915 {strides = array<i32>} : memref<1x128x8x128xf32, #tpu.memory_space<vmem>>, vector<1x1x8x128xf32>,
    %c0_565 = arith.constant 0 : index
    %c43 = arith.constant 43 : index
    %c0_566 = arith.constant 0 : index
    %c0_567 = arith.constant 0 : index
    %916 = vector.load %arg4[%c0_565, %c43, %c0_566, %c0_567] : memref<1x128x8x128xf32, #tpu.memory_space<vmem>>, vector<1x1x8x128xf32>
    %917 = vector.shape_cast %916 : vector<1x1x8x128xf32> to vector<8x128xf32>
    %918 = arith.addf %917, %849 : vector<8x128xf32>
    %c0_568 = arith.constant 0 : index
    %c43_569 = arith.constant 43 : index
    %c0_570 = arith.constant 0 : index
    %c0_571 = arith.constant 0 : index
    %919 = vector.load %arg4[%c0_568, %c43_569, %c0_570, %c0_571] : memref<1x128x8x128xf32, #tpu.memory_space<vmem>>, vector<1x1x8x128xf32>
    %920 = vector.shape_cast %919 : vector<1x1x8x128xf32> to vector<8x128xf32>
    %921 = vector.shape_cast %918 : vector<8x128xf32> to vector<1x1x8x128xf32>
    tpu.vector_store %arg4[%c0_568, %c43_569, %c0_570, %c0_571], %921 {strides = array<i32>} : memref<1x128x8x128xf32, #tpu.memory_space<vmem>>, vector<1x1x8x128xf32>,
    %c0_572 = arith.constant 0 : index
    %c44 = arith.constant 44 : index
    %c0_573 = arith.constant 0 : index
    %c0_574 = arith.constant 0 : index
    %922 = vector.load %arg4[%c0_572, %c44, %c0_573, %c0_574] : memref<1x128x8x128xf32, #tpu.memory_space<vmem>>, vector<1x1x8x128xf32>
    %923 = vector.shape_cast %922 : vector<1x1x8x128xf32> to vector<8x128xf32>
    %924 = arith.addf %923, %861 : vector<8x128xf32>
    %c0_575 = arith.constant 0 : index
    %c44_576 = arith.constant 44 : index
    %c0_577 = arith.constant 0 : index
    %c0_578 = arith.constant 0 : index
    %925 = vector.load %arg4[%c0_575, %c44_576, %c0_577, %c0_578] : memref<1x128x8x128xf32, #tpu.memory_space<vmem>>, vector<1x1x8x128xf32>
    %926 = vector.shape_cast %925 : vector<1x1x8x128xf32> to vector<8x128xf32>
    %927 = vector.shape_cast %924 : vector<8x128xf32> to vector<1x1x8x128xf32>
    tpu.vector_store %arg4[%c0_575, %c44_576, %c0_577, %c0_578], %927 {strides = array<i32>} : memref<1x128x8x128xf32, #tpu.memory_space<vmem>>, vector<1x1x8x128xf32>,
    %c0_579 = arith.constant 0 : index
    %c45 = arith.constant 45 : index
    %c0_580 = arith.constant 0 : index
    %c0_581 = arith.constant 0 : index
    %928 = vector.load %arg4[%c0_579, %c45, %c0_580, %c0_581] : memref<1x128x8x128xf32, #tpu.memory_space<vmem>>, vector<1x1x8x128xf32>
    %929 = vector.shape_cast %928 : vector<1x1x8x128xf32> to vector<8x128xf32>
    %930 = arith.addf %929, %873 : vector<8x128xf32>
    %c0_582 = arith.constant 0 : index
    %c45_583 = arith.constant 45 : index
    %c0_584 = arith.constant 0 : index
    %c0_585 = arith.constant 0 : index
    %931 = vector.load %arg4[%c0_582, %c45_583, %c0_584, %c0_585] : memref<1x128x8x128xf32, #tpu.memory_space<vmem>>, vector<1x1x8x128xf32>
    %932 = vector.shape_cast %931 : vector<1x1x8x128xf32> to vector<8x128xf32>
    %933 = vector.shape_cast %930 : vector<8x128xf32> to vector<1x1x8x128xf32>
    tpu.vector_store %arg4[%c0_582, %c45_583, %c0_584, %c0_585], %933 {strides = array<i32>} : memref<1x128x8x128xf32, #tpu.memory_space<vmem>>, vector<1x1x8x128xf32>,
    %c0_586 = arith.constant 0 : index
    %c46 = arith.constant 46 : index
    %c0_587 = arith.constant 0 : index
    %c0_588 = arith.constant 0 : index
    %934 = vector.load %arg4[%c0_586, %c46, %c0_587, %c0_588] : memref<1x128x8x128xf32, #tpu.memory_space<vmem>>, vector<1x1x8x128xf32>
    %935 = vector.shape_cast %934 : vector<1x1x8x128xf32> to vector<8x128xf32>
    %936 = arith.addf %935, %885 : vector<8x128xf32>
    %c0_589 = arith.constant 0 : index
    %c46_590 = arith.constant 46 : index
    %c0_591 = arith.constant 0 : index
    %c0_592 = arith.constant 0 : index
    %937 = vector.load %arg4[%c0_589, %c46_590, %c0_591, %c0_592] : memref<1x128x8x128xf32, #tpu.memory_space<vmem>>, vector<1x1x8x128xf32>
    %938 = vector.shape_cast %937 : vector<1x1x8x128xf32> to vector<8x128xf32>
    %939 = vector.shape_cast %936 : vector<8x128xf32> to vector<1x1x8x128xf32>
    tpu.vector_store %arg4[%c0_589, %c46_590, %c0_591, %c0_592], %939 {strides = array<i32>} : memref<1x128x8x128xf32, #tpu.memory_space<vmem>>, vector<1x1x8x128xf32>,
    %c0_593 = arith.constant 0 : index
    %c47 = arith.constant 47 : index
    %c0_594 = arith.constant 0 : index
    %c0_595 = arith.constant 0 : index
    %940 = vector.load %arg4[%c0_593, %c47, %c0_594, %c0_595] : memref<1x128x8x128xf32, #tpu.memory_space<vmem>>, vector<1x1x8x128xf32>
    %941 = vector.shape_cast %940 : vector<1x1x8x128xf32> to vector<8x128xf32>
    %942 = arith.addf %941, %897 : vector<8x128xf32>
    %c0_596 = arith.constant 0 : index
    %c47_597 = arith.constant 47 : index
    %c0_598 = arith.constant 0 : index
    %c0_599 = arith.constant 0 : index
    %943 = vector.load %arg4[%c0_596, %c47_597, %c0_598, %c0_599] : memref<1x128x8x128xf32, #tpu.memory_space<vmem>>, vector<1x1x8x128xf32>
    %944 = vector.shape_cast %943 : vector<1x1x8x128xf32> to vector<8x128xf32>
    %945 = vector.shape_cast %942 : vector<8x128xf32> to vector<1x1x8x128xf32>
    tpu.vector_store %arg4[%c0_596, %c47_597, %c0_598, %c0_599], %945 {strides = array<i32>} : memref<1x128x8x128xf32, #tpu.memory_space<vmem>>, vector<1x1x8x128xf32>,
    %cst_600 = arith.constant 0.000000e+00 : f32
    %946 = vector.broadcast %cst_600 : f32 to vector<8x128xf32>
    %cst_601 = arith.constant 0.000000e+00 : f32
    %947 = vector.broadcast %cst_601 : f32 to vector<8x128xf32>
    %cst_602 = arith.constant 0.000000e+00 : f32
    %948 = vector.broadcast %cst_602 : f32 to vector<8x128xf32>
    %cst_603 = arith.constant 0.000000e+00 : f32
    %949 = vector.broadcast %cst_603 : f32 to vector<8x128xf32>
    %cst_604 = arith.constant 0.000000e+00 : f32
    %950 = vector.broadcast %cst_604 : f32 to vector<8x128xf32>
    %cst_605 = arith.constant 0.000000e+00 : f32
    %951 = vector.broadcast %cst_605 : f32 to vector<8x128xf32>
    %cst_606 = arith.constant 0.000000e+00 : f32
    %952 = vector.broadcast %cst_606 : f32 to vector<8x128xf32>
    %cst_607 = arith.constant 0.000000e+00 : f32
    %953 = vector.broadcast %cst_607 : f32 to vector<8x128xf32>
    %c0_i32_608 = arith.constant 0 : i32
    %c128_i32_609 = arith.constant 128 : i32
    %954 = arith.muli %c0_i32_608, %c128_i32_609 : i32
    %955 = tpu.assume_multiple %954, 128 : i32
    %c0_610 = arith.constant 0 : index
    %956 = arith.index_cast %955 : i32 to index
    %957 = vector.load %arg2[%c0_610, %956] : memref<8x128xf32, #tpu.memory_space<vmem>>, vector<8x128xf32>
    %958 = arith.mulf %957, %3 : vector<8x128xf32>
    %cst_611 = arith.constant 0.0204081628 : f32
    %959 = vector.broadcast %cst_611 : f32 to vector<8x128xf32>
    %960 = arith.mulf %958, %959 : vector<8x128xf32>
    %961 = math.roundeven %960 : vector<8x128xf32>
    %cst_612 = arith.constant -1.280000e+02 : f32
    %cst_613 = arith.constant 1.270000e+02 : f32
    %962 = vector.broadcast %cst_612 : f32 to vector<8x128xf32>
    %963 = arith.maximumf %962, %961 : vector<8x128xf32>
    %964 = vector.broadcast %cst_613 : f32 to vector<8x128xf32>
    %965 = arith.minimumf %964, %963 : vector<8x128xf32>
    %cst_614 = arith.constant 4.900000e+01 : f32
    %966 = vector.broadcast %cst_614 : f32 to vector<8x128xf32>
    %967 = arith.mulf %965, %966 : vector<8x128xf32>
    %968 = arith.subf %967, %958 : vector<8x128xf32>
    %969 = arith.mulf %968, %968 : vector<8x128xf32>
    %970 = arith.addf %946, %969 : vector<8x128xf32>
    %cst_615 = arith.constant 2.000000e-02 : f32
    %971 = vector.broadcast %cst_615 : f32 to vector<8x128xf32>
    %972 = arith.mulf %958, %971 : vector<8x128xf32>
    %973 = math.roundeven %972 : vector<8x128xf32>
    %cst_616 = arith.constant -1.280000e+02 : f32
    %cst_617 = arith.constant 1.270000e+02 : f32
    %974 = vector.broadcast %cst_616 : f32 to vector<8x128xf32>
    %975 = arith.maximumf %974, %973 : vector<8x128xf32>
    %976 = vector.broadcast %cst_617 : f32 to vector<8x128xf32>
    %977 = arith.minimumf %976, %975 : vector<8x128xf32>
    %cst_618 = arith.constant 5.000000e+01 : f32
    %978 = vector.broadcast %cst_618 : f32 to vector<8x128xf32>
    %979 = arith.mulf %977, %978 : vector<8x128xf32>
    %980 = arith.subf %979, %958 : vector<8x128xf32>
    %981 = arith.mulf %980, %980 : vector<8x128xf32>
    %982 = arith.addf %947, %981 : vector<8x128xf32>
    %cst_619 = arith.constant 0.0196078438 : f32
    %983 = vector.broadcast %cst_619 : f32 to vector<8x128xf32>
    %984 = arith.mulf %958, %983 : vector<8x128xf32>
    %985 = math.roundeven %984 : vector<8x128xf32>
    %cst_620 = arith.constant -1.280000e+02 : f32
    %cst_621 = arith.constant 1.270000e+02 : f32
    %986 = vector.broadcast %cst_620 : f32 to vector<8x128xf32>
    %987 = arith.maximumf %986, %985 : vector<8x128xf32>
    %988 = vector.broadcast %cst_621 : f32 to vector<8x128xf32>
    %989 = arith.minimumf %988, %987 : vector<8x128xf32>
    %cst_622 = arith.constant 5.100000e+01 : f32
    %990 = vector.broadcast %cst_622 : f32 to vector<8x128xf32>
    %991 = arith.mulf %989, %990 : vector<8x128xf32>
    %992 = arith.subf %991, %958 : vector<8x128xf32>
    %993 = arith.mulf %992, %992 : vector<8x128xf32>
    %994 = arith.addf %948, %993 : vector<8x128xf32>
    %cst_623 = arith.constant 0.0192307699 : f32
    %995 = vector.broadcast %cst_623 : f32 to vector<8x128xf32>
    %996 = arith.mulf %958, %995 : vector<8x128xf32>
    %997 = math.roundeven %996 : vector<8x128xf32>
    %cst_624 = arith.constant -1.280000e+02 : f32
    %cst_625 = arith.constant 1.270000e+02 : f32
    %998 = vector.broadcast %cst_624 : f32 to vector<8x128xf32>
    %999 = arith.maximumf %998, %997 : vector<8x128xf32>
    %1000 = vector.broadcast %cst_625 : f32 to vector<8x128xf32>
    %1001 = arith.minimumf %1000, %999 : vector<8x128xf32>
    %cst_626 = arith.constant 5.200000e+01 : f32
    %1002 = vector.broadcast %cst_626 : f32 to vector<8x128xf32>
    %1003 = arith.mulf %1001, %1002 : vector<8x128xf32>
    %1004 = arith.subf %1003, %958 : vector<8x128xf32>
    %1005 = arith.mulf %1004, %1004 : vector<8x128xf32>
    %1006 = arith.addf %949, %1005 : vector<8x128xf32>
    %cst_627 = arith.constant 0.0188679248 : f32
    %1007 = vector.broadcast %cst_627 : f32 to vector<8x128xf32>
    %1008 = arith.mulf %958, %1007 : vector<8x128xf32>
    %1009 = math.roundeven %1008 : vector<8x128xf32>
    %cst_628 = arith.constant -1.280000e+02 : f32
    %cst_629 = arith.constant 1.270000e+02 : f32
    %1010 = vector.broadcast %cst_628 : f32 to vector<8x128xf32>
    %1011 = arith.maximumf %1010, %1009 : vector<8x128xf32>
    %1012 = vector.broadcast %cst_629 : f32 to vector<8x128xf32>
    %1013 = arith.minimumf %1012, %1011 : vector<8x128xf32>
    %cst_630 = arith.constant 5.300000e+01 : f32
    %1014 = vector.broadcast %cst_630 : f32 to vector<8x128xf32>
    %1015 = arith.mulf %1013, %1014 : vector<8x128xf32>
    %1016 = arith.subf %1015, %958 : vector<8x128xf32>
    %1017 = arith.mulf %1016, %1016 : vector<8x128xf32>
    %1018 = arith.addf %950, %1017 : vector<8x128xf32>
    %cst_631 = arith.constant 0.0185185187 : f32
    %1019 = vector.broadcast %cst_631 : f32 to vector<8x128xf32>
    %1020 = arith.mulf %958, %1019 : vector<8x128xf32>
    %1021 = math.roundeven %1020 : vector<8x128xf32>
    %cst_632 = arith.constant -1.280000e+02 : f32
    %cst_633 = arith.constant 1.270000e+02 : f32
    %1022 = vector.broadcast %cst_632 : f32 to vector<8x128xf32>
    %1023 = arith.maximumf %1022, %1021 : vector<8x128xf32>
    %1024 = vector.broadcast %cst_633 : f32 to vector<8x128xf32>
    %1025 = arith.minimumf %1024, %1023 : vector<8x128xf32>
    %cst_634 = arith.constant 5.400000e+01 : f32
    %1026 = vector.broadcast %cst_634 : f32 to vector<8x128xf32>
    %1027 = arith.mulf %1025, %1026 : vector<8x128xf32>
    %1028 = arith.subf %1027, %958 : vector<8x128xf32>
    %1029 = arith.mulf %1028, %1028 : vector<8x128xf32>
    %1030 = arith.addf %951, %1029 : vector<8x128xf32>
    %cst_635 = arith.constant 0.0181818176 : f32
    %1031 = vector.broadcast %cst_635 : f32 to vector<8x128xf32>
    %1032 = arith.mulf %958, %1031 : vector<8x128xf32>
    %1033 = math.roundeven %1032 : vector<8x128xf32>
    %cst_636 = arith.constant -1.280000e+02 : f32
    %cst_637 = arith.constant 1.270000e+02 : f32
    %1034 = vector.broadcast %cst_636 : f32 to vector<8x128xf32>
    %1035 = arith.maximumf %1034, %1033 : vector<8x128xf32>
    %1036 = vector.broadcast %cst_637 : f32 to vector<8x128xf32>
    %1037 = arith.minimumf %1036, %1035 : vector<8x128xf32>
    %cst_638 = arith.constant 5.500000e+01 : f32
    %1038 = vector.broadcast %cst_638 : f32 to vector<8x128xf32>
    %1039 = arith.mulf %1037, %1038 : vector<8x128xf32>
    %1040 = arith.subf %1039, %958 : vector<8x128xf32>
    %1041 = arith.mulf %1040, %1040 : vector<8x128xf32>
    %1042 = arith.addf %952, %1041 : vector<8x128xf32>
    %cst_639 = arith.constant 0.0178571437 : f32
    %1043 = vector.broadcast %cst_639 : f32 to vector<8x128xf32>
    %1044 = arith.mulf %958, %1043 : vector<8x128xf32>
    %1045 = math.roundeven %1044 : vector<8x128xf32>
    %cst_640 = arith.constant -1.280000e+02 : f32
    %cst_641 = arith.constant 1.270000e+02 : f32
    %1046 = vector.broadcast %cst_640 : f32 to vector<8x128xf32>
    %1047 = arith.maximumf %1046, %1045 : vector<8x128xf32>
    %1048 = vector.broadcast %cst_641 : f32 to vector<8x128xf32>
    %1049 = arith.minimumf %1048, %1047 : vector<8x128xf32>
    %cst_642 = arith.constant 5.600000e+01 : f32
    %1050 = vector.broadcast %cst_642 : f32 to vector<8x128xf32>
    %1051 = arith.mulf %1049, %1050 : vector<8x128xf32>
    %1052 = arith.subf %1051, %958 : vector<8x128xf32>
    %1053 = arith.mulf %1052, %1052 : vector<8x128xf32>
    %1054 = arith.addf %953, %1053 : vector<8x128xf32>
    %c1_i32_643 = arith.constant 1 : i32
    %c0_644 = arith.constant 0 : index
    %c48 = arith.constant 48 : index
    %c0_645 = arith.constant 0 : index
    %c0_646 = arith.constant 0 : index
    %1055 = vector.load %arg4[%c0_644, %c48, %c0_645, %c0_646] : memref<1x128x8x128xf32, #tpu.memory_space<vmem>>, vector<1x1x8x128xf32>
    %1056 = vector.shape_cast %1055 : vector<1x1x8x128xf32> to vector<8x128xf32>
    %1057 = arith.addf %1056, %970 : vector<8x128xf32>
    %c0_647 = arith.constant 0 : index
    %c48_648 = arith.constant 48 : index
    %c0_649 = arith.constant 0 : index
    %c0_650 = arith.constant 0 : index
    %1058 = vector.load %arg4[%c0_647, %c48_648, %c0_649, %c0_650] : memref<1x128x8x128xf32, #tpu.memory_space<vmem>>, vector<1x1x8x128xf32>
    %1059 = vector.shape_cast %1058 : vector<1x1x8x128xf32> to vector<8x128xf32>
    %1060 = vector.shape_cast %1057 : vector<8x128xf32> to vector<1x1x8x128xf32>
    tpu.vector_store %arg4[%c0_647, %c48_648, %c0_649, %c0_650], %1060 {strides = array<i32>} : memref<1x128x8x128xf32, #tpu.memory_space<vmem>>, vector<1x1x8x128xf32>,
    %c0_651 = arith.constant 0 : index
    %c49 = arith.constant 49 : index
    %c0_652 = arith.constant 0 : index
    %c0_653 = arith.constant 0 : index
    %1061 = vector.load %arg4[%c0_651, %c49, %c0_652, %c0_653] : memref<1x128x8x128xf32, #tpu.memory_space<vmem>>, vector<1x1x8x128xf32>
    %1062 = vector.shape_cast %1061 : vector<1x1x8x128xf32> to vector<8x128xf32>
    %1063 = arith.addf %1062, %982 : vector<8x128xf32>
    %c0_654 = arith.constant 0 : index
    %c49_655 = arith.constant 49 : index
    %c0_656 = arith.constant 0 : index
    %c0_657 = arith.constant 0 : index
    %1064 = vector.load %arg4[%c0_654, %c49_655, %c0_656, %c0_657] : memref<1x128x8x128xf32, #tpu.memory_space<vmem>>, vector<1x1x8x128xf32>
    %1065 = vector.shape_cast %1064 : vector<1x1x8x128xf32> to vector<8x128xf32>
    %1066 = vector.shape_cast %1063 : vector<8x128xf32> to vector<1x1x8x128xf32>
    tpu.vector_store %arg4[%c0_654, %c49_655, %c0_656, %c0_657], %1066 {strides = array<i32>} : memref<1x128x8x128xf32, #tpu.memory_space<vmem>>, vector<1x1x8x128xf32>,
    %c0_658 = arith.constant 0 : index
    %c50 = arith.constant 50 : index
    %c0_659 = arith.constant 0 : index
    %c0_660 = arith.constant 0 : index
    %1067 = vector.load %arg4[%c0_658, %c50, %c0_659, %c0_660] : memref<1x128x8x128xf32, #tpu.memory_space<vmem>>, vector<1x1x8x128xf32>
    %1068 = vector.shape_cast %1067 : vector<1x1x8x128xf32> to vector<8x128xf32>
    %1069 = arith.addf %1068, %994 : vector<8x128xf32>
    %c0_661 = arith.constant 0 : index
    %c50_662 = arith.constant 50 : index
    %c0_663 = arith.constant 0 : index
    %c0_664 = arith.constant 0 : index
    %1070 = vector.load %arg4[%c0_661, %c50_662, %c0_663, %c0_664] : memref<1x128x8x128xf32, #tpu.memory_space<vmem>>, vector<1x1x8x128xf32>
    %1071 = vector.shape_cast %1070 : vector<1x1x8x128xf32> to vector<8x128xf32>
    %1072 = vector.shape_cast %1069 : vector<8x128xf32> to vector<1x1x8x128xf32>
    tpu.vector_store %arg4[%c0_661, %c50_662, %c0_663, %c0_664], %1072 {strides = array<i32>} : memref<1x128x8x128xf32, #tpu.memory_space<vmem>>, vector<1x1x8x128xf32>,
    %c0_665 = arith.constant 0 : index
    %c51 = arith.constant 51 : index
    %c0_666 = arith.constant 0 : index
    %c0_667 = arith.constant 0 : index
    %1073 = vector.load %arg4[%c0_665, %c51, %c0_666, %c0_667] : memref<1x128x8x128xf32, #tpu.memory_space<vmem>>, vector<1x1x8x128xf32>
    %1074 = vector.shape_cast %1073 : vector<1x1x8x128xf32> to vector<8x128xf32>
    %1075 = arith.addf %1074, %1006 : vector<8x128xf32>
    %c0_668 = arith.constant 0 : index
    %c51_669 = arith.constant 51 : index
    %c0_670 = arith.constant 0 : index
    %c0_671 = arith.constant 0 : index
    %1076 = vector.load %arg4[%c0_668, %c51_669, %c0_670, %c0_671] : memref<1x128x8x128xf32, #tpu.memory_space<vmem>>, vector<1x1x8x128xf32>
    %1077 = vector.shape_cast %1076 : vector<1x1x8x128xf32> to vector<8x128xf32>
    %1078 = vector.shape_cast %1075 : vector<8x128xf32> to vector<1x1x8x128xf32>
    tpu.vector_store %arg4[%c0_668, %c51_669, %c0_670, %c0_671], %1078 {strides = array<i32>} : memref<1x128x8x128xf32, #tpu.memory_space<vmem>>, vector<1x1x8x128xf32>,
    %c0_672 = arith.constant 0 : index
    %c52 = arith.constant 52 : index
    %c0_673 = arith.constant 0 : index
    %c0_674 = arith.constant 0 : index
    %1079 = vector.load %arg4[%c0_672, %c52, %c0_673, %c0_674] : memref<1x128x8x128xf32, #tpu.memory_space<vmem>>, vector<1x1x8x128xf32>
    %1080 = vector.shape_cast %1079 : vector<1x1x8x128xf32> to vector<8x128xf32>
    %1081 = arith.addf %1080, %1018 : vector<8x128xf32>
    %c0_675 = arith.constant 0 : index
    %c52_676 = arith.constant 52 : index
    %c0_677 = arith.constant 0 : index
    %c0_678 = arith.constant 0 : index
    %1082 = vector.load %arg4[%c0_675, %c52_676, %c0_677, %c0_678] : memref<1x128x8x128xf32, #tpu.memory_space<vmem>>, vector<1x1x8x128xf32>
    %1083 = vector.shape_cast %1082 : vector<1x1x8x128xf32> to vector<8x128xf32>
    %1084 = vector.shape_cast %1081 : vector<8x128xf32> to vector<1x1x8x128xf32>
    tpu.vector_store %arg4[%c0_675, %c52_676, %c0_677, %c0_678], %1084 {strides = array<i32>} : memref<1x128x8x128xf32, #tpu.memory_space<vmem>>, vector<1x1x8x128xf32>,
    %c0_679 = arith.constant 0 : index
    %c53 = arith.constant 53 : index
    %c0_680 = arith.constant 0 : index
    %c0_681 = arith.constant 0 : index
    %1085 = vector.load %arg4[%c0_679, %c53, %c0_680, %c0_681] : memref<1x128x8x128xf32, #tpu.memory_space<vmem>>, vector<1x1x8x128xf32>
    %1086 = vector.shape_cast %1085 : vector<1x1x8x128xf32> to vector<8x128xf32>
    %1087 = arith.addf %1086, %1030 : vector<8x128xf32>
    %c0_682 = arith.constant 0 : index
    %c53_683 = arith.constant 53 : index
    %c0_684 = arith.constant 0 : index
    %c0_685 = arith.constant 0 : index
    %1088 = vector.load %arg4[%c0_682, %c53_683, %c0_684, %c0_685] : memref<1x128x8x128xf32, #tpu.memory_space<vmem>>, vector<1x1x8x128xf32>
    %1089 = vector.shape_cast %1088 : vector<1x1x8x128xf32> to vector<8x128xf32>
    %1090 = vector.shape_cast %1087 : vector<8x128xf32> to vector<1x1x8x128xf32>
    tpu.vector_store %arg4[%c0_682, %c53_683, %c0_684, %c0_685], %1090 {strides = array<i32>} : memref<1x128x8x128xf32, #tpu.memory_space<vmem>>, vector<1x1x8x128xf32>,
    %c0_686 = arith.constant 0 : index
    %c54 = arith.constant 54 : index
    %c0_687 = arith.constant 0 : index
    %c0_688 = arith.constant 0 : index
    %1091 = vector.load %arg4[%c0_686, %c54, %c0_687, %c0_688] : memref<1x128x8x128xf32, #tpu.memory_space<vmem>>, vector<1x1x8x128xf32>
    %1092 = vector.shape_cast %1091 : vector<1x1x8x128xf32> to vector<8x128xf32>
    %1093 = arith.addf %1092, %1042 : vector<8x128xf32>
    %c0_689 = arith.constant 0 : index
    %c54_690 = arith.constant 54 : index
    %c0_691 = arith.constant 0 : index
    %c0_692 = arith.constant 0 : index
    %1094 = vector.load %arg4[%c0_689, %c54_690, %c0_691, %c0_692] : memref<1x128x8x128xf32, #tpu.memory_space<vmem>>, vector<1x1x8x128xf32>
    %1095 = vector.shape_cast %1094 : vector<1x1x8x128xf32> to vector<8x128xf32>
    %1096 = vector.shape_cast %1093 : vector<8x128xf32> to vector<1x1x8x128xf32>
    tpu.vector_store %arg4[%c0_689, %c54_690, %c0_691, %c0_692], %1096 {strides = array<i32>} : memref<1x128x8x128xf32, #tpu.memory_space<vmem>>, vector<1x1x8x128xf32>,
    %c0_693 = arith.constant 0 : index
    %c55 = arith.constant 55 : index
    %c0_694 = arith.constant 0 : index
    %c0_695 = arith.constant 0 : index
    %1097 = vector.load %arg4[%c0_693, %c55, %c0_694, %c0_695] : memref<1x128x8x128xf32, #tpu.memory_space<vmem>>, vector<1x1x8x128xf32>
    %1098 = vector.shape_cast %1097 : vector<1x1x8x128xf32> to vector<8x128xf32>
    %1099 = arith.addf %1098, %1054 : vector<8x128xf32>
    %c0_696 = arith.constant 0 : index
    %c55_697 = arith.constant 55 : index
    %c0_698 = arith.constant 0 : index
    %c0_699 = arith.constant 0 : index
    %1100 = vector.load %arg4[%c0_696, %c55_697, %c0_698, %c0_699] : memref<1x128x8x128xf32, #tpu.memory_space<vmem>>, vector<1x1x8x128xf32>
    %1101 = vector.shape_cast %1100 : vector<1x1x8x128xf32> to vector<8x128xf32>
    %1102 = vector.shape_cast %1099 : vector<8x128xf32> to vector<1x1x8x128xf32>
    tpu.vector_store %arg4[%c0_696, %c55_697, %c0_698, %c0_699], %1102 {strides = array<i32>} : memref<1x128x8x128xf32, #tpu.memory_space<vmem>>, vector<1x1x8x128xf32>,
    %cst_700 = arith.constant 0.000000e+00 : f32
    %1103 = vector.broadcast %cst_700 : f32 to vector<8x128xf32>
    %cst_701 = arith.constant 0.000000e+00 : f32
    %1104 = vector.broadcast %cst_701 : f32 to vector<8x128xf32>
    %cst_702 = arith.constant 0.000000e+00 : f32
    %1105 = vector.broadcast %cst_702 : f32 to vector<8x128xf32>
    %cst_703 = arith.constant 0.000000e+00 : f32
    %1106 = vector.broadcast %cst_703 : f32 to vector<8x128xf32>
    %cst_704 = arith.constant 0.000000e+00 : f32
    %1107 = vector.broadcast %cst_704 : f32 to vector<8x128xf32>
    %cst_705 = arith.constant 0.000000e+00 : f32
    %1108 = vector.broadcast %cst_705 : f32 to vector<8x128xf32>
    %cst_706 = arith.constant 0.000000e+00 : f32
    %1109 = vector.broadcast %cst_706 : f32 to vector<8x128xf32>
    %cst_707 = arith.constant 0.000000e+00 : f32
    %1110 = vector.broadcast %cst_707 : f32 to vector<8x128xf32>
    %c0_i32_708 = arith.constant 0 : i32
    %c128_i32_709 = arith.constant 128 : i32
    %1111 = arith.muli %c0_i32_708, %c128_i32_709 : i32
    %1112 = tpu.assume_multiple %1111, 128 : i32
    %c0_710 = arith.constant 0 : index
    %1113 = arith.index_cast %1112 : i32 to index
    %1114 = vector.load %arg2[%c0_710, %1113] : memref<8x128xf32, #tpu.memory_space<vmem>>, vector<8x128xf32>
    %1115 = arith.mulf %1114, %3 : vector<8x128xf32>
    %cst_711 = arith.constant 0.0175438598 : f32
    %1116 = vector.broadcast %cst_711 : f32 to vector<8x128xf32>
    %1117 = arith.mulf %1115, %1116 : vector<8x128xf32>
    %1118 = math.roundeven %1117 : vector<8x128xf32>
    %cst_712 = arith.constant -1.280000e+02 : f32
    %cst_713 = arith.constant 1.270000e+02 : f32
    %1119 = vector.broadcast %cst_712 : f32 to vector<8x128xf32>
    %1120 = arith.maximumf %1119, %1118 : vector<8x128xf32>
    %1121 = vector.broadcast %cst_713 : f32 to vector<8x128xf32>
    %1122 = arith.minimumf %1121, %1120 : vector<8x128xf32>
    %cst_714 = arith.constant 5.700000e+01 : f32
    %1123 = vector.broadcast %cst_714 : f32 to vector<8x128xf32>
    %1124 = arith.mulf %1122, %1123 : vector<8x128xf32>
    %1125 = arith.subf %1124, %1115 : vector<8x128xf32>
    %1126 = arith.mulf %1125, %1125 : vector<8x128xf32>
    %1127 = arith.addf %1103, %1126 : vector<8x128xf32>
    %cst_715 = arith.constant 0.0172413792 : f32
    %1128 = vector.broadcast %cst_715 : f32 to vector<8x128xf32>
    %1129 = arith.mulf %1115, %1128 : vector<8x128xf32>
    %1130 = math.roundeven %1129 : vector<8x128xf32>
    %cst_716 = arith.constant -1.280000e+02 : f32
    %cst_717 = arith.constant 1.270000e+02 : f32
    %1131 = vector.broadcast %cst_716 : f32 to vector<8x128xf32>
    %1132 = arith.maximumf %1131, %1130 : vector<8x128xf32>
    %1133 = vector.broadcast %cst_717 : f32 to vector<8x128xf32>
    %1134 = arith.minimumf %1133, %1132 : vector<8x128xf32>
    %cst_718 = arith.constant 5.800000e+01 : f32
    %1135 = vector.broadcast %cst_718 : f32 to vector<8x128xf32>
    %1136 = arith.mulf %1134, %1135 : vector<8x128xf32>
    %1137 = arith.subf %1136, %1115 : vector<8x128xf32>
    %1138 = arith.mulf %1137, %1137 : vector<8x128xf32>
    %1139 = arith.addf %1104, %1138 : vector<8x128xf32>
    %cst_719 = arith.constant 0.0169491526 : f32
    %1140 = vector.broadcast %cst_719 : f32 to vector<8x128xf32>
    %1141 = arith.mulf %1115, %1140 : vector<8x128xf32>
    %1142 = math.roundeven %1141 : vector<8x128xf32>
    %cst_720 = arith.constant -1.280000e+02 : f32
    %cst_721 = arith.constant 1.270000e+02 : f32
    %1143 = vector.broadcast %cst_720 : f32 to vector<8x128xf32>
    %1144 = arith.maximumf %1143, %1142 : vector<8x128xf32>
    %1145 = vector.broadcast %cst_721 : f32 to vector<8x128xf32>
    %1146 = arith.minimumf %1145, %1144 : vector<8x128xf32>
    %cst_722 = arith.constant 5.900000e+01 : f32
    %1147 = vector.broadcast %cst_722 : f32 to vector<8x128xf32>
    %1148 = arith.mulf %1146, %1147 : vector<8x128xf32>
    %1149 = arith.subf %1148, %1115 : vector<8x128xf32>
    %1150 = arith.mulf %1149, %1149 : vector<8x128xf32>
    %1151 = arith.addf %1105, %1150 : vector<8x128xf32>
    %cst_723 = arith.constant 0.0166666675 : f32
    %1152 = vector.broadcast %cst_723 : f32 to vector<8x128xf32>
    %1153 = arith.mulf %1115, %1152 : vector<8x128xf32>
    %1154 = math.roundeven %1153 : vector<8x128xf32>
    %cst_724 = arith.constant -1.280000e+02 : f32
    %cst_725 = arith.constant 1.270000e+02 : f32
    %1155 = vector.broadcast %cst_724 : f32 to vector<8x128xf32>
    %1156 = arith.maximumf %1155, %1154 : vector<8x128xf32>
    %1157 = vector.broadcast %cst_725 : f32 to vector<8x128xf32>
    %1158 = arith.minimumf %1157, %1156 : vector<8x128xf32>
    %cst_726 = arith.constant 6.000000e+01 : f32
    %1159 = vector.broadcast %cst_726 : f32 to vector<8x128xf32>
    %1160 = arith.mulf %1158, %1159 : vector<8x128xf32>
    %1161 = arith.subf %1160, %1115 : vector<8x128xf32>
    %1162 = arith.mulf %1161, %1161 : vector<8x128xf32>
    %1163 = arith.addf %1106, %1162 : vector<8x128xf32>
    %cst_727 = arith.constant 0.0163934417 : f32
    %1164 = vector.broadcast %cst_727 : f32 to vector<8x128xf32>
    %1165 = arith.mulf %1115, %1164 : vector<8x128xf32>
    %1166 = math.roundeven %1165 : vector<8x128xf32>
    %cst_728 = arith.constant -1.280000e+02 : f32
    %cst_729 = arith.constant 1.270000e+02 : f32
    %1167 = vector.broadcast %cst_728 : f32 to vector<8x128xf32>
    %1168 = arith.maximumf %1167, %1166 : vector<8x128xf32>
    %1169 = vector.broadcast %cst_729 : f32 to vector<8x128xf32>
    %1170 = arith.minimumf %1169, %1168 : vector<8x128xf32>
    %cst_730 = arith.constant 6.100000e+01 : f32
    %1171 = vector.broadcast %cst_730 : f32 to vector<8x128xf32>
    %1172 = arith.mulf %1170, %1171 : vector<8x128xf32>
    %1173 = arith.subf %1172, %1115 : vector<8x128xf32>
    %1174 = arith.mulf %1173, %1173 : vector<8x128xf32>
    %1175 = arith.addf %1107, %1174 : vector<8x128xf32>
    %cst_731 = arith.constant 0.0161290318 : f32
    %1176 = vector.broadcast %cst_731 : f32 to vector<8x128xf32>
    %1177 = arith.mulf %1115, %1176 : vector<8x128xf32>
    %1178 = math.roundeven %1177 : vector<8x128xf32>
    %cst_732 = arith.constant -1.280000e+02 : f32
    %cst_733 = arith.constant 1.270000e+02 : f32
    %1179 = vector.broadcast %cst_732 : f32 to vector<8x128xf32>
    %1180 = arith.maximumf %1179, %1178 : vector<8x128xf32>
    %1181 = vector.broadcast %cst_733 : f32 to vector<8x128xf32>
    %1182 = arith.minimumf %1181, %1180 : vector<8x128xf32>
    %cst_734 = arith.constant 6.200000e+01 : f32
    %1183 = vector.broadcast %cst_734 : f32 to vector<8x128xf32>
    %1184 = arith.mulf %1182, %1183 : vector<8x128xf32>
    %1185 = arith.subf %1184, %1115 : vector<8x128xf32>
    %1186 = arith.mulf %1185, %1185 : vector<8x128xf32>
    %1187 = arith.addf %1108, %1186 : vector<8x128xf32>
    %cst_735 = arith.constant 0.0158730168 : f32
    %1188 = vector.broadcast %cst_735 : f32 to vector<8x128xf32>
    %1189 = arith.mulf %1115, %1188 : vector<8x128xf32>
    %1190 = math.roundeven %1189 : vector<8x128xf32>
    %cst_736 = arith.constant -1.280000e+02 : f32
    %cst_737 = arith.constant 1.270000e+02 : f32
    %1191 = vector.broadcast %cst_736 : f32 to vector<8x128xf32>
    %1192 = arith.maximumf %1191, %1190 : vector<8x128xf32>
    %1193 = vector.broadcast %cst_737 : f32 to vector<8x128xf32>
    %1194 = arith.minimumf %1193, %1192 : vector<8x128xf32>
    %cst_738 = arith.constant 6.300000e+01 : f32
    %1195 = vector.broadcast %cst_738 : f32 to vector<8x128xf32>
    %1196 = arith.mulf %1194, %1195 : vector<8x128xf32>
    %1197 = arith.subf %1196, %1115 : vector<8x128xf32>
    %1198 = arith.mulf %1197, %1197 : vector<8x128xf32>
    %1199 = arith.addf %1109, %1198 : vector<8x128xf32>
    %cst_739 = arith.constant 1.562500e-02 : f32
    %1200 = vector.broadcast %cst_739 : f32 to vector<8x128xf32>
    %1201 = arith.mulf %1115, %1200 : vector<8x128xf32>
    %1202 = math.roundeven %1201 : vector<8x128xf32>
    %cst_740 = arith.constant -1.280000e+02 : f32
    %cst_741 = arith.constant 1.270000e+02 : f32
    %1203 = vector.broadcast %cst_740 : f32 to vector<8x128xf32>
    %1204 = arith.maximumf %1203, %1202 : vector<8x128xf32>
    %1205 = vector.broadcast %cst_741 : f32 to vector<8x128xf32>
    %1206 = arith.minimumf %1205, %1204 : vector<8x128xf32>
    %cst_742 = arith.constant 6.400000e+01 : f32
    %1207 = vector.broadcast %cst_742 : f32 to vector<8x128xf32>
    %1208 = arith.mulf %1206, %1207 : vector<8x128xf32>
    %1209 = arith.subf %1208, %1115 : vector<8x128xf32>
    %1210 = arith.mulf %1209, %1209 : vector<8x128xf32>
    %1211 = arith.addf %1110, %1210 : vector<8x128xf32>
    %c1_i32_743 = arith.constant 1 : i32
    %c0_744 = arith.constant 0 : index
    %c56 = arith.constant 56 : index
    %c0_745 = arith.constant 0 : index
    %c0_746 = arith.constant 0 : index
    %1212 = vector.load %arg4[%c0_744, %c56, %c0_745, %c0_746] : memref<1x128x8x128xf32, #tpu.memory_space<vmem>>, vector<1x1x8x128xf32>
    %1213 = vector.shape_cast %1212 : vector<1x1x8x128xf32> to vector<8x128xf32>
    %1214 = arith.addf %1213, %1127 : vector<8x128xf32>
    %c0_747 = arith.constant 0 : index
    %c56_748 = arith.constant 56 : index
    %c0_749 = arith.constant 0 : index
    %c0_750 = arith.constant 0 : index
    %1215 = vector.load %arg4[%c0_747, %c56_748, %c0_749, %c0_750] : memref<1x128x8x128xf32, #tpu.memory_space<vmem>>, vector<1x1x8x128xf32>
    %1216 = vector.shape_cast %1215 : vector<1x1x8x128xf32> to vector<8x128xf32>
    %1217 = vector.shape_cast %1214 : vector<8x128xf32> to vector<1x1x8x128xf32>
    tpu.vector_store %arg4[%c0_747, %c56_748, %c0_749, %c0_750], %1217 {strides = array<i32>} : memref<1x128x8x128xf32, #tpu.memory_space<vmem>>, vector<1x1x8x128xf32>,
    %c0_751 = arith.constant 0 : index
    %c57 = arith.constant 57 : index
    %c0_752 = arith.constant 0 : index
    %c0_753 = arith.constant 0 : index
    %1218 = vector.load %arg4[%c0_751, %c57, %c0_752, %c0_753] : memref<1x128x8x128xf32, #tpu.memory_space<vmem>>, vector<1x1x8x128xf32>
    %1219 = vector.shape_cast %1218 : vector<1x1x8x128xf32> to vector<8x128xf32>
    %1220 = arith.addf %1219, %1139 : vector<8x128xf32>
    %c0_754 = arith.constant 0 : index
    %c57_755 = arith.constant 57 : index
    %c0_756 = arith.constant 0 : index
    %c0_757 = arith.constant 0 : index
    %1221 = vector.load %arg4[%c0_754, %c57_755, %c0_756, %c0_757] : memref<1x128x8x128xf32, #tpu.memory_space<vmem>>, vector<1x1x8x128xf32>
    %1222 = vector.shape_cast %1221 : vector<1x1x8x128xf32> to vector<8x128xf32>
    %1223 = vector.shape_cast %1220 : vector<8x128xf32> to vector<1x1x8x128xf32>
    tpu.vector_store %arg4[%c0_754, %c57_755, %c0_756, %c0_757], %1223 {strides = array<i32>} : memref<1x128x8x128xf32, #tpu.memory_space<vmem>>, vector<1x1x8x128xf32>,
    %c0_758 = arith.constant 0 : index
    %c58 = arith.constant 58 : index
    %c0_759 = arith.constant 0 : index
    %c0_760 = arith.constant 0 : index
    %1224 = vector.load %arg4[%c0_758, %c58, %c0_759, %c0_760] : memref<1x128x8x128xf32, #tpu.memory_space<vmem>>, vector<1x1x8x128xf32>
    %1225 = vector.shape_cast %1224 : vector<1x1x8x128xf32> to vector<8x128xf32>
    %1226 = arith.addf %1225, %1151 : vector<8x128xf32>
    %c0_761 = arith.constant 0 : index
    %c58_762 = arith.constant 58 : index
    %c0_763 = arith.constant 0 : index
    %c0_764 = arith.constant 0 : index
    %1227 = vector.load %arg4[%c0_761, %c58_762, %c0_763, %c0_764] : memref<1x128x8x128xf32, #tpu.memory_space<vmem>>, vector<1x1x8x128xf32>
    %1228 = vector.shape_cast %1227 : vector<1x1x8x128xf32> to vector<8x128xf32>
    %1229 = vector.shape_cast %1226 : vector<8x128xf32> to vector<1x1x8x128xf32>
    tpu.vector_store %arg4[%c0_761, %c58_762, %c0_763, %c0_764], %1229 {strides = array<i32>} : memref<1x128x8x128xf32, #tpu.memory_space<vmem>>, vector<1x1x8x128xf32>,
    %c0_765 = arith.constant 0 : index
    %c59 = arith.constant 59 : index
    %c0_766 = arith.constant 0 : index
    %c0_767 = arith.constant 0 : index
    %1230 = vector.load %arg4[%c0_765, %c59, %c0_766, %c0_767] : memref<1x128x8x128xf32, #tpu.memory_space<vmem>>, vector<1x1x8x128xf32>
    %1231 = vector.shape_cast %1230 : vector<1x1x8x128xf32> to vector<8x128xf32>
    %1232 = arith.addf %1231, %1163 : vector<8x128xf32>
    %c0_768 = arith.constant 0 : index
    %c59_769 = arith.constant 59 : index
    %c0_770 = arith.constant 0 : index
    %c0_771 = arith.constant 0 : index
    %1233 = vector.load %arg4[%c0_768, %c59_769, %c0_770, %c0_771] : memref<1x128x8x128xf32, #tpu.memory_space<vmem>>, vector<1x1x8x128xf32>
    %1234 = vector.shape_cast %1233 : vector<1x1x8x128xf32> to vector<8x128xf32>
    %1235 = vector.shape_cast %1232 : vector<8x128xf32> to vector<1x1x8x128xf32>
    tpu.vector_store %arg4[%c0_768, %c59_769, %c0_770, %c0_771], %1235 {strides = array<i32>} : memref<1x128x8x128xf32, #tpu.memory_space<vmem>>, vector<1x1x8x128xf32>,
    %c0_772 = arith.constant 0 : index
    %c60 = arith.constant 60 : index
    %c0_773 = arith.constant 0 : index
    %c0_774 = arith.constant 0 : index
    %1236 = vector.load %arg4[%c0_772, %c60, %c0_773, %c0_774] : memref<1x128x8x128xf32, #tpu.memory_space<vmem>>, vector<1x1x8x128xf32>
    %1237 = vector.shape_cast %1236 : vector<1x1x8x128xf32> to vector<8x128xf32>
    %1238 = arith.addf %1237, %1175 : vector<8x128xf32>
    %c0_775 = arith.constant 0 : index
    %c60_776 = arith.constant 60 : index
    %c0_777 = arith.constant 0 : index
    %c0_778 = arith.constant 0 : index
    %1239 = vector.load %arg4[%c0_775, %c60_776, %c0_777, %c0_778] : memref<1x128x8x128xf32, #tpu.memory_space<vmem>>, vector<1x1x8x128xf32>
    %1240 = vector.shape_cast %1239 : vector<1x1x8x128xf32> to vector<8x128xf32>
    %1241 = vector.shape_cast %1238 : vector<8x128xf32> to vector<1x1x8x128xf32>
    tpu.vector_store %arg4[%c0_775, %c60_776, %c0_777, %c0_778], %1241 {strides = array<i32>} : memref<1x128x8x128xf32, #tpu.memory_space<vmem>>, vector<1x1x8x128xf32>,
    %c0_779 = arith.constant 0 : index
    %c61 = arith.constant 61 : index
    %c0_780 = arith.constant 0 : index
    %c0_781 = arith.constant 0 : index
    %1242 = vector.load %arg4[%c0_779, %c61, %c0_780, %c0_781] : memref<1x128x8x128xf32, #tpu.memory_space<vmem>>, vector<1x1x8x128xf32>
    %1243 = vector.shape_cast %1242 : vector<1x1x8x128xf32> to vector<8x128xf32>
    %1244 = arith.addf %1243, %1187 : vector<8x128xf32>
    %c0_782 = arith.constant 0 : index
    %c61_783 = arith.constant 61 : index
    %c0_784 = arith.constant 0 : index
    %c0_785 = arith.constant 0 : index
    %1245 = vector.load %arg4[%c0_782, %c61_783, %c0_784, %c0_785] : memref<1x128x8x128xf32, #tpu.memory_space<vmem>>, vector<1x1x8x128xf32>
    %1246 = vector.shape_cast %1245 : vector<1x1x8x128xf32> to vector<8x128xf32>
    %1247 = vector.shape_cast %1244 : vector<8x128xf32> to vector<1x1x8x128xf32>
    tpu.vector_store %arg4[%c0_782, %c61_783, %c0_784, %c0_785], %1247 {strides = array<i32>} : memref<1x128x8x128xf32, #tpu.memory_space<vmem>>, vector<1x1x8x128xf32>,
    %c0_786 = arith.constant 0 : index
    %c62 = arith.constant 62 : index
    %c0_787 = arith.constant 0 : index
    %c0_788 = arith.constant 0 : index
    %1248 = vector.load %arg4[%c0_786, %c62, %c0_787, %c0_788] : memref<1x128x8x128xf32, #tpu.memory_space<vmem>>, vector<1x1x8x128xf32>
    %1249 = vector.shape_cast %1248 : vector<1x1x8x128xf32> to vector<8x128xf32>
    %1250 = arith.addf %1249, %1199 : vector<8x128xf32>
    %c0_789 = arith.constant 0 : index
    %c62_790 = arith.constant 62 : index
    %c0_791 = arith.constant 0 : index
    %c0_792 = arith.constant 0 : index
    %1251 = vector.load %arg4[%c0_789, %c62_790, %c0_791, %c0_792] : memref<1x128x8x128xf32, #tpu.memory_space<vmem>>, vector<1x1x8x128xf32>
    %1252 = vector.shape_cast %1251 : vector<1x1x8x128xf32> to vector<8x128xf32>
    %1253 = vector.shape_cast %1250 : vector<8x128xf32> to vector<1x1x8x128xf32>
    tpu.vector_store %arg4[%c0_789, %c62_790, %c0_791, %c0_792], %1253 {strides = array<i32>} : memref<1x128x8x128xf32, #tpu.memory_space<vmem>>, vector<1x1x8x128xf32>,
    %c0_793 = arith.constant 0 : index
    %c63 = arith.constant 63 : index
    %c0_794 = arith.constant 0 : index
    %c0_795 = arith.constant 0 : index
    %1254 = vector.load %arg4[%c0_793, %c63, %c0_794, %c0_795] : memref<1x128x8x128xf32, #tpu.memory_space<vmem>>, vector<1x1x8x128xf32>
    %1255 = vector.shape_cast %1254 : vector<1x1x8x128xf32> to vector<8x128xf32>
    %1256 = arith.addf %1255, %1211 : vector<8x128xf32>
    %c0_796 = arith.constant 0 : index
    %c63_797 = arith.constant 63 : index
    %c0_798 = arith.constant 0 : index
    %c0_799 = arith.constant 0 : index
    %1257 = vector.load %arg4[%c0_796, %c63_797, %c0_798, %c0_799] : memref<1x128x8x128xf32, #tpu.memory_space<vmem>>, vector<1x1x8x128xf32>
    %1258 = vector.shape_cast %1257 : vector<1x1x8x128xf32> to vector<8x128xf32>
    %1259 = vector.shape_cast %1256 : vector<8x128xf32> to vector<1x1x8x128xf32>
    tpu.vector_store %arg4[%c0_796, %c63_797, %c0_798, %c0_799], %1259 {strides = array<i32>} : memref<1x128x8x128xf32, #tpu.memory_space<vmem>>, vector<1x1x8x128xf32>,
    %cst_800 = arith.constant 0.000000e+00 : f32
    %1260 = vector.broadcast %cst_800 : f32 to vector<8x128xf32>
    %cst_801 = arith.constant 0.000000e+00 : f32
    %1261 = vector.broadcast %cst_801 : f32 to vector<8x128xf32>
    %cst_802 = arith.constant 0.000000e+00 : f32
    %1262 = vector.broadcast %cst_802 : f32 to vector<8x128xf32>
    %cst_803 = arith.constant 0.000000e+00 : f32
    %1263 = vector.broadcast %cst_803 : f32 to vector<8x128xf32>
    %cst_804 = arith.constant 0.000000e+00 : f32
    %1264 = vector.broadcast %cst_804 : f32 to vector<8x128xf32>
    %cst_805 = arith.constant 0.000000e+00 : f32
    %1265 = vector.broadcast %cst_805 : f32 to vector<8x128xf32>
    %cst_806 = arith.constant 0.000000e+00 : f32
    %1266 = vector.broadcast %cst_806 : f32 to vector<8x128xf32>
    %cst_807 = arith.constant 0.000000e+00 : f32
    %1267 = vector.broadcast %cst_807 : f32 to vector<8x128xf32>
    %c0_i32_808 = arith.constant 0 : i32
    %c128_i32_809 = arith.constant 128 : i32
    %1268 = arith.muli %c0_i32_808, %c128_i32_809 : i32
    %1269 = tpu.assume_multiple %1268, 128 : i32
    %c0_810 = arith.constant 0 : index
    %1270 = arith.index_cast %1269 : i32 to index
    %1271 = vector.load %arg2[%c0_810, %1270] : memref<8x128xf32, #tpu.memory_space<vmem>>, vector<8x128xf32>
    %1272 = arith.mulf %1271, %3 : vector<8x128xf32>
    %cst_811 = arith.constant 0.0153846154 : f32
    %1273 = vector.broadcast %cst_811 : f32 to vector<8x128xf32>
    %1274 = arith.mulf %1272, %1273 : vector<8x128xf32>
    %1275 = math.roundeven %1274 : vector<8x128xf32>
    %cst_812 = arith.constant -1.280000e+02 : f32
    %cst_813 = arith.constant 1.270000e+02 : f32
    %1276 = vector.broadcast %cst_812 : f32 to vector<8x128xf32>
    %1277 = arith.maximumf %1276, %1275 : vector<8x128xf32>
    %1278 = vector.broadcast %cst_813 : f32 to vector<8x128xf32>
    %1279 = arith.minimumf %1278, %1277 : vector<8x128xf32>
    %cst_814 = arith.constant 6.500000e+01 : f32
    %1280 = vector.broadcast %cst_814 : f32 to vector<8x128xf32>
    %1281 = arith.mulf %1279, %1280 : vector<8x128xf32>
    %1282 = arith.subf %1281, %1272 : vector<8x128xf32>
    %1283 = arith.mulf %1282, %1282 : vector<8x128xf32>
    %1284 = arith.addf %1260, %1283 : vector<8x128xf32>
    %cst_815 = arith.constant 0.0151515156 : f32
    %1285 = vector.broadcast %cst_815 : f32 to vector<8x128xf32>
    %1286 = arith.mulf %1272, %1285 : vector<8x128xf32>
    %1287 = math.roundeven %1286 : vector<8x128xf32>
    %cst_816 = arith.constant -1.280000e+02 : f32
    %cst_817 = arith.constant 1.270000e+02 : f32
    %1288 = vector.broadcast %cst_816 : f32 to vector<8x128xf32>
    %1289 = arith.maximumf %1288, %1287 : vector<8x128xf32>
    %1290 = vector.broadcast %cst_817 : f32 to vector<8x128xf32>
    %1291 = arith.minimumf %1290, %1289 : vector<8x128xf32>
    %cst_818 = arith.constant 6.600000e+01 : f32
    %1292 = vector.broadcast %cst_818 : f32 to vector<8x128xf32>
    %1293 = arith.mulf %1291, %1292 : vector<8x128xf32>
    %1294 = arith.subf %1293, %1272 : vector<8x128xf32>
    %1295 = arith.mulf %1294, %1294 : vector<8x128xf32>
    %1296 = arith.addf %1261, %1295 : vector<8x128xf32>
    %cst_819 = arith.constant 0.0149253728 : f32
    %1297 = vector.broadcast %cst_819 : f32 to vector<8x128xf32>
    %1298 = arith.mulf %1272, %1297 : vector<8x128xf32>
    %1299 = math.roundeven %1298 : vector<8x128xf32>
    %cst_820 = arith.constant -1.280000e+02 : f32
    %cst_821 = arith.constant 1.270000e+02 : f32
    %1300 = vector.broadcast %cst_820 : f32 to vector<8x128xf32>
    %1301 = arith.maximumf %1300, %1299 : vector<8x128xf32>
    %1302 = vector.broadcast %cst_821 : f32 to vector<8x128xf32>
    %1303 = arith.minimumf %1302, %1301 : vector<8x128xf32>
    %cst_822 = arith.constant 6.700000e+01 : f32
    %1304 = vector.broadcast %cst_822 : f32 to vector<8x128xf32>
    %1305 = arith.mulf %1303, %1304 : vector<8x128xf32>
    %1306 = arith.subf %1305, %1272 : vector<8x128xf32>
    %1307 = arith.mulf %1306, %1306 : vector<8x128xf32>
    %1308 = arith.addf %1262, %1307 : vector<8x128xf32>
    %cst_823 = arith.constant 0.0147058824 : f32
    %1309 = vector.broadcast %cst_823 : f32 to vector<8x128xf32>
    %1310 = arith.mulf %1272, %1309 : vector<8x128xf32>
    %1311 = math.roundeven %1310 : vector<8x128xf32>
    %cst_824 = arith.constant -1.280000e+02 : f32
    %cst_825 = arith.constant 1.270000e+02 : f32
    %1312 = vector.broadcast %cst_824 : f32 to vector<8x128xf32>
    %1313 = arith.maximumf %1312, %1311 : vector<8x128xf32>
    %1314 = vector.broadcast %cst_825 : f32 to vector<8x128xf32>
    %1315 = arith.minimumf %1314, %1313 : vector<8x128xf32>
    %cst_826 = arith.constant 6.800000e+01 : f32
    %1316 = vector.broadcast %cst_826 : f32 to vector<8x128xf32>
    %1317 = arith.mulf %1315, %1316 : vector<8x128xf32>
    %1318 = arith.subf %1317, %1272 : vector<8x128xf32>
    %1319 = arith.mulf %1318, %1318 : vector<8x128xf32>
    %1320 = arith.addf %1263, %1319 : vector<8x128xf32>
    %cst_827 = arith.constant 0.0144927539 : f32
    %1321 = vector.broadcast %cst_827 : f32 to vector<8x128xf32>
    %1322 = arith.mulf %1272, %1321 : vector<8x128xf32>
    %1323 = math.roundeven %1322 : vector<8x128xf32>
    %cst_828 = arith.constant -1.280000e+02 : f32
    %cst_829 = arith.constant 1.270000e+02 : f32
    %1324 = vector.broadcast %cst_828 : f32 to vector<8x128xf32>
    %1325 = arith.maximumf %1324, %1323 : vector<8x128xf32>
    %1326 = vector.broadcast %cst_829 : f32 to vector<8x128xf32>
    %1327 = arith.minimumf %1326, %1325 : vector<8x128xf32>
    %cst_830 = arith.constant 6.900000e+01 : f32
    %1328 = vector.broadcast %cst_830 : f32 to vector<8x128xf32>
    %1329 = arith.mulf %1327, %1328 : vector<8x128xf32>
    %1330 = arith.subf %1329, %1272 : vector<8x128xf32>
    %1331 = arith.mulf %1330, %1330 : vector<8x128xf32>
    %1332 = arith.addf %1264, %1331 : vector<8x128xf32>
    %cst_831 = arith.constant 0.0142857144 : f32
    %1333 = vector.broadcast %cst_831 : f32 to vector<8x128xf32>
    %1334 = arith.mulf %1272, %1333 : vector<8x128xf32>
    %1335 = math.roundeven %1334 : vector<8x128xf32>
    %cst_832 = arith.constant -1.280000e+02 : f32
    %cst_833 = arith.constant 1.270000e+02 : f32
    %1336 = vector.broadcast %cst_832 : f32 to vector<8x128xf32>
    %1337 = arith.maximumf %1336, %1335 : vector<8x128xf32>
    %1338 = vector.broadcast %cst_833 : f32 to vector<8x128xf32>
    %1339 = arith.minimumf %1338, %1337 : vector<8x128xf32>
    %cst_834 = arith.constant 7.000000e+01 : f32
    %1340 = vector.broadcast %cst_834 : f32 to vector<8x128xf32>
    %1341 = arith.mulf %1339, %1340 : vector<8x128xf32>
    %1342 = arith.subf %1341, %1272 : vector<8x128xf32>
    %1343 = arith.mulf %1342, %1342 : vector<8x128xf32>
    %1344 = arith.addf %1265, %1343 : vector<8x128xf32>
    %cst_835 = arith.constant 0.0140845068 : f32
    %1345 = vector.broadcast %cst_835 : f32 to vector<8x128xf32>
    %1346 = arith.mulf %1272, %1345 : vector<8x128xf32>
    %1347 = math.roundeven %1346 : vector<8x128xf32>
    %cst_836 = arith.constant -1.280000e+02 : f32
    %cst_837 = arith.constant 1.270000e+02 : f32
    %1348 = vector.broadcast %cst_836 : f32 to vector<8x128xf32>
    %1349 = arith.maximumf %1348, %1347 : vector<8x128xf32>
    %1350 = vector.broadcast %cst_837 : f32 to vector<8x128xf32>
    %1351 = arith.minimumf %1350, %1349 : vector<8x128xf32>
    %cst_838 = arith.constant 7.100000e+01 : f32
    %1352 = vector.broadcast %cst_838 : f32 to vector<8x128xf32>
    %1353 = arith.mulf %1351, %1352 : vector<8x128xf32>
    %1354 = arith.subf %1353, %1272 : vector<8x128xf32>
    %1355 = arith.mulf %1354, %1354 : vector<8x128xf32>
    %1356 = arith.addf %1266, %1355 : vector<8x128xf32>
    %cst_839 = arith.constant 0.013888889 : f32
    %1357 = vector.broadcast %cst_839 : f32 to vector<8x128xf32>
    %1358 = arith.mulf %1272, %1357 : vector<8x128xf32>
    %1359 = math.roundeven %1358 : vector<8x128xf32>
    %cst_840 = arith.constant -1.280000e+02 : f32
    %cst_841 = arith.constant 1.270000e+02 : f32
    %1360 = vector.broadcast %cst_840 : f32 to vector<8x128xf32>
    %1361 = arith.maximumf %1360, %1359 : vector<8x128xf32>
    %1362 = vector.broadcast %cst_841 : f32 to vector<8x128xf32>
    %1363 = arith.minimumf %1362, %1361 : vector<8x128xf32>
    %cst_842 = arith.constant 7.200000e+01 : f32
    %1364 = vector.broadcast %cst_842 : f32 to vector<8x128xf32>
    %1365 = arith.mulf %1363, %1364 : vector<8x128xf32>
    %1366 = arith.subf %1365, %1272 : vector<8x128xf32>
    %1367 = arith.mulf %1366, %1366 : vector<8x128xf32>
    %1368 = arith.addf %1267, %1367 : vector<8x128xf32>
    %c1_i32_843 = arith.constant 1 : i32
    %c0_844 = arith.constant 0 : index
    %c64 = arith.constant 64 : index
    %c0_845 = arith.constant 0 : index
    %c0_846 = arith.constant 0 : index
    %1369 = vector.load %arg4[%c0_844, %c64, %c0_845, %c0_846] : memref<1x128x8x128xf32, #tpu.memory_space<vmem>>, vector<1x1x8x128xf32>
    %1370 = vector.shape_cast %1369 : vector<1x1x8x128xf32> to vector<8x128xf32>
    %1371 = arith.addf %1370, %1284 : vector<8x128xf32>
    %c0_847 = arith.constant 0 : index
    %c64_848 = arith.constant 64 : index
    %c0_849 = arith.constant 0 : index
    %c0_850 = arith.constant 0 : index
    %1372 = vector.load %arg4[%c0_847, %c64_848, %c0_849, %c0_850] : memref<1x128x8x128xf32, #tpu.memory_space<vmem>>, vector<1x1x8x128xf32>
    %1373 = vector.shape_cast %1372 : vector<1x1x8x128xf32> to vector<8x128xf32>
    %1374 = vector.shape_cast %1371 : vector<8x128xf32> to vector<1x1x8x128xf32>
    tpu.vector_store %arg4[%c0_847, %c64_848, %c0_849, %c0_850], %1374 {strides = array<i32>} : memref<1x128x8x128xf32, #tpu.memory_space<vmem>>, vector<1x1x8x128xf32>,
    %c0_851 = arith.constant 0 : index
    %c65 = arith.constant 65 : index
    %c0_852 = arith.constant 0 : index
    %c0_853 = arith.constant 0 : index
    %1375 = vector.load %arg4[%c0_851, %c65, %c0_852, %c0_853] : memref<1x128x8x128xf32, #tpu.memory_space<vmem>>, vector<1x1x8x128xf32>
    %1376 = vector.shape_cast %1375 : vector<1x1x8x128xf32> to vector<8x128xf32>
    %1377 = arith.addf %1376, %1296 : vector<8x128xf32>
    %c0_854 = arith.constant 0 : index
    %c65_855 = arith.constant 65 : index
    %c0_856 = arith.constant 0 : index
    %c0_857 = arith.constant 0 : index
    %1378 = vector.load %arg4[%c0_854, %c65_855, %c0_856, %c0_857] : memref<1x128x8x128xf32, #tpu.memory_space<vmem>>, vector<1x1x8x128xf32>
    %1379 = vector.shape_cast %1378 : vector<1x1x8x128xf32> to vector<8x128xf32>
    %1380 = vector.shape_cast %1377 : vector<8x128xf32> to vector<1x1x8x128xf32>
    tpu.vector_store %arg4[%c0_854, %c65_855, %c0_856, %c0_857], %1380 {strides = array<i32>} : memref<1x128x8x128xf32, #tpu.memory_space<vmem>>, vector<1x1x8x128xf32>,
    %c0_858 = arith.constant 0 : index
    %c66 = arith.constant 66 : index
    %c0_859 = arith.constant 0 : index
    %c0_860 = arith.constant 0 : index
    %1381 = vector.load %arg4[%c0_858, %c66, %c0_859, %c0_860] : memref<1x128x8x128xf32, #tpu.memory_space<vmem>>, vector<1x1x8x128xf32>
    %1382 = vector.shape_cast %1381 : vector<1x1x8x128xf32> to vector<8x128xf32>
    %1383 = arith.addf %1382, %1308 : vector<8x128xf32>
    %c0_861 = arith.constant 0 : index
    %c66_862 = arith.constant 66 : index
    %c0_863 = arith.constant 0 : index
    %c0_864 = arith.constant 0 : index
    %1384 = vector.load %arg4[%c0_861, %c66_862, %c0_863, %c0_864] : memref<1x128x8x128xf32, #tpu.memory_space<vmem>>, vector<1x1x8x128xf32>
    %1385 = vector.shape_cast %1384 : vector<1x1x8x128xf32> to vector<8x128xf32>
    %1386 = vector.shape_cast %1383 : vector<8x128xf32> to vector<1x1x8x128xf32>
    tpu.vector_store %arg4[%c0_861, %c66_862, %c0_863, %c0_864], %1386 {strides = array<i32>} : memref<1x128x8x128xf32, #tpu.memory_space<vmem>>, vector<1x1x8x128xf32>,
    %c0_865 = arith.constant 0 : index
    %c67 = arith.constant 67 : index
    %c0_866 = arith.constant 0 : index
    %c0_867 = arith.constant 0 : index
    %1387 = vector.load %arg4[%c0_865, %c67, %c0_866, %c0_867] : memref<1x128x8x128xf32, #tpu.memory_space<vmem>>, vector<1x1x8x128xf32>
    %1388 = vector.shape_cast %1387 : vector<1x1x8x128xf32> to vector<8x128xf32>
    %1389 = arith.addf %1388, %1320 : vector<8x128xf32>
    %c0_868 = arith.constant 0 : index
    %c67_869 = arith.constant 67 : index
    %c0_870 = arith.constant 0 : index
    %c0_871 = arith.constant 0 : index
    %1390 = vector.load %arg4[%c0_868, %c67_869, %c0_870, %c0_871] : memref<1x128x8x128xf32, #tpu.memory_space<vmem>>, vector<1x1x8x128xf32>
    %1391 = vector.shape_cast %1390 : vector<1x1x8x128xf32> to vector<8x128xf32>
    %1392 = vector.shape_cast %1389 : vector<8x128xf32> to vector<1x1x8x128xf32>
    tpu.vector_store %arg4[%c0_868, %c67_869, %c0_870, %c0_871], %1392 {strides = array<i32>} : memref<1x128x8x128xf32, #tpu.memory_space<vmem>>, vector<1x1x8x128xf32>,
    %c0_872 = arith.constant 0 : index
    %c68 = arith.constant 68 : index
    %c0_873 = arith.constant 0 : index
    %c0_874 = arith.constant 0 : index
    %1393 = vector.load %arg4[%c0_872, %c68, %c0_873, %c0_874] : memref<1x128x8x128xf32, #tpu.memory_space<vmem>>, vector<1x1x8x128xf32>
    %1394 = vector.shape_cast %1393 : vector<1x1x8x128xf32> to vector<8x128xf32>
    %1395 = arith.addf %1394, %1332 : vector<8x128xf32>
    %c0_875 = arith.constant 0 : index
    %c68_876 = arith.constant 68 : index
    %c0_877 = arith.constant 0 : index
    %c0_878 = arith.constant 0 : index
    %1396 = vector.load %arg4[%c0_875, %c68_876, %c0_877, %c0_878] : memref<1x128x8x128xf32, #tpu.memory_space<vmem>>, vector<1x1x8x128xf32>
    %1397 = vector.shape_cast %1396 : vector<1x1x8x128xf32> to vector<8x128xf32>
    %1398 = vector.shape_cast %1395 : vector<8x128xf32> to vector<1x1x8x128xf32>
    tpu.vector_store %arg4[%c0_875, %c68_876, %c0_877, %c0_878], %1398 {strides = array<i32>} : memref<1x128x8x128xf32, #tpu.memory_space<vmem>>, vector<1x1x8x128xf32>,
    %c0_879 = arith.constant 0 : index
    %c69 = arith.constant 69 : index
    %c0_880 = arith.constant 0 : index
    %c0_881 = arith.constant 0 : index
    %1399 = vector.load %arg4[%c0_879, %c69, %c0_880, %c0_881] : memref<1x128x8x128xf32, #tpu.memory_space<vmem>>, vector<1x1x8x128xf32>
    %1400 = vector.shape_cast %1399 : vector<1x1x8x128xf32> to vector<8x128xf32>
    %1401 = arith.addf %1400, %1344 : vector<8x128xf32>
    %c0_882 = arith.constant 0 : index
    %c69_883 = arith.constant 69 : index
    %c0_884 = arith.constant 0 : index
    %c0_885 = arith.constant 0 : index
    %1402 = vector.load %arg4[%c0_882, %c69_883, %c0_884, %c0_885] : memref<1x128x8x128xf32, #tpu.memory_space<vmem>>, vector<1x1x8x128xf32>
    %1403 = vector.shape_cast %1402 : vector<1x1x8x128xf32> to vector<8x128xf32>
    %1404 = vector.shape_cast %1401 : vector<8x128xf32> to vector<1x1x8x128xf32>
    tpu.vector_store %arg4[%c0_882, %c69_883, %c0_884, %c0_885], %1404 {strides = array<i32>} : memref<1x128x8x128xf32, #tpu.memory_space<vmem>>, vector<1x1x8x128xf32>,
    %c0_886 = arith.constant 0 : index
    %c70 = arith.constant 70 : index
    %c0_887 = arith.constant 0 : index
    %c0_888 = arith.constant 0 : index
    %1405 = vector.load %arg4[%c0_886, %c70, %c0_887, %c0_888] : memref<1x128x8x128xf32, #tpu.memory_space<vmem>>, vector<1x1x8x128xf32>
    %1406 = vector.shape_cast %1405 : vector<1x1x8x128xf32> to vector<8x128xf32>
    %1407 = arith.addf %1406, %1356 : vector<8x128xf32>
    %c0_889 = arith.constant 0 : index
    %c70_890 = arith.constant 70 : index
    %c0_891 = arith.constant 0 : index
    %c0_892 = arith.constant 0 : index
    %1408 = vector.load %arg4[%c0_889, %c70_890, %c0_891, %c0_892] : memref<1x128x8x128xf32, #tpu.memory_space<vmem>>, vector<1x1x8x128xf32>
    %1409 = vector.shape_cast %1408 : vector<1x1x8x128xf32> to vector<8x128xf32>
    %1410 = vector.shape_cast %1407 : vector<8x128xf32> to vector<1x1x8x128xf32>
    tpu.vector_store %arg4[%c0_889, %c70_890, %c0_891, %c0_892], %1410 {strides = array<i32>} : memref<1x128x8x128xf32, #tpu.memory_space<vmem>>, vector<1x1x8x128xf32>,
    %c0_893 = arith.constant 0 : index
    %c71 = arith.constant 71 : index
    %c0_894 = arith.constant 0 : index
    %c0_895 = arith.constant 0 : index
    %1411 = vector.load %arg4[%c0_893, %c71, %c0_894, %c0_895] : memref<1x128x8x128xf32, #tpu.memory_space<vmem>>, vector<1x1x8x128xf32>
    %1412 = vector.shape_cast %1411 : vector<1x1x8x128xf32> to vector<8x128xf32>
    %1413 = arith.addf %1412, %1368 : vector<8x128xf32>
    %c0_896 = arith.constant 0 : index
    %c71_897 = arith.constant 71 : index
    %c0_898 = arith.constant 0 : index
    %c0_899 = arith.constant 0 : index
    %1414 = vector.load %arg4[%c0_896, %c71_897, %c0_898, %c0_899] : memref<1x128x8x128xf32, #tpu.memory_space<vmem>>, vector<1x1x8x128xf32>
    %1415 = vector.shape_cast %1414 : vector<1x1x8x128xf32> to vector<8x128xf32>
    %1416 = vector.shape_cast %1413 : vector<8x128xf32> to vector<1x1x8x128xf32>
    tpu.vector_store %arg4[%c0_896, %c71_897, %c0_898, %c0_899], %1416 {strides = array<i32>} : memref<1x128x8x128xf32, #tpu.memory_space<vmem>>, vector<1x1x8x128xf32>,
    %cst_900 = arith.constant 0.000000e+00 : f32
    %1417 = vector.broadcast %cst_900 : f32 to vector<8x128xf32>
    %cst_901 = arith.constant 0.000000e+00 : f32
    %1418 = vector.broadcast %cst_901 : f32 to vector<8x128xf32>
    %cst_902 = arith.constant 0.000000e+00 : f32
    %1419 = vector.broadcast %cst_902 : f32 to vector<8x128xf32>
    %cst_903 = arith.constant 0.000000e+00 : f32
    %1420 = vector.broadcast %cst_903 : f32 to vector<8x128xf32>
    %cst_904 = arith.constant 0.000000e+00 : f32
    %1421 = vector.broadcast %cst_904 : f32 to vector<8x128xf32>
    %cst_905 = arith.constant 0.000000e+00 : f32
    %1422 = vector.broadcast %cst_905 : f32 to vector<8x128xf32>
    %cst_906 = arith.constant 0.000000e+00 : f32
    %1423 = vector.broadcast %cst_906 : f32 to vector<8x128xf32>
    %cst_907 = arith.constant 0.000000e+00 : f32
    %1424 = vector.broadcast %cst_907 : f32 to vector<8x128xf32>
    %c0_i32_908 = arith.constant 0 : i32
    %c128_i32_909 = arith.constant 128 : i32
    %1425 = arith.muli %c0_i32_908, %c128_i32_909 : i32
    %1426 = tpu.assume_multiple %1425, 128 : i32
    %c0_910 = arith.constant 0 : index
    %1427 = arith.index_cast %1426 : i32 to index
    %1428 = vector.load %arg2[%c0_910, %1427] : memref<8x128xf32, #tpu.memory_space<vmem>>, vector<8x128xf32>
    %1429 = arith.mulf %1428, %3 : vector<8x128xf32>
    %cst_911 = arith.constant 0.01369863 : f32
    %1430 = vector.broadcast %cst_911 : f32 to vector<8x128xf32>
    %1431 = arith.mulf %1429, %1430 : vector<8x128xf32>
    %1432 = math.roundeven %1431 : vector<8x128xf32>
    %cst_912 = arith.constant -1.280000e+02 : f32
    %cst_913 = arith.constant 1.270000e+02 : f32
    %1433 = vector.broadcast %cst_912 : f32 to vector<8x128xf32>
    %1434 = arith.maximumf %1433, %1432 : vector<8x128xf32>
    %1435 = vector.broadcast %cst_913 : f32 to vector<8x128xf32>
    %1436 = arith.minimumf %1435, %1434 : vector<8x128xf32>
    %cst_914 = arith.constant 7.300000e+01 : f32
    %1437 = vector.broadcast %cst_914 : f32 to vector<8x128xf32>
    %1438 = arith.mulf %1436, %1437 : vector<8x128xf32>
    %1439 = arith.subf %1438, %1429 : vector<8x128xf32>
    %1440 = arith.mulf %1439, %1439 : vector<8x128xf32>
    %1441 = arith.addf %1417, %1440 : vector<8x128xf32>
    %cst_915 = arith.constant 0.0135135138 : f32
    %1442 = vector.broadcast %cst_915 : f32 to vector<8x128xf32>
    %1443 = arith.mulf %1429, %1442 : vector<8x128xf32>
    %1444 = math.roundeven %1443 : vector<8x128xf32>
    %cst_916 = arith.constant -1.280000e+02 : f32
    %cst_917 = arith.constant 1.270000e+02 : f32
    %1445 = vector.broadcast %cst_916 : f32 to vector<8x128xf32>
    %1446 = arith.maximumf %1445, %1444 : vector<8x128xf32>
    %1447 = vector.broadcast %cst_917 : f32 to vector<8x128xf32>
    %1448 = arith.minimumf %1447, %1446 : vector<8x128xf32>
    %cst_918 = arith.constant 7.400000e+01 : f32
    %1449 = vector.broadcast %cst_918 : f32 to vector<8x128xf32>
    %1450 = arith.mulf %1448, %1449 : vector<8x128xf32>
    %1451 = arith.subf %1450, %1429 : vector<8x128xf32>
    %1452 = arith.mulf %1451, %1451 : vector<8x128xf32>
    %1453 = arith.addf %1418, %1452 : vector<8x128xf32>
    %cst_919 = arith.constant 0.0133333337 : f32
    %1454 = vector.broadcast %cst_919 : f32 to vector<8x128xf32>
    %1455 = arith.mulf %1429, %1454 : vector<8x128xf32>
    %1456 = math.roundeven %1455 : vector<8x128xf32>
    %cst_920 = arith.constant -1.280000e+02 : f32
    %cst_921 = arith.constant 1.270000e+02 : f32
    %1457 = vector.broadcast %cst_920 : f32 to vector<8x128xf32>
    %1458 = arith.maximumf %1457, %1456 : vector<8x128xf32>
    %1459 = vector.broadcast %cst_921 : f32 to vector<8x128xf32>
    %1460 = arith.minimumf %1459, %1458 : vector<8x128xf32>
    %cst_922 = arith.constant 7.500000e+01 : f32
    %1461 = vector.broadcast %cst_922 : f32 to vector<8x128xf32>
    %1462 = arith.mulf %1460, %1461 : vector<8x128xf32>
    %1463 = arith.subf %1462, %1429 : vector<8x128xf32>
    %1464 = arith.mulf %1463, %1463 : vector<8x128xf32>
    %1465 = arith.addf %1419, %1464 : vector<8x128xf32>
    %cst_923 = arith.constant 0.0131578948 : f32
    %1466 = vector.broadcast %cst_923 : f32 to vector<8x128xf32>
    %1467 = arith.mulf %1429, %1466 : vector<8x128xf32>
    %1468 = math.roundeven %1467 : vector<8x128xf32>
    %cst_924 = arith.constant -1.280000e+02 : f32
    %cst_925 = arith.constant 1.270000e+02 : f32
    %1469 = vector.broadcast %cst_924 : f32 to vector<8x128xf32>
    %1470 = arith.maximumf %1469, %1468 : vector<8x128xf32>
    %1471 = vector.broadcast %cst_925 : f32 to vector<8x128xf32>
    %1472 = arith.minimumf %1471, %1470 : vector<8x128xf32>
    %cst_926 = arith.constant 7.600000e+01 : f32
    %1473 = vector.broadcast %cst_926 : f32 to vector<8x128xf32>
    %1474 = arith.mulf %1472, %1473 : vector<8x128xf32>
    %1475 = arith.subf %1474, %1429 : vector<8x128xf32>
    %1476 = arith.mulf %1475, %1475 : vector<8x128xf32>
    %1477 = arith.addf %1420, %1476 : vector<8x128xf32>
    %cst_927 = arith.constant 0.012987013 : f32
    %1478 = vector.broadcast %cst_927 : f32 to vector<8x128xf32>
    %1479 = arith.mulf %1429, %1478 : vector<8x128xf32>
    %1480 = math.roundeven %1479 : vector<8x128xf32>
    %cst_928 = arith.constant -1.280000e+02 : f32
    %cst_929 = arith.constant 1.270000e+02 : f32
    %1481 = vector.broadcast %cst_928 : f32 to vector<8x128xf32>
    %1482 = arith.maximumf %1481, %1480 : vector<8x128xf32>
    %1483 = vector.broadcast %cst_929 : f32 to vector<8x128xf32>
    %1484 = arith.minimumf %1483, %1482 : vector<8x128xf32>
    %cst_930 = arith.constant 7.700000e+01 : f32
    %1485 = vector.broadcast %cst_930 : f32 to vector<8x128xf32>
    %1486 = arith.mulf %1484, %1485 : vector<8x128xf32>
    %1487 = arith.subf %1486, %1429 : vector<8x128xf32>
    %1488 = arith.mulf %1487, %1487 : vector<8x128xf32>
    %1489 = arith.addf %1421, %1488 : vector<8x128xf32>
    %cst_931 = arith.constant 0.012820513 : f32
    %1490 = vector.broadcast %cst_931 : f32 to vector<8x128xf32>
    %1491 = arith.mulf %1429, %1490 : vector<8x128xf32>
    %1492 = math.roundeven %1491 : vector<8x128xf32>
    %cst_932 = arith.constant -1.280000e+02 : f32
    %cst_933 = arith.constant 1.270000e+02 : f32
    %1493 = vector.broadcast %cst_932 : f32 to vector<8x128xf32>
    %1494 = arith.maximumf %1493, %1492 : vector<8x128xf32>
    %1495 = vector.broadcast %cst_933 : f32 to vector<8x128xf32>
    %1496 = arith.minimumf %1495, %1494 : vector<8x128xf32>
    %cst_934 = arith.constant 7.800000e+01 : f32
    %1497 = vector.broadcast %cst_934 : f32 to vector<8x128xf32>
    %1498 = arith.mulf %1496, %1497 : vector<8x128xf32>
    %1499 = arith.subf %1498, %1429 : vector<8x128xf32>
    %1500 = arith.mulf %1499, %1499 : vector<8x128xf32>
    %1501 = arith.addf %1422, %1500 : vector<8x128xf32>
    %cst_935 = arith.constant 0.0126582282 : f32
    %1502 = vector.broadcast %cst_935 : f32 to vector<8x128xf32>
    %1503 = arith.mulf %1429, %1502 : vector<8x128xf32>
    %1504 = math.roundeven %1503 : vector<8x128xf32>
    %cst_936 = arith.constant -1.280000e+02 : f32
    %cst_937 = arith.constant 1.270000e+02 : f32
    %1505 = vector.broadcast %cst_936 : f32 to vector<8x128xf32>
    %1506 = arith.maximumf %1505, %1504 : vector<8x128xf32>
    %1507 = vector.broadcast %cst_937 : f32 to vector<8x128xf32>
    %1508 = arith.minimumf %1507, %1506 : vector<8x128xf32>
    %cst_938 = arith.constant 7.900000e+01 : f32
    %1509 = vector.broadcast %cst_938 : f32 to vector<8x128xf32>
    %1510 = arith.mulf %1508, %1509 : vector<8x128xf32>
    %1511 = arith.subf %1510, %1429 : vector<8x128xf32>
    %1512 = arith.mulf %1511, %1511 : vector<8x128xf32>
    %1513 = arith.addf %1423, %1512 : vector<8x128xf32>
    %cst_939 = arith.constant 1.250000e-02 : f32
    %1514 = vector.broadcast %cst_939 : f32 to vector<8x128xf32>
    %1515 = arith.mulf %1429, %1514 : vector<8x128xf32>
    %1516 = math.roundeven %1515 : vector<8x128xf32>
    %cst_940 = arith.constant -1.280000e+02 : f32
    %cst_941 = arith.constant 1.270000e+02 : f32
    %1517 = vector.broadcast %cst_940 : f32 to vector<8x128xf32>
    %1518 = arith.maximumf %1517, %1516 : vector<8x128xf32>
    %1519 = vector.broadcast %cst_941 : f32 to vector<8x128xf32>
    %1520 = arith.minimumf %1519, %1518 : vector<8x128xf32>
    %cst_942 = arith.constant 8.000000e+01 : f32
    %1521 = vector.broadcast %cst_942 : f32 to vector<8x128xf32>
    %1522 = arith.mulf %1520, %1521 : vector<8x128xf32>
    %1523 = arith.subf %1522, %1429 : vector<8x128xf32>
    %1524 = arith.mulf %1523, %1523 : vector<8x128xf32>
    %1525 = arith.addf %1424, %1524 : vector<8x128xf32>
    %c1_i32_943 = arith.constant 1 : i32
    %c0_944 = arith.constant 0 : index
    %c72 = arith.constant 72 : index
    %c0_945 = arith.constant 0 : index
    %c0_946 = arith.constant 0 : index
    %1526 = vector.load %arg4[%c0_944, %c72, %c0_945, %c0_946] : memref<1x128x8x128xf32, #tpu.memory_space<vmem>>, vector<1x1x8x128xf32>
    %1527 = vector.shape_cast %1526 : vector<1x1x8x128xf32> to vector<8x128xf32>
    %1528 = arith.addf %1527, %1441 : vector<8x128xf32>
    %c0_947 = arith.constant 0 : index
    %c72_948 = arith.constant 72 : index
    %c0_949 = arith.constant 0 : index
    %c0_950 = arith.constant 0 : index
    %1529 = vector.load %arg4[%c0_947, %c72_948, %c0_949, %c0_950] : memref<1x128x8x128xf32, #tpu.memory_space<vmem>>, vector<1x1x8x128xf32>
    %1530 = vector.shape_cast %1529 : vector<1x1x8x128xf32> to vector<8x128xf32>
    %1531 = vector.shape_cast %1528 : vector<8x128xf32> to vector<1x1x8x128xf32>
    tpu.vector_store %arg4[%c0_947, %c72_948, %c0_949, %c0_950], %1531 {strides = array<i32>} : memref<1x128x8x128xf32, #tpu.memory_space<vmem>>, vector<1x1x8x128xf32>,
    %c0_951 = arith.constant 0 : index
    %c73 = arith.constant 73 : index
    %c0_952 = arith.constant 0 : index
    %c0_953 = arith.constant 0 : index
    %1532 = vector.load %arg4[%c0_951, %c73, %c0_952, %c0_953] : memref<1x128x8x128xf32, #tpu.memory_space<vmem>>, vector<1x1x8x128xf32>
    %1533 = vector.shape_cast %1532 : vector<1x1x8x128xf32> to vector<8x128xf32>
    %1534 = arith.addf %1533, %1453 : vector<8x128xf32>
    %c0_954 = arith.constant 0 : index
    %c73_955 = arith.constant 73 : index
    %c0_956 = arith.constant 0 : index
    %c0_957 = arith.constant 0 : index
    %1535 = vector.load %arg4[%c0_954, %c73_955, %c0_956, %c0_957] : memref<1x128x8x128xf32, #tpu.memory_space<vmem>>, vector<1x1x8x128xf32>
    %1536 = vector.shape_cast %1535 : vector<1x1x8x128xf32> to vector<8x128xf32>
    %1537 = vector.shape_cast %1534 : vector<8x128xf32> to vector<1x1x8x128xf32>
    tpu.vector_store %arg4[%c0_954, %c73_955, %c0_956, %c0_957], %1537 {strides = array<i32>} : memref<1x128x8x128xf32, #tpu.memory_space<vmem>>, vector<1x1x8x128xf32>,
    %c0_958 = arith.constant 0 : index
    %c74 = arith.constant 74 : index
    %c0_959 = arith.constant 0 : index
    %c0_960 = arith.constant 0 : index
    %1538 = vector.load %arg4[%c0_958, %c74, %c0_959, %c0_960] : memref<1x128x8x128xf32, #tpu.memory_space<vmem>>, vector<1x1x8x128xf32>
    %1539 = vector.shape_cast %1538 : vector<1x1x8x128xf32> to vector<8x128xf32>
    %1540 = arith.addf %1539, %1465 : vector<8x128xf32>
    %c0_961 = arith.constant 0 : index
    %c74_962 = arith.constant 74 : index
    %c0_963 = arith.constant 0 : index
    %c0_964 = arith.constant 0 : index
    %1541 = vector.load %arg4[%c0_961, %c74_962, %c0_963, %c0_964] : memref<1x128x8x128xf32, #tpu.memory_space<vmem>>, vector<1x1x8x128xf32>
    %1542 = vector.shape_cast %1541 : vector<1x1x8x128xf32> to vector<8x128xf32>
    %1543 = vector.shape_cast %1540 : vector<8x128xf32> to vector<1x1x8x128xf32>
    tpu.vector_store %arg4[%c0_961, %c74_962, %c0_963, %c0_964], %1543 {strides = array<i32>} : memref<1x128x8x128xf32, #tpu.memory_space<vmem>>, vector<1x1x8x128xf32>,
    %c0_965 = arith.constant 0 : index
    %c75 = arith.constant 75 : index
    %c0_966 = arith.constant 0 : index
    %c0_967 = arith.constant 0 : index
    %1544 = vector.load %arg4[%c0_965, %c75, %c0_966, %c0_967] : memref<1x128x8x128xf32, #tpu.memory_space<vmem>>, vector<1x1x8x128xf32>
    %1545 = vector.shape_cast %1544 : vector<1x1x8x128xf32> to vector<8x128xf32>
    %1546 = arith.addf %1545, %1477 : vector<8x128xf32>
    %c0_968 = arith.constant 0 : index
    %c75_969 = arith.constant 75 : index
    %c0_970 = arith.constant 0 : index
    %c0_971 = arith.constant 0 : index
    %1547 = vector.load %arg4[%c0_968, %c75_969, %c0_970, %c0_971] : memref<1x128x8x128xf32, #tpu.memory_space<vmem>>, vector<1x1x8x128xf32>
    %1548 = vector.shape_cast %1547 : vector<1x1x8x128xf32> to vector<8x128xf32>
    %1549 = vector.shape_cast %1546 : vector<8x128xf32> to vector<1x1x8x128xf32>
    tpu.vector_store %arg4[%c0_968, %c75_969, %c0_970, %c0_971], %1549 {strides = array<i32>} : memref<1x128x8x128xf32, #tpu.memory_space<vmem>>, vector<1x1x8x128xf32>,
    %c0_972 = arith.constant 0 : index
    %c76 = arith.constant 76 : index
    %c0_973 = arith.constant 0 : index
    %c0_974 = arith.constant 0 : index
    %1550 = vector.load %arg4[%c0_972, %c76, %c0_973, %c0_974] : memref<1x128x8x128xf32, #tpu.memory_space<vmem>>, vector<1x1x8x128xf32>
    %1551 = vector.shape_cast %1550 : vector<1x1x8x128xf32> to vector<8x128xf32>
    %1552 = arith.addf %1551, %1489 : vector<8x128xf32>
    %c0_975 = arith.constant 0 : index
    %c76_976 = arith.constant 76 : index
    %c0_977 = arith.constant 0 : index
    %c0_978 = arith.constant 0 : index
    %1553 = vector.load %arg4[%c0_975, %c76_976, %c0_977, %c0_978] : memref<1x128x8x128xf32, #tpu.memory_space<vmem>>, vector<1x1x8x128xf32>
    %1554 = vector.shape_cast %1553 : vector<1x1x8x128xf32> to vector<8x128xf32>
    %1555 = vector.shape_cast %1552 : vector<8x128xf32> to vector<1x1x8x128xf32>
    tpu.vector_store %arg4[%c0_975, %c76_976, %c0_977, %c0_978], %1555 {strides = array<i32>} : memref<1x128x8x128xf32, #tpu.memory_space<vmem>>, vector<1x1x8x128xf32>,
    %c0_979 = arith.constant 0 : index
    %c77 = arith.constant 77 : index
    %c0_980 = arith.constant 0 : index
    %c0_981 = arith.constant 0 : index
    %1556 = vector.load %arg4[%c0_979, %c77, %c0_980, %c0_981] : memref<1x128x8x128xf32, #tpu.memory_space<vmem>>, vector<1x1x8x128xf32>
    %1557 = vector.shape_cast %1556 : vector<1x1x8x128xf32> to vector<8x128xf32>
    %1558 = arith.addf %1557, %1501 : vector<8x128xf32>
    %c0_982 = arith.constant 0 : index
    %c77_983 = arith.constant 77 : index
    %c0_984 = arith.constant 0 : index
    %c0_985 = arith.constant 0 : index
    %1559 = vector.load %arg4[%c0_982, %c77_983, %c0_984, %c0_985] : memref<1x128x8x128xf32, #tpu.memory_space<vmem>>, vector<1x1x8x128xf32>
    %1560 = vector.shape_cast %1559 : vector<1x1x8x128xf32> to vector<8x128xf32>
    %1561 = vector.shape_cast %1558 : vector<8x128xf32> to vector<1x1x8x128xf32>
    tpu.vector_store %arg4[%c0_982, %c77_983, %c0_984, %c0_985], %1561 {strides = array<i32>} : memref<1x128x8x128xf32, #tpu.memory_space<vmem>>, vector<1x1x8x128xf32>,
    %c0_986 = arith.constant 0 : index
    %c78 = arith.constant 78 : index
    %c0_987 = arith.constant 0 : index
    %c0_988 = arith.constant 0 : index
    %1562 = vector.load %arg4[%c0_986, %c78, %c0_987, %c0_988] : memref<1x128x8x128xf32, #tpu.memory_space<vmem>>, vector<1x1x8x128xf32>
    %1563 = vector.shape_cast %1562 : vector<1x1x8x128xf32> to vector<8x128xf32>
    %1564 = arith.addf %1563, %1513 : vector<8x128xf32>
    %c0_989 = arith.constant 0 : index
    %c78_990 = arith.constant 78 : index
    %c0_991 = arith.constant 0 : index
    %c0_992 = arith.constant 0 : index
    %1565 = vector.load %arg4[%c0_989, %c78_990, %c0_991, %c0_992] : memref<1x128x8x128xf32, #tpu.memory_space<vmem>>, vector<1x1x8x128xf32>
    %1566 = vector.shape_cast %1565 : vector<1x1x8x128xf32> to vector<8x128xf32>
    %1567 = vector.shape_cast %1564 : vector<8x128xf32> to vector<1x1x8x128xf32>
    tpu.vector_store %arg4[%c0_989, %c78_990, %c0_991, %c0_992], %1567 {strides = array<i32>} : memref<1x128x8x128xf32, #tpu.memory_space<vmem>>, vector<1x1x8x128xf32>,
    %c0_993 = arith.constant 0 : index
    %c79 = arith.constant 79 : index
    %c0_994 = arith.constant 0 : index
    %c0_995 = arith.constant 0 : index
    %1568 = vector.load %arg4[%c0_993, %c79, %c0_994, %c0_995] : memref<1x128x8x128xf32, #tpu.memory_space<vmem>>, vector<1x1x8x128xf32>
    %1569 = vector.shape_cast %1568 : vector<1x1x8x128xf32> to vector<8x128xf32>
    %1570 = arith.addf %1569, %1525 : vector<8x128xf32>
    %c0_996 = arith.constant 0 : index
    %c79_997 = arith.constant 79 : index
    %c0_998 = arith.constant 0 : index
    %c0_999 = arith.constant 0 : index
    %1571 = vector.load %arg4[%c0_996, %c79_997, %c0_998, %c0_999] : memref<1x128x8x128xf32, #tpu.memory_space<vmem>>, vector<1x1x8x128xf32>
    %1572 = vector.shape_cast %1571 : vector<1x1x8x128xf32> to vector<8x128xf32>
    %1573 = vector.shape_cast %1570 : vector<8x128xf32> to vector<1x1x8x128xf32>
    tpu.vector_store %arg4[%c0_996, %c79_997, %c0_998, %c0_999], %1573 {strides = array<i32>} : memref<1x128x8x128xf32, #tpu.memory_space<vmem>>, vector<1x1x8x128xf32>,
    %cst_1000 = arith.constant 0.000000e+00 : f32
    %1574 = vector.broadcast %cst_1000 : f32 to vector<8x128xf32>
    %cst_1001 = arith.constant 0.000000e+00 : f32
    %1575 = vector.broadcast %cst_1001 : f32 to vector<8x128xf32>
    %cst_1002 = arith.constant 0.000000e+00 : f32
    %1576 = vector.broadcast %cst_1002 : f32 to vector<8x128xf32>
    %cst_1003 = arith.constant 0.000000e+00 : f32
    %1577 = vector.broadcast %cst_1003 : f32 to vector<8x128xf32>
    %cst_1004 = arith.constant 0.000000e+00 : f32
    %1578 = vector.broadcast %cst_1004 : f32 to vector<8x128xf32>
    %cst_1005 = arith.constant 0.000000e+00 : f32
    %1579 = vector.broadcast %cst_1005 : f32 to vector<8x128xf32>
    %cst_1006 = arith.constant 0.000000e+00 : f32
    %1580 = vector.broadcast %cst_1006 : f32 to vector<8x128xf32>
    %cst_1007 = arith.constant 0.000000e+00 : f32
    %1581 = vector.broadcast %cst_1007 : f32 to vector<8x128xf32>
    %c0_i32_1008 = arith.constant 0 : i32
    %c128_i32_1009 = arith.constant 128 : i32
    %1582 = arith.muli %c0_i32_1008, %c128_i32_1009 : i32
    %1583 = tpu.assume_multiple %1582, 128 : i32
    %c0_1010 = arith.constant 0 : index
    %1584 = arith.index_cast %1583 : i32 to index
    %1585 = vector.load %arg2[%c0_1010, %1584] : memref<8x128xf32, #tpu.memory_space<vmem>>, vector<8x128xf32>
    %1586 = arith.mulf %1585, %3 : vector<8x128xf32>
    %cst_1011 = arith.constant 0.0123456791 : f32
    %1587 = vector.broadcast %cst_1011 : f32 to vector<8x128xf32>
    %1588 = arith.mulf %1586, %1587 : vector<8x128xf32>
    %1589 = math.roundeven %1588 : vector<8x128xf32>
    %cst_1012 = arith.constant -1.280000e+02 : f32
    %cst_1013 = arith.constant 1.270000e+02 : f32
    %1590 = vector.broadcast %cst_1012 : f32 to vector<8x128xf32>
    %1591 = arith.maximumf %1590, %1589 : vector<8x128xf32>
    %1592 = vector.broadcast %cst_1013 : f32 to vector<8x128xf32>
    %1593 = arith.minimumf %1592, %1591 : vector<8x128xf32>
    %cst_1014 = arith.constant 8.100000e+01 : f32
    %1594 = vector.broadcast %cst_1014 : f32 to vector<8x128xf32>
    %1595 = arith.mulf %1593, %1594 : vector<8x128xf32>
    %1596 = arith.subf %1595, %1586 : vector<8x128xf32>
    %1597 = arith.mulf %1596, %1596 : vector<8x128xf32>
    %1598 = arith.addf %1574, %1597 : vector<8x128xf32>
    %cst_1015 = arith.constant 0.0121951215 : f32
    %1599 = vector.broadcast %cst_1015 : f32 to vector<8x128xf32>
    %1600 = arith.mulf %1586, %1599 : vector<8x128xf32>
    %1601 = math.roundeven %1600 : vector<8x128xf32>
    %cst_1016 = arith.constant -1.280000e+02 : f32
    %cst_1017 = arith.constant 1.270000e+02 : f32
    %1602 = vector.broadcast %cst_1016 : f32 to vector<8x128xf32>
    %1603 = arith.maximumf %1602, %1601 : vector<8x128xf32>
    %1604 = vector.broadcast %cst_1017 : f32 to vector<8x128xf32>
    %1605 = arith.minimumf %1604, %1603 : vector<8x128xf32>
    %cst_1018 = arith.constant 8.200000e+01 : f32
    %1606 = vector.broadcast %cst_1018 : f32 to vector<8x128xf32>
    %1607 = arith.mulf %1605, %1606 : vector<8x128xf32>
    %1608 = arith.subf %1607, %1586 : vector<8x128xf32>
    %1609 = arith.mulf %1608, %1608 : vector<8x128xf32>
    %1610 = arith.addf %1575, %1609 : vector<8x128xf32>
    %cst_1019 = arith.constant 0.0120481923 : f32
    %1611 = vector.broadcast %cst_1019 : f32 to vector<8x128xf32>
    %1612 = arith.mulf %1586, %1611 : vector<8x128xf32>
    %1613 = math.roundeven %1612 : vector<8x128xf32>
    %cst_1020 = arith.constant -1.280000e+02 : f32
    %cst_1021 = arith.constant 1.270000e+02 : f32
    %1614 = vector.broadcast %cst_1020 : f32 to vector<8x128xf32>
    %1615 = arith.maximumf %1614, %1613 : vector<8x128xf32>
    %1616 = vector.broadcast %cst_1021 : f32 to vector<8x128xf32>
    %1617 = arith.minimumf %1616, %1615 : vector<8x128xf32>
    %cst_1022 = arith.constant 8.300000e+01 : f32
    %1618 = vector.broadcast %cst_1022 : f32 to vector<8x128xf32>
    %1619 = arith.mulf %1617, %1618 : vector<8x128xf32>
    %1620 = arith.subf %1619, %1586 : vector<8x128xf32>
    %1621 = arith.mulf %1620, %1620 : vector<8x128xf32>
    %1622 = arith.addf %1576, %1621 : vector<8x128xf32>
    %cst_1023 = arith.constant 0.0119047621 : f32
    %1623 = vector.broadcast %cst_1023 : f32 to vector<8x128xf32>
    %1624 = arith.mulf %1586, %1623 : vector<8x128xf32>
    %1625 = math.roundeven %1624 : vector<8x128xf32>
    %cst_1024 = arith.constant -1.280000e+02 : f32
    %cst_1025 = arith.constant 1.270000e+02 : f32
    %1626 = vector.broadcast %cst_1024 : f32 to vector<8x128xf32>
    %1627 = arith.maximumf %1626, %1625 : vector<8x128xf32>
    %1628 = vector.broadcast %cst_1025 : f32 to vector<8x128xf32>
    %1629 = arith.minimumf %1628, %1627 : vector<8x128xf32>
    %cst_1026 = arith.constant 8.400000e+01 : f32
    %1630 = vector.broadcast %cst_1026 : f32 to vector<8x128xf32>
    %1631 = arith.mulf %1629, %1630 : vector<8x128xf32>
    %1632 = arith.subf %1631, %1586 : vector<8x128xf32>
    %1633 = arith.mulf %1632, %1632 : vector<8x128xf32>
    %1634 = arith.addf %1577, %1633 : vector<8x128xf32>
    %cst_1027 = arith.constant 0.0117647061 : f32
    %1635 = vector.broadcast %cst_1027 : f32 to vector<8x128xf32>
    %1636 = arith.mulf %1586, %1635 : vector<8x128xf32>
    %1637 = math.roundeven %1636 : vector<8x128xf32>
    %cst_1028 = arith.constant -1.280000e+02 : f32
    %cst_1029 = arith.constant 1.270000e+02 : f32
    %1638 = vector.broadcast %cst_1028 : f32 to vector<8x128xf32>
    %1639 = arith.maximumf %1638, %1637 : vector<8x128xf32>
    %1640 = vector.broadcast %cst_1029 : f32 to vector<8x128xf32>
    %1641 = arith.minimumf %1640, %1639 : vector<8x128xf32>
    %cst_1030 = arith.constant 8.500000e+01 : f32
    %1642 = vector.broadcast %cst_1030 : f32 to vector<8x128xf32>
    %1643 = arith.mulf %1641, %1642 : vector<8x128xf32>
    %1644 = arith.subf %1643, %1586 : vector<8x128xf32>
    %1645 = arith.mulf %1644, %1644 : vector<8x128xf32>
    %1646 = arith.addf %1578, %1645 : vector<8x128xf32>
    %cst_1031 = arith.constant 0.0116279069 : f32
    %1647 = vector.broadcast %cst_1031 : f32 to vector<8x128xf32>
    %1648 = arith.mulf %1586, %1647 : vector<8x128xf32>
    %1649 = math.roundeven %1648 : vector<8x128xf32>
    %cst_1032 = arith.constant -1.280000e+02 : f32
    %cst_1033 = arith.constant 1.270000e+02 : f32
    %1650 = vector.broadcast %cst_1032 : f32 to vector<8x128xf32>
    %1651 = arith.maximumf %1650, %1649 : vector<8x128xf32>
    %1652 = vector.broadcast %cst_1033 : f32 to vector<8x128xf32>
    %1653 = arith.minimumf %1652, %1651 : vector<8x128xf32>
    %cst_1034 = arith.constant 8.600000e+01 : f32
    %1654 = vector.broadcast %cst_1034 : f32 to vector<8x128xf32>
    %1655 = arith.mulf %1653, %1654 : vector<8x128xf32>
    %1656 = arith.subf %1655, %1586 : vector<8x128xf32>
    %1657 = arith.mulf %1656, %1656 : vector<8x128xf32>
    %1658 = arith.addf %1579, %1657 : vector<8x128xf32>
    %cst_1035 = arith.constant 0.0114942528 : f32
    %1659 = vector.broadcast %cst_1035 : f32 to vector<8x128xf32>
    %1660 = arith.mulf %1586, %1659 : vector<8x128xf32>
    %1661 = math.roundeven %1660 : vector<8x128xf32>
    %cst_1036 = arith.constant -1.280000e+02 : f32
    %cst_1037 = arith.constant 1.270000e+02 : f32
    %1662 = vector.broadcast %cst_1036 : f32 to vector<8x128xf32>
    %1663 = arith.maximumf %1662, %1661 : vector<8x128xf32>
    %1664 = vector.broadcast %cst_1037 : f32 to vector<8x128xf32>
    %1665 = arith.minimumf %1664, %1663 : vector<8x128xf32>
    %cst_1038 = arith.constant 8.700000e+01 : f32
    %1666 = vector.broadcast %cst_1038 : f32 to vector<8x128xf32>
    %1667 = arith.mulf %1665, %1666 : vector<8x128xf32>
    %1668 = arith.subf %1667, %1586 : vector<8x128xf32>
    %1669 = arith.mulf %1668, %1668 : vector<8x128xf32>
    %1670 = arith.addf %1580, %1669 : vector<8x128xf32>
    %cst_1039 = arith.constant 0.0113636367 : f32
    %1671 = vector.broadcast %cst_1039 : f32 to vector<8x128xf32>
    %1672 = arith.mulf %1586, %1671 : vector<8x128xf32>
    %1673 = math.roundeven %1672 : vector<8x128xf32>
    %cst_1040 = arith.constant -1.280000e+02 : f32
    %cst_1041 = arith.constant 1.270000e+02 : f32
    %1674 = vector.broadcast %cst_1040 : f32 to vector<8x128xf32>
    %1675 = arith.maximumf %1674, %1673 : vector<8x128xf32>
    %1676 = vector.broadcast %cst_1041 : f32 to vector<8x128xf32>
    %1677 = arith.minimumf %1676, %1675 : vector<8x128xf32>
    %cst_1042 = arith.constant 8.800000e+01 : f32
    %1678 = vector.broadcast %cst_1042 : f32 to vector<8x128xf32>
    %1679 = arith.mulf %1677, %1678 : vector<8x128xf32>
    %1680 = arith.subf %1679, %1586 : vector<8x128xf32>
    %1681 = arith.mulf %1680, %1680 : vector<8x128xf32>
    %1682 = arith.addf %1581, %1681 : vector<8x128xf32>
    %c1_i32_1043 = arith.constant 1 : i32
    %c0_1044 = arith.constant 0 : index
    %c80 = arith.constant 80 : index
    %c0_1045 = arith.constant 0 : index
    %c0_1046 = arith.constant 0 : index
    %1683 = vector.load %arg4[%c0_1044, %c80, %c0_1045, %c0_1046] : memref<1x128x8x128xf32, #tpu.memory_space<vmem>>, vector<1x1x8x128xf32>
    %1684 = vector.shape_cast %1683 : vector<1x1x8x128xf32> to vector<8x128xf32>
    %1685 = arith.addf %1684, %1598 : vector<8x128xf32>
    %c0_1047 = arith.constant 0 : index
    %c80_1048 = arith.constant 80 : index
    %c0_1049 = arith.constant 0 : index
    %c0_1050 = arith.constant 0 : index
    %1686 = vector.load %arg4[%c0_1047, %c80_1048, %c0_1049, %c0_1050] : memref<1x128x8x128xf32, #tpu.memory_space<vmem>>, vector<1x1x8x128xf32>
    %1687 = vector.shape_cast %1686 : vector<1x1x8x128xf32> to vector<8x128xf32>
    %1688 = vector.shape_cast %1685 : vector<8x128xf32> to vector<1x1x8x128xf32>
    tpu.vector_store %arg4[%c0_1047, %c80_1048, %c0_1049, %c0_1050], %1688 {strides = array<i32>} : memref<1x128x8x128xf32, #tpu.memory_space<vmem>>, vector<1x1x8x128xf32>,
    %c0_1051 = arith.constant 0 : index
    %c81 = arith.constant 81 : index
    %c0_1052 = arith.constant 0 : index
    %c0_1053 = arith.constant 0 : index
    %1689 = vector.load %arg4[%c0_1051, %c81, %c0_1052, %c0_1053] : memref<1x128x8x128xf32, #tpu.memory_space<vmem>>, vector<1x1x8x128xf32>
    %1690 = vector.shape_cast %1689 : vector<1x1x8x128xf32> to vector<8x128xf32>
    %1691 = arith.addf %1690, %1610 : vector<8x128xf32>
    %c0_1054 = arith.constant 0 : index
    %c81_1055 = arith.constant 81 : index
    %c0_1056 = arith.constant 0 : index
    %c0_1057 = arith.constant 0 : index
    %1692 = vector.load %arg4[%c0_1054, %c81_1055, %c0_1056, %c0_1057] : memref<1x128x8x128xf32, #tpu.memory_space<vmem>>, vector<1x1x8x128xf32>
    %1693 = vector.shape_cast %1692 : vector<1x1x8x128xf32> to vector<8x128xf32>
    %1694 = vector.shape_cast %1691 : vector<8x128xf32> to vector<1x1x8x128xf32>
    tpu.vector_store %arg4[%c0_1054, %c81_1055, %c0_1056, %c0_1057], %1694 {strides = array<i32>} : memref<1x128x8x128xf32, #tpu.memory_space<vmem>>, vector<1x1x8x128xf32>,
    %c0_1058 = arith.constant 0 : index
    %c82 = arith.constant 82 : index
    %c0_1059 = arith.constant 0 : index
    %c0_1060 = arith.constant 0 : index
    %1695 = vector.load %arg4[%c0_1058, %c82, %c0_1059, %c0_1060] : memref<1x128x8x128xf32, #tpu.memory_space<vmem>>, vector<1x1x8x128xf32>
    %1696 = vector.shape_cast %1695 : vector<1x1x8x128xf32> to vector<8x128xf32>
    %1697 = arith.addf %1696, %1622 : vector<8x128xf32>
    %c0_1061 = arith.constant 0 : index
    %c82_1062 = arith.constant 82 : index
    %c0_1063 = arith.constant 0 : index
    %c0_1064 = arith.constant 0 : index
    %1698 = vector.load %arg4[%c0_1061, %c82_1062, %c0_1063, %c0_1064] : memref<1x128x8x128xf32, #tpu.memory_space<vmem>>, vector<1x1x8x128xf32>
    %1699 = vector.shape_cast %1698 : vector<1x1x8x128xf32> to vector<8x128xf32>
    %1700 = vector.shape_cast %1697 : vector<8x128xf32> to vector<1x1x8x128xf32>
    tpu.vector_store %arg4[%c0_1061, %c82_1062, %c0_1063, %c0_1064], %1700 {strides = array<i32>} : memref<1x128x8x128xf32, #tpu.memory_space<vmem>>, vector<1x1x8x128xf32>,
    %c0_1065 = arith.constant 0 : index
    %c83 = arith.constant 83 : index
    %c0_1066 = arith.constant 0 : index
    %c0_1067 = arith.constant 0 : index
    %1701 = vector.load %arg4[%c0_1065, %c83, %c0_1066, %c0_1067] : memref<1x128x8x128xf32, #tpu.memory_space<vmem>>, vector<1x1x8x128xf32>
    %1702 = vector.shape_cast %1701 : vector<1x1x8x128xf32> to vector<8x128xf32>
    %1703 = arith.addf %1702, %1634 : vector<8x128xf32>
    %c0_1068 = arith.constant 0 : index
    %c83_1069 = arith.constant 83 : index
    %c0_1070 = arith.constant 0 : index
    %c0_1071 = arith.constant 0 : index
    %1704 = vector.load %arg4[%c0_1068, %c83_1069, %c0_1070, %c0_1071] : memref<1x128x8x128xf32, #tpu.memory_space<vmem>>, vector<1x1x8x128xf32>
    %1705 = vector.shape_cast %1704 : vector<1x1x8x128xf32> to vector<8x128xf32>
    %1706 = vector.shape_cast %1703 : vector<8x128xf32> to vector<1x1x8x128xf32>
    tpu.vector_store %arg4[%c0_1068, %c83_1069, %c0_1070, %c0_1071], %1706 {strides = array<i32>} : memref<1x128x8x128xf32, #tpu.memory_space<vmem>>, vector<1x1x8x128xf32>,
    %c0_1072 = arith.constant 0 : index
    %c84 = arith.constant 84 : index
    %c0_1073 = arith.constant 0 : index
    %c0_1074 = arith.constant 0 : index
    %1707 = vector.load %arg4[%c0_1072, %c84, %c0_1073, %c0_1074] : memref<1x128x8x128xf32, #tpu.memory_space<vmem>>, vector<1x1x8x128xf32>
    %1708 = vector.shape_cast %1707 : vector<1x1x8x128xf32> to vector<8x128xf32>
    %1709 = arith.addf %1708, %1646 : vector<8x128xf32>
    %c0_1075 = arith.constant 0 : index
    %c84_1076 = arith.constant 84 : index
    %c0_1077 = arith.constant 0 : index
    %c0_1078 = arith.constant 0 : index
    %1710 = vector.load %arg4[%c0_1075, %c84_1076, %c0_1077, %c0_1078] : memref<1x128x8x128xf32, #tpu.memory_space<vmem>>, vector<1x1x8x128xf32>
    %1711 = vector.shape_cast %1710 : vector<1x1x8x128xf32> to vector<8x128xf32>
    %1712 = vector.shape_cast %1709 : vector<8x128xf32> to vector<1x1x8x128xf32>
    tpu.vector_store %arg4[%c0_1075, %c84_1076, %c0_1077, %c0_1078], %1712 {strides = array<i32>} : memref<1x128x8x128xf32, #tpu.memory_space<vmem>>, vector<1x1x8x128xf32>,
    %c0_1079 = arith.constant 0 : index
    %c85 = arith.constant 85 : index
    %c0_1080 = arith.constant 0 : index
    %c0_1081 = arith.constant 0 : index
    %1713 = vector.load %arg4[%c0_1079, %c85, %c0_1080, %c0_1081] : memref<1x128x8x128xf32, #tpu.memory_space<vmem>>, vector<1x1x8x128xf32>
    %1714 = vector.shape_cast %1713 : vector<1x1x8x128xf32> to vector<8x128xf32>
    %1715 = arith.addf %1714, %1658 : vector<8x128xf32>
    %c0_1082 = arith.constant 0 : index
    %c85_1083 = arith.constant 85 : index
    %c0_1084 = arith.constant 0 : index
    %c0_1085 = arith.constant 0 : index
    %1716 = vector.load %arg4[%c0_1082, %c85_1083, %c0_1084, %c0_1085] : memref<1x128x8x128xf32, #tpu.memory_space<vmem>>, vector<1x1x8x128xf32>
    %1717 = vector.shape_cast %1716 : vector<1x1x8x128xf32> to vector<8x128xf32>
    %1718 = vector.shape_cast %1715 : vector<8x128xf32> to vector<1x1x8x128xf32>
    tpu.vector_store %arg4[%c0_1082, %c85_1083, %c0_1084, %c0_1085], %1718 {strides = array<i32>} : memref<1x128x8x128xf32, #tpu.memory_space<vmem>>, vector<1x1x8x128xf32>,
    %c0_1086 = arith.constant 0 : index
    %c86 = arith.constant 86 : index
    %c0_1087 = arith.constant 0 : index
    %c0_1088 = arith.constant 0 : index
    %1719 = vector.load %arg4[%c0_1086, %c86, %c0_1087, %c0_1088] : memref<1x128x8x128xf32, #tpu.memory_space<vmem>>, vector<1x1x8x128xf32>
    %1720 = vector.shape_cast %1719 : vector<1x1x8x128xf32> to vector<8x128xf32>
    %1721 = arith.addf %1720, %1670 : vector<8x128xf32>
    %c0_1089 = arith.constant 0 : index
    %c86_1090 = arith.constant 86 : index
    %c0_1091 = arith.constant 0 : index
    %c0_1092 = arith.constant 0 : index
    %1722 = vector.load %arg4[%c0_1089, %c86_1090, %c0_1091, %c0_1092] : memref<1x128x8x128xf32, #tpu.memory_space<vmem>>, vector<1x1x8x128xf32>
    %1723 = vector.shape_cast %1722 : vector<1x1x8x128xf32> to vector<8x128xf32>
    %1724 = vector.shape_cast %1721 : vector<8x128xf32> to vector<1x1x8x128xf32>
    tpu.vector_store %arg4[%c0_1089, %c86_1090, %c0_1091, %c0_1092], %1724 {strides = array<i32>} : memref<1x128x8x128xf32, #tpu.memory_space<vmem>>, vector<1x1x8x128xf32>,
    %c0_1093 = arith.constant 0 : index
    %c87 = arith.constant 87 : index
    %c0_1094 = arith.constant 0 : index
    %c0_1095 = arith.constant 0 : index
    %1725 = vector.load %arg4[%c0_1093, %c87, %c0_1094, %c0_1095] : memref<1x128x8x128xf32, #tpu.memory_space<vmem>>, vector<1x1x8x128xf32>
    %1726 = vector.shape_cast %1725 : vector<1x1x8x128xf32> to vector<8x128xf32>
    %1727 = arith.addf %1726, %1682 : vector<8x128xf32>
    %c0_1096 = arith.constant 0 : index
    %c87_1097 = arith.constant 87 : index
    %c0_1098 = arith.constant 0 : index
    %c0_1099 = arith.constant 0 : index
    %1728 = vector.load %arg4[%c0_1096, %c87_1097, %c0_1098, %c0_1099] : memref<1x128x8x128xf32, #tpu.memory_space<vmem>>, vector<1x1x8x128xf32>
    %1729 = vector.shape_cast %1728 : vector<1x1x8x128xf32> to vector<8x128xf32>
    %1730 = vector.shape_cast %1727 : vector<8x128xf32> to vector<1x1x8x128xf32>
    tpu.vector_store %arg4[%c0_1096, %c87_1097, %c0_1098, %c0_1099], %1730 {strides = array<i32>} : memref<1x128x8x128xf32, #tpu.memory_space<vmem>>, vector<1x1x8x128xf32>,
    %cst_1100 = arith.constant 0.000000e+00 : f32
    %1731 = vector.broadcast %cst_1100 : f32 to vector<8x128xf32>
    %cst_1101 = arith.constant 0.000000e+00 : f32
    %1732 = vector.broadcast %cst_1101 : f32 to vector<8x128xf32>
    %cst_1102 = arith.constant 0.000000e+00 : f32
    %1733 = vector.broadcast %cst_1102 : f32 to vector<8x128xf32>
    %cst_1103 = arith.constant 0.000000e+00 : f32
    %1734 = vector.broadcast %cst_1103 : f32 to vector<8x128xf32>
    %cst_1104 = arith.constant 0.000000e+00 : f32
    %1735 = vector.broadcast %cst_1104 : f32 to vector<8x128xf32>
    %cst_1105 = arith.constant 0.000000e+00 : f32
    %1736 = vector.broadcast %cst_1105 : f32 to vector<8x128xf32>
    %cst_1106 = arith.constant 0.000000e+00 : f32
    %1737 = vector.broadcast %cst_1106 : f32 to vector<8x128xf32>
    %cst_1107 = arith.constant 0.000000e+00 : f32
    %1738 = vector.broadcast %cst_1107 : f32 to vector<8x128xf32>
    %c0_i32_1108 = arith.constant 0 : i32
    %c128_i32_1109 = arith.constant 128 : i32
    %1739 = arith.muli %c0_i32_1108, %c128_i32_1109 : i32
    %1740 = tpu.assume_multiple %1739, 128 : i32
    %c0_1110 = arith.constant 0 : index
    %1741 = arith.index_cast %1740 : i32 to index
    %1742 = vector.load %arg2[%c0_1110, %1741] : memref<8x128xf32, #tpu.memory_space<vmem>>, vector<8x128xf32>
    %1743 = arith.mulf %1742, %3 : vector<8x128xf32>
    %cst_1111 = arith.constant 0.0112359552 : f32
    %1744 = vector.broadcast %cst_1111 : f32 to vector<8x128xf32>
    %1745 = arith.mulf %1743, %1744 : vector<8x128xf32>
    %1746 = math.roundeven %1745 : vector<8x128xf32>
    %cst_1112 = arith.constant -1.280000e+02 : f32
    %cst_1113 = arith.constant 1.270000e+02 : f32
    %1747 = vector.broadcast %cst_1112 : f32 to vector<8x128xf32>
    %1748 = arith.maximumf %1747, %1746 : vector<8x128xf32>
    %1749 = vector.broadcast %cst_1113 : f32 to vector<8x128xf32>
    %1750 = arith.minimumf %1749, %1748 : vector<8x128xf32>
    %cst_1114 = arith.constant 8.900000e+01 : f32
    %1751 = vector.broadcast %cst_1114 : f32 to vector<8x128xf32>
    %1752 = arith.mulf %1750, %1751 : vector<8x128xf32>
    %1753 = arith.subf %1752, %1743 : vector<8x128xf32>
    %1754 = arith.mulf %1753, %1753 : vector<8x128xf32>
    %1755 = arith.addf %1731, %1754 : vector<8x128xf32>
    %cst_1115 = arith.constant 0.0111111114 : f32
    %1756 = vector.broadcast %cst_1115 : f32 to vector<8x128xf32>
    %1757 = arith.mulf %1743, %1756 : vector<8x128xf32>
    %1758 = math.roundeven %1757 : vector<8x128xf32>
    %cst_1116 = arith.constant -1.280000e+02 : f32
    %cst_1117 = arith.constant 1.270000e+02 : f32
    %1759 = vector.broadcast %cst_1116 : f32 to vector<8x128xf32>
    %1760 = arith.maximumf %1759, %1758 : vector<8x128xf32>
    %1761 = vector.broadcast %cst_1117 : f32 to vector<8x128xf32>
    %1762 = arith.minimumf %1761, %1760 : vector<8x128xf32>
    %cst_1118 = arith.constant 9.000000e+01 : f32
    %1763 = vector.broadcast %cst_1118 : f32 to vector<8x128xf32>
    %1764 = arith.mulf %1762, %1763 : vector<8x128xf32>
    %1765 = arith.subf %1764, %1743 : vector<8x128xf32>
    %1766 = arith.mulf %1765, %1765 : vector<8x128xf32>
    %1767 = arith.addf %1732, %1766 : vector<8x128xf32>
    %cst_1119 = arith.constant 0.0109890113 : f32
    %1768 = vector.broadcast %cst_1119 : f32 to vector<8x128xf32>
    %1769 = arith.mulf %1743, %1768 : vector<8x128xf32>
    %1770 = math.roundeven %1769 : vector<8x128xf32>
    %cst_1120 = arith.constant -1.280000e+02 : f32
    %cst_1121 = arith.constant 1.270000e+02 : f32
    %1771 = vector.broadcast %cst_1120 : f32 to vector<8x128xf32>
    %1772 = arith.maximumf %1771, %1770 : vector<8x128xf32>
    %1773 = vector.broadcast %cst_1121 : f32 to vector<8x128xf32>
    %1774 = arith.minimumf %1773, %1772 : vector<8x128xf32>
    %cst_1122 = arith.constant 9.100000e+01 : f32
    %1775 = vector.broadcast %cst_1122 : f32 to vector<8x128xf32>
    %1776 = arith.mulf %1774, %1775 : vector<8x128xf32>
    %1777 = arith.subf %1776, %1743 : vector<8x128xf32>
    %1778 = arith.mulf %1777, %1777 : vector<8x128xf32>
    %1779 = arith.addf %1733, %1778 : vector<8x128xf32>
    %cst_1123 = arith.constant 0.0108695654 : f32
    %1780 = vector.broadcast %cst_1123 : f32 to vector<8x128xf32>
    %1781 = arith.mulf %1743, %1780 : vector<8x128xf32>
    %1782 = math.roundeven %1781 : vector<8x128xf32>
    %cst_1124 = arith.constant -1.280000e+02 : f32
    %cst_1125 = arith.constant 1.270000e+02 : f32
    %1783 = vector.broadcast %cst_1124 : f32 to vector<8x128xf32>
    %1784 = arith.maximumf %1783, %1782 : vector<8x128xf32>
    %1785 = vector.broadcast %cst_1125 : f32 to vector<8x128xf32>
    %1786 = arith.minimumf %1785, %1784 : vector<8x128xf32>
    %cst_1126 = arith.constant 9.200000e+01 : f32
    %1787 = vector.broadcast %cst_1126 : f32 to vector<8x128xf32>
    %1788 = arith.mulf %1786, %1787 : vector<8x128xf32>
    %1789 = arith.subf %1788, %1743 : vector<8x128xf32>
    %1790 = arith.mulf %1789, %1789 : vector<8x128xf32>
    %1791 = arith.addf %1734, %1790 : vector<8x128xf32>
    %cst_1127 = arith.constant 0.0107526882 : f32
    %1792 = vector.broadcast %cst_1127 : f32 to vector<8x128xf32>
    %1793 = arith.mulf %1743, %1792 : vector<8x128xf32>
    %1794 = math.roundeven %1793 : vector<8x128xf32>
    %cst_1128 = arith.constant -1.280000e+02 : f32
    %cst_1129 = arith.constant 1.270000e+02 : f32
    %1795 = vector.broadcast %cst_1128 : f32 to vector<8x128xf32>
    %1796 = arith.maximumf %1795, %1794 : vector<8x128xf32>
    %1797 = vector.broadcast %cst_1129 : f32 to vector<8x128xf32>
    %1798 = arith.minimumf %1797, %1796 : vector<8x128xf32>
    %cst_1130 = arith.constant 9.300000e+01 : f32
    %1799 = vector.broadcast %cst_1130 : f32 to vector<8x128xf32>
    %1800 = arith.mulf %1798, %1799 : vector<8x128xf32>
    %1801 = arith.subf %1800, %1743 : vector<8x128xf32>
    %1802 = arith.mulf %1801, %1801 : vector<8x128xf32>
    %1803 = arith.addf %1735, %1802 : vector<8x128xf32>
    %cst_1131 = arith.constant 0.0106382975 : f32
    %1804 = vector.broadcast %cst_1131 : f32 to vector<8x128xf32>
    %1805 = arith.mulf %1743, %1804 : vector<8x128xf32>
    %1806 = math.roundeven %1805 : vector<8x128xf32>
    %cst_1132 = arith.constant -1.280000e+02 : f32
    %cst_1133 = arith.constant 1.270000e+02 : f32
    %1807 = vector.broadcast %cst_1132 : f32 to vector<8x128xf32>
    %1808 = arith.maximumf %1807, %1806 : vector<8x128xf32>
    %1809 = vector.broadcast %cst_1133 : f32 to vector<8x128xf32>
    %1810 = arith.minimumf %1809, %1808 : vector<8x128xf32>
    %cst_1134 = arith.constant 9.400000e+01 : f32
    %1811 = vector.broadcast %cst_1134 : f32 to vector<8x128xf32>
    %1812 = arith.mulf %1810, %1811 : vector<8x128xf32>
    %1813 = arith.subf %1812, %1743 : vector<8x128xf32>
    %1814 = arith.mulf %1813, %1813 : vector<8x128xf32>
    %1815 = arith.addf %1736, %1814 : vector<8x128xf32>
    %cst_1135 = arith.constant 0.0105263162 : f32
    %1816 = vector.broadcast %cst_1135 : f32 to vector<8x128xf32>
    %1817 = arith.mulf %1743, %1816 : vector<8x128xf32>
    %1818 = math.roundeven %1817 : vector<8x128xf32>
    %cst_1136 = arith.constant -1.280000e+02 : f32
    %cst_1137 = arith.constant 1.270000e+02 : f32
    %1819 = vector.broadcast %cst_1136 : f32 to vector<8x128xf32>
    %1820 = arith.maximumf %1819, %1818 : vector<8x128xf32>
    %1821 = vector.broadcast %cst_1137 : f32 to vector<8x128xf32>
    %1822 = arith.minimumf %1821, %1820 : vector<8x128xf32>
    %cst_1138 = arith.constant 9.500000e+01 : f32
    %1823 = vector.broadcast %cst_1138 : f32 to vector<8x128xf32>
    %1824 = arith.mulf %1822, %1823 : vector<8x128xf32>
    %1825 = arith.subf %1824, %1743 : vector<8x128xf32>
    %1826 = arith.mulf %1825, %1825 : vector<8x128xf32>
    %1827 = arith.addf %1737, %1826 : vector<8x128xf32>
    %cst_1139 = arith.constant 0.010416667 : f32
    %1828 = vector.broadcast %cst_1139 : f32 to vector<8x128xf32>
    %1829 = arith.mulf %1743, %1828 : vector<8x128xf32>
    %1830 = math.roundeven %1829 : vector<8x128xf32>
    %cst_1140 = arith.constant -1.280000e+02 : f32
    %cst_1141 = arith.constant 1.270000e+02 : f32
    %1831 = vector.broadcast %cst_1140 : f32 to vector<8x128xf32>
    %1832 = arith.maximumf %1831, %1830 : vector<8x128xf32>
    %1833 = vector.broadcast %cst_1141 : f32 to vector<8x128xf32>
    %1834 = arith.minimumf %1833, %1832 : vector<8x128xf32>
    %cst_1142 = arith.constant 9.600000e+01 : f32
    %1835 = vector.broadcast %cst_1142 : f32 to vector<8x128xf32>
    %1836 = arith.mulf %1834, %1835 : vector<8x128xf32>
    %1837 = arith.subf %1836, %1743 : vector<8x128xf32>
    %1838 = arith.mulf %1837, %1837 : vector<8x128xf32>
    %1839 = arith.addf %1738, %1838 : vector<8x128xf32>
    %c1_i32_1143 = arith.constant 1 : i32
    %c0_1144 = arith.constant 0 : index
    %c88 = arith.constant 88 : index
    %c0_1145 = arith.constant 0 : index
    %c0_1146 = arith.constant 0 : index
    %1840 = vector.load %arg4[%c0_1144, %c88, %c0_1145, %c0_1146] : memref<1x128x8x128xf32, #tpu.memory_space<vmem>>, vector<1x1x8x128xf32>
    %1841 = vector.shape_cast %1840 : vector<1x1x8x128xf32> to vector<8x128xf32>
    %1842 = arith.addf %1841, %1755 : vector<8x128xf32>
    %c0_1147 = arith.constant 0 : index
    %c88_1148 = arith.constant 88 : index
    %c0_1149 = arith.constant 0 : index
    %c0_1150 = arith.constant 0 : index
    %1843 = vector.load %arg4[%c0_1147, %c88_1148, %c0_1149, %c0_1150] : memref<1x128x8x128xf32, #tpu.memory_space<vmem>>, vector<1x1x8x128xf32>
    %1844 = vector.shape_cast %1843 : vector<1x1x8x128xf32> to vector<8x128xf32>
    %1845 = vector.shape_cast %1842 : vector<8x128xf32> to vector<1x1x8x128xf32>
    tpu.vector_store %arg4[%c0_1147, %c88_1148, %c0_1149, %c0_1150], %1845 {strides = array<i32>} : memref<1x128x8x128xf32, #tpu.memory_space<vmem>>, vector<1x1x8x128xf32>,
    %c0_1151 = arith.constant 0 : index
    %c89 = arith.constant 89 : index
    %c0_1152 = arith.constant 0 : index
    %c0_1153 = arith.constant 0 : index
    %1846 = vector.load %arg4[%c0_1151, %c89, %c0_1152, %c0_1153] : memref<1x128x8x128xf32, #tpu.memory_space<vmem>>, vector<1x1x8x128xf32>
    %1847 = vector.shape_cast %1846 : vector<1x1x8x128xf32> to vector<8x128xf32>
    %1848 = arith.addf %1847, %1767 : vector<8x128xf32>
    %c0_1154 = arith.constant 0 : index
    %c89_1155 = arith.constant 89 : index
    %c0_1156 = arith.constant 0 : index
    %c0_1157 = arith.constant 0 : index
    %1849 = vector.load %arg4[%c0_1154, %c89_1155, %c0_1156, %c0_1157] : memref<1x128x8x128xf32, #tpu.memory_space<vmem>>, vector<1x1x8x128xf32>
    %1850 = vector.shape_cast %1849 : vector<1x1x8x128xf32> to vector<8x128xf32>
    %1851 = vector.shape_cast %1848 : vector<8x128xf32> to vector<1x1x8x128xf32>
    tpu.vector_store %arg4[%c0_1154, %c89_1155, %c0_1156, %c0_1157], %1851 {strides = array<i32>} : memref<1x128x8x128xf32, #tpu.memory_space<vmem>>, vector<1x1x8x128xf32>,
    %c0_1158 = arith.constant 0 : index
    %c90 = arith.constant 90 : index
    %c0_1159 = arith.constant 0 : index
    %c0_1160 = arith.constant 0 : index
    %1852 = vector.load %arg4[%c0_1158, %c90, %c0_1159, %c0_1160] : memref<1x128x8x128xf32, #tpu.memory_space<vmem>>, vector<1x1x8x128xf32>
    %1853 = vector.shape_cast %1852 : vector<1x1x8x128xf32> to vector<8x128xf32>
    %1854 = arith.addf %1853, %1779 : vector<8x128xf32>
    %c0_1161 = arith.constant 0 : index
    %c90_1162 = arith.constant 90 : index
    %c0_1163 = arith.constant 0 : index
    %c0_1164 = arith.constant 0 : index
    %1855 = vector.load %arg4[%c0_1161, %c90_1162, %c0_1163, %c0_1164] : memref<1x128x8x128xf32, #tpu.memory_space<vmem>>, vector<1x1x8x128xf32>
    %1856 = vector.shape_cast %1855 : vector<1x1x8x128xf32> to vector<8x128xf32>
    %1857 = vector.shape_cast %1854 : vector<8x128xf32> to vector<1x1x8x128xf32>
    tpu.vector_store %arg4[%c0_1161, %c90_1162, %c0_1163, %c0_1164], %1857 {strides = array<i32>} : memref<1x128x8x128xf32, #tpu.memory_space<vmem>>, vector<1x1x8x128xf32>,
    %c0_1165 = arith.constant 0 : index
    %c91 = arith.constant 91 : index
    %c0_1166 = arith.constant 0 : index
    %c0_1167 = arith.constant 0 : index
    %1858 = vector.load %arg4[%c0_1165, %c91, %c0_1166, %c0_1167] : memref<1x128x8x128xf32, #tpu.memory_space<vmem>>, vector<1x1x8x128xf32>
    %1859 = vector.shape_cast %1858 : vector<1x1x8x128xf32> to vector<8x128xf32>
    %1860 = arith.addf %1859, %1791 : vector<8x128xf32>
    %c0_1168 = arith.constant 0 : index
    %c91_1169 = arith.constant 91 : index
    %c0_1170 = arith.constant 0 : index
    %c0_1171 = arith.constant 0 : index
    %1861 = vector.load %arg4[%c0_1168, %c91_1169, %c0_1170, %c0_1171] : memref<1x128x8x128xf32, #tpu.memory_space<vmem>>, vector<1x1x8x128xf32>
    %1862 = vector.shape_cast %1861 : vector<1x1x8x128xf32> to vector<8x128xf32>
    %1863 = vector.shape_cast %1860 : vector<8x128xf32> to vector<1x1x8x128xf32>
    tpu.vector_store %arg4[%c0_1168, %c91_1169, %c0_1170, %c0_1171], %1863 {strides = array<i32>} : memref<1x128x8x128xf32, #tpu.memory_space<vmem>>, vector<1x1x8x128xf32>,
    %c0_1172 = arith.constant 0 : index
    %c92 = arith.constant 92 : index
    %c0_1173 = arith.constant 0 : index
    %c0_1174 = arith.constant 0 : index
    %1864 = vector.load %arg4[%c0_1172, %c92, %c0_1173, %c0_1174] : memref<1x128x8x128xf32, #tpu.memory_space<vmem>>, vector<1x1x8x128xf32>
    %1865 = vector.shape_cast %1864 : vector<1x1x8x128xf32> to vector<8x128xf32>
    %1866 = arith.addf %1865, %1803 : vector<8x128xf32>
    %c0_1175 = arith.constant 0 : index
    %c92_1176 = arith.constant 92 : index
    %c0_1177 = arith.constant 0 : index
    %c0_1178 = arith.constant 0 : index
    %1867 = vector.load %arg4[%c0_1175, %c92_1176, %c0_1177, %c0_1178] : memref<1x128x8x128xf32, #tpu.memory_space<vmem>>, vector<1x1x8x128xf32>
    %1868 = vector.shape_cast %1867 : vector<1x1x8x128xf32> to vector<8x128xf32>
    %1869 = vector.shape_cast %1866 : vector<8x128xf32> to vector<1x1x8x128xf32>
    tpu.vector_store %arg4[%c0_1175, %c92_1176, %c0_1177, %c0_1178], %1869 {strides = array<i32>} : memref<1x128x8x128xf32, #tpu.memory_space<vmem>>, vector<1x1x8x128xf32>,
    %c0_1179 = arith.constant 0 : index
    %c93 = arith.constant 93 : index
    %c0_1180 = arith.constant 0 : index
    %c0_1181 = arith.constant 0 : index
    %1870 = vector.load %arg4[%c0_1179, %c93, %c0_1180, %c0_1181] : memref<1x128x8x128xf32, #tpu.memory_space<vmem>>, vector<1x1x8x128xf32>
    %1871 = vector.shape_cast %1870 : vector<1x1x8x128xf32> to vector<8x128xf32>
    %1872 = arith.addf %1871, %1815 : vector<8x128xf32>
    %c0_1182 = arith.constant 0 : index
    %c93_1183 = arith.constant 93 : index
    %c0_1184 = arith.constant 0 : index
    %c0_1185 = arith.constant 0 : index
    %1873 = vector.load %arg4[%c0_1182, %c93_1183, %c0_1184, %c0_1185] : memref<1x128x8x128xf32, #tpu.memory_space<vmem>>, vector<1x1x8x128xf32>
    %1874 = vector.shape_cast %1873 : vector<1x1x8x128xf32> to vector<8x128xf32>
    %1875 = vector.shape_cast %1872 : vector<8x128xf32> to vector<1x1x8x128xf32>
    tpu.vector_store %arg4[%c0_1182, %c93_1183, %c0_1184, %c0_1185], %1875 {strides = array<i32>} : memref<1x128x8x128xf32, #tpu.memory_space<vmem>>, vector<1x1x8x128xf32>,
    %c0_1186 = arith.constant 0 : index
    %c94 = arith.constant 94 : index
    %c0_1187 = arith.constant 0 : index
    %c0_1188 = arith.constant 0 : index
    %1876 = vector.load %arg4[%c0_1186, %c94, %c0_1187, %c0_1188] : memref<1x128x8x128xf32, #tpu.memory_space<vmem>>, vector<1x1x8x128xf32>
    %1877 = vector.shape_cast %1876 : vector<1x1x8x128xf32> to vector<8x128xf32>
    %1878 = arith.addf %1877, %1827 : vector<8x128xf32>
    %c0_1189 = arith.constant 0 : index
    %c94_1190 = arith.constant 94 : index
    %c0_1191 = arith.constant 0 : index
    %c0_1192 = arith.constant 0 : index
    %1879 = vector.load %arg4[%c0_1189, %c94_1190, %c0_1191, %c0_1192] : memref<1x128x8x128xf32, #tpu.memory_space<vmem>>, vector<1x1x8x128xf32>
    %1880 = vector.shape_cast %1879 : vector<1x1x8x128xf32> to vector<8x128xf32>
    %1881 = vector.shape_cast %1878 : vector<8x128xf32> to vector<1x1x8x128xf32>
    tpu.vector_store %arg4[%c0_1189, %c94_1190, %c0_1191, %c0_1192], %1881 {strides = array<i32>} : memref<1x128x8x128xf32, #tpu.memory_space<vmem>>, vector<1x1x8x128xf32>,
    %c0_1193 = arith.constant 0 : index
    %c95 = arith.constant 95 : index
    %c0_1194 = arith.constant 0 : index
    %c0_1195 = arith.constant 0 : index
    %1882 = vector.load %arg4[%c0_1193, %c95, %c0_1194, %c0_1195] : memref<1x128x8x128xf32, #tpu.memory_space<vmem>>, vector<1x1x8x128xf32>
    %1883 = vector.shape_cast %1882 : vector<1x1x8x128xf32> to vector<8x128xf32>
    %1884 = arith.addf %1883, %1839 : vector<8x128xf32>
    %c0_1196 = arith.constant 0 : index
    %c95_1197 = arith.constant 95 : index
    %c0_1198 = arith.constant 0 : index
    %c0_1199 = arith.constant 0 : index
    %1885 = vector.load %arg4[%c0_1196, %c95_1197, %c0_1198, %c0_1199] : memref<1x128x8x128xf32, #tpu.memory_space<vmem>>, vector<1x1x8x128xf32>
    %1886 = vector.shape_cast %1885 : vector<1x1x8x128xf32> to vector<8x128xf32>
    %1887 = vector.shape_cast %1884 : vector<8x128xf32> to vector<1x1x8x128xf32>
    tpu.vector_store %arg4[%c0_1196, %c95_1197, %c0_1198, %c0_1199], %1887 {strides = array<i32>} : memref<1x128x8x128xf32, #tpu.memory_space<vmem>>, vector<1x1x8x128xf32>,
    %cst_1200 = arith.constant 0.000000e+00 : f32
    %1888 = vector.broadcast %cst_1200 : f32 to vector<8x128xf32>
    %cst_1201 = arith.constant 0.000000e+00 : f32
    %1889 = vector.broadcast %cst_1201 : f32 to vector<8x128xf32>
    %cst_1202 = arith.constant 0.000000e+00 : f32
    %1890 = vector.broadcast %cst_1202 : f32 to vector<8x128xf32>
    %cst_1203 = arith.constant 0.000000e+00 : f32
    %1891 = vector.broadcast %cst_1203 : f32 to vector<8x128xf32>
    %c0_i32_1204 = arith.constant 0 : i32
    %c128_i32_1205 = arith.constant 128 : i32
    %1892 = arith.muli %c0_i32_1204, %c128_i32_1205 : i32
    %1893 = tpu.assume_multiple %1892, 128 : i32
    %c0_1206 = arith.constant 0 : index
    %1894 = arith.index_cast %1893 : i32 to index
    %1895 = vector.load %arg2[%c0_1206, %1894] : memref<8x128xf32, #tpu.memory_space<vmem>>, vector<8x128xf32>
    %1896 = arith.mulf %1895, %3 : vector<8x128xf32>
    %cst_1207 = arith.constant 0.010309278 : f32
    %1897 = vector.broadcast %cst_1207 : f32 to vector<8x128xf32>
    %1898 = arith.mulf %1896, %1897 : vector<8x128xf32>
    %1899 = math.roundeven %1898 : vector<8x128xf32>
    %cst_1208 = arith.constant -1.280000e+02 : f32
    %cst_1209 = arith.constant 1.270000e+02 : f32
    %1900 = vector.broadcast %cst_1208 : f32 to vector<8x128xf32>
    %1901 = arith.maximumf %1900, %1899 : vector<8x128xf32>
    %1902 = vector.broadcast %cst_1209 : f32 to vector<8x128xf32>
    %1903 = arith.minimumf %1902, %1901 : vector<8x128xf32>
    %cst_1210 = arith.constant 9.700000e+01 : f32
    %1904 = vector.broadcast %cst_1210 : f32 to vector<8x128xf32>
    %1905 = arith.mulf %1903, %1904 : vector<8x128xf32>
    %1906 = arith.subf %1905, %1896 : vector<8x128xf32>
    %1907 = arith.mulf %1906, %1906 : vector<8x128xf32>
    %1908 = arith.addf %1888, %1907 : vector<8x128xf32>
    %cst_1211 = arith.constant 0.0102040814 : f32
    %1909 = vector.broadcast %cst_1211 : f32 to vector<8x128xf32>
    %1910 = arith.mulf %1896, %1909 : vector<8x128xf32>
    %1911 = math.roundeven %1910 : vector<8x128xf32>
    %cst_1212 = arith.constant -1.280000e+02 : f32
    %cst_1213 = arith.constant 1.270000e+02 : f32
    %1912 = vector.broadcast %cst_1212 : f32 to vector<8x128xf32>
    %1913 = arith.maximumf %1912, %1911 : vector<8x128xf32>
    %1914 = vector.broadcast %cst_1213 : f32 to vector<8x128xf32>
    %1915 = arith.minimumf %1914, %1913 : vector<8x128xf32>
    %cst_1214 = arith.constant 9.800000e+01 : f32
    %1916 = vector.broadcast %cst_1214 : f32 to vector<8x128xf32>
    %1917 = arith.mulf %1915, %1916 : vector<8x128xf32>
    %1918 = arith.subf %1917, %1896 : vector<8x128xf32>
    %1919 = arith.mulf %1918, %1918 : vector<8x128xf32>
    %1920 = arith.addf %1889, %1919 : vector<8x128xf32>
    %cst_1215 = arith.constant 0.0101010101 : f32
    %1921 = vector.broadcast %cst_1215 : f32 to vector<8x128xf32>
    %1922 = arith.mulf %1896, %1921 : vector<8x128xf32>
    %1923 = math.roundeven %1922 : vector<8x128xf32>
    %cst_1216 = arith.constant -1.280000e+02 : f32
    %cst_1217 = arith.constant 1.270000e+02 : f32
    %1924 = vector.broadcast %cst_1216 : f32 to vector<8x128xf32>
    %1925 = arith.maximumf %1924, %1923 : vector<8x128xf32>
    %1926 = vector.broadcast %cst_1217 : f32 to vector<8x128xf32>
    %1927 = arith.minimumf %1926, %1925 : vector<8x128xf32>
    %cst_1218 = arith.constant 9.900000e+01 : f32
    %1928 = vector.broadcast %cst_1218 : f32 to vector<8x128xf32>
    %1929 = arith.mulf %1927, %1928 : vector<8x128xf32>
    %1930 = arith.subf %1929, %1896 : vector<8x128xf32>
    %1931 = arith.mulf %1930, %1930 : vector<8x128xf32>
    %1932 = arith.addf %1890, %1931 : vector<8x128xf32>
    %cst_1219 = arith.constant 0.00999999977 : f32
    %1933 = vector.broadcast %cst_1219 : f32 to vector<8x128xf32>
    %1934 = arith.mulf %1896, %1933 : vector<8x128xf32>
    %1935 = math.roundeven %1934 : vector<8x128xf32>
    %cst_1220 = arith.constant -1.280000e+02 : f32
    %cst_1221 = arith.constant 1.270000e+02 : f32
    %1936 = vector.broadcast %cst_1220 : f32 to vector<8x128xf32>
    %1937 = arith.maximumf %1936, %1935 : vector<8x128xf32>
    %1938 = vector.broadcast %cst_1221 : f32 to vector<8x128xf32>
    %1939 = arith.minimumf %1938, %1937 : vector<8x128xf32>
    %cst_1222 = arith.constant 1.000000e+02 : f32
    %1940 = vector.broadcast %cst_1222 : f32 to vector<8x128xf32>
    %1941 = arith.mulf %1939, %1940 : vector<8x128xf32>
    %1942 = arith.subf %1941, %1896 : vector<8x128xf32>
    %1943 = arith.mulf %1942, %1942 : vector<8x128xf32>
    %1944 = arith.addf %1891, %1943 : vector<8x128xf32>
    %c1_i32_1223 = arith.constant 1 : i32
    %c0_1224 = arith.constant 0 : index
    %c96 = arith.constant 96 : index
    %c0_1225 = arith.constant 0 : index
    %c0_1226 = arith.constant 0 : index
    %1945 = vector.load %arg4[%c0_1224, %c96, %c0_1225, %c0_1226] : memref<1x128x8x128xf32, #tpu.memory_space<vmem>>, vector<1x1x8x128xf32>
    %1946 = vector.shape_cast %1945 : vector<1x1x8x128xf32> to vector<8x128xf32>
    %1947 = arith.addf %1946, %1908 : vector<8x128xf32>
    %c0_1227 = arith.constant 0 : index
    %c96_1228 = arith.constant 96 : index
    %c0_1229 = arith.constant 0 : index
    %c0_1230 = arith.constant 0 : index
    %1948 = vector.load %arg4[%c0_1227, %c96_1228, %c0_1229, %c0_1230] : memref<1x128x8x128xf32, #tpu.memory_space<vmem>>, vector<1x1x8x128xf32>
    %1949 = vector.shape_cast %1948 : vector<1x1x8x128xf32> to vector<8x128xf32>
    %1950 = vector.shape_cast %1947 : vector<8x128xf32> to vector<1x1x8x128xf32>
    tpu.vector_store %arg4[%c0_1227, %c96_1228, %c0_1229, %c0_1230], %1950 {strides = array<i32>} : memref<1x128x8x128xf32, #tpu.memory_space<vmem>>, vector<1x1x8x128xf32>,
    %c0_1231 = arith.constant 0 : index
    %c97 = arith.constant 97 : index
    %c0_1232 = arith.constant 0 : index
    %c0_1233 = arith.constant 0 : index
    %1951 = vector.load %arg4[%c0_1231, %c97, %c0_1232, %c0_1233] : memref<1x128x8x128xf32, #tpu.memory_space<vmem>>, vector<1x1x8x128xf32>
    %1952 = vector.shape_cast %1951 : vector<1x1x8x128xf32> to vector<8x128xf32>
    %1953 = arith.addf %1952, %1920 : vector<8x128xf32>
    %c0_1234 = arith.constant 0 : index
    %c97_1235 = arith.constant 97 : index
    %c0_1236 = arith.constant 0 : index
    %c0_1237 = arith.constant 0 : index
    %1954 = vector.load %arg4[%c0_1234, %c97_1235, %c0_1236, %c0_1237] : memref<1x128x8x128xf32, #tpu.memory_space<vmem>>, vector<1x1x8x128xf32>
    %1955 = vector.shape_cast %1954 : vector<1x1x8x128xf32> to vector<8x128xf32>
    %1956 = vector.shape_cast %1953 : vector<8x128xf32> to vector<1x1x8x128xf32>
    tpu.vector_store %arg4[%c0_1234, %c97_1235, %c0_1236, %c0_1237], %1956 {strides = array<i32>} : memref<1x128x8x128xf32, #tpu.memory_space<vmem>>, vector<1x1x8x128xf32>,
    %c0_1238 = arith.constant 0 : index
    %c98 = arith.constant 98 : index
    %c0_1239 = arith.constant 0 : index
    %c0_1240 = arith.constant 0 : index
    %1957 = vector.load %arg4[%c0_1238, %c98, %c0_1239, %c0_1240] : memref<1x128x8x128xf32, #tpu.memory_space<vmem>>, vector<1x1x8x128xf32>
    %1958 = vector.shape_cast %1957 : vector<1x1x8x128xf32> to vector<8x128xf32>
    %1959 = arith.addf %1958, %1932 : vector<8x128xf32>
    %c0_1241 = arith.constant 0 : index
    %c98_1242 = arith.constant 98 : index
    %c0_1243 = arith.constant 0 : index
    %c0_1244 = arith.constant 0 : index
    %1960 = vector.load %arg4[%c0_1241, %c98_1242, %c0_1243, %c0_1244] : memref<1x128x8x128xf32, #tpu.memory_space<vmem>>, vector<1x1x8x128xf32>
    %1961 = vector.shape_cast %1960 : vector<1x1x8x128xf32> to vector<8x128xf32>
    %1962 = vector.shape_cast %1959 : vector<8x128xf32> to vector<1x1x8x128xf32>
    tpu.vector_store %arg4[%c0_1241, %c98_1242, %c0_1243, %c0_1244], %1962 {strides = array<i32>} : memref<1x128x8x128xf32, #tpu.memory_space<vmem>>, vector<1x1x8x128xf32>,
    %c0_1245 = arith.constant 0 : index
    %c99 = arith.constant 99 : index
    %c0_1246 = arith.constant 0 : index
    %c0_1247 = arith.constant 0 : index
    %1963 = vector.load %arg4[%c0_1245, %c99, %c0_1246, %c0_1247] : memref<1x128x8x128xf32, #tpu.memory_space<vmem>>, vector<1x1x8x128xf32>
    %1964 = vector.shape_cast %1963 : vector<1x1x8x128xf32> to vector<8x128xf32>
    %1965 = arith.addf %1964, %1944 : vector<8x128xf32>
    %c0_1248 = arith.constant 0 : index
    %c99_1249 = arith.constant 99 : index
    %c0_1250 = arith.constant 0 : index
    %c0_1251 = arith.constant 0 : index
    %1966 = vector.load %arg4[%c0_1248, %c99_1249, %c0_1250, %c0_1251] : memref<1x128x8x128xf32, #tpu.memory_space<vmem>>, vector<1x1x8x128xf32>
    %1967 = vector.shape_cast %1966 : vector<1x1x8x128xf32> to vector<8x128xf32>
    %1968 = vector.shape_cast %1965 : vector<8x128xf32> to vector<1x1x8x128xf32>
    tpu.vector_store %arg4[%c0_1248, %c99_1249, %c0_1250, %c0_1251], %1968 {strides = array<i32>} : memref<1x128x8x128xf32, #tpu.memory_space<vmem>>, vector<1x1x8x128xf32>,
    return
  }
  func.func @transform_0(%arg0: i32, %arg1: i32) -> (i32, i32) {
    %c0_i32 = arith.constant 0 : i32
    return %arg0, %arg1 : i32, i32
  }
  func.func @transform_1(%arg0: i32, %arg1: i32) -> (i32, i32) {
    %c0_i32 = arith.constant 0 : i32
    %c0_i32_0 = arith.constant 0 : i32
    return %arg0, %c0_i32 : i32, i32
  }
  func.func @transform_2(%arg0: i32, %arg1: i32) -> (i32, i32, i32, i32) {
    %c0_i32 = arith.constant 0 : i32
    %c0_i32_0 = arith.constant 0 : i32
    %c0_i32_1 = arith.constant 0 : i32
    %c0_i32_2 = arith.constant 0 : i32
    return %arg0, %c0_i32, %c0_i32_0, %c0_i32_1 : i32, i32, i32, i32
  }
}

</mosaic_0001>

<bundles_post_ra>
// kernel: tpu_custom_call.1
= control target key start
LH: loop header
LB: loop body
LE: loop exit
PB: predicated region body
PF: predicated region fallthrough
CT: control target
= control target key end

     0   :  { %7 = vsyncpa [#allocation3], 0  ;;  %s2865_s0 = inlined_call_operand.hbm [shape: f32[16,128], index: 0, kind: input, shape index: {}]   ;;  %s2866_s1 = inlined_call_operand.hbm [shape: f32[16,128], index: 1, kind: input, shape index: {}]   ;;  %s2867_s2 = inlined_call_operand.hbm [shape: f32[2,128,8,128], index: 2, kind: output, shape index: {}]  }
   0x1   :  { %9 = vsyncpa [#allocation3 + $0x1], 0 }
   0x2   :  { %10 = vsyncpa [#allocation6], 0 }
   0x3   :  { %12 = vsyncpa [#allocation6 + $0x1], 0 }
   0x4   :  { %13 = vsyncpa [#allocation4], 0 }
   0x5   :  { %15 = vsyncpa [#allocation4 + $0x1], 0  ;;  %s2242_s9 = smov 0   ;;  %s2244_s10 = smov 0  }
   0x6   :  { %s2246_s11 = smov 0   ;;  %s2248_s12 = smov 0  }
   0x7   :  { %s2250_s13 = smov 0   ;;  %s2252_s14 = smov 0  }
   0x8 LB: > { %s1686_s15 = sadd.s32 4294967295, %s2219_s14   ;;  %s1687_s16 = sadd.s32 4294967294, %s2219_s14   ;;  %s2219_s14 = sphi %s2252_s14, %s21_s14   ;;  %s2215_s13 = sphi %s2250_s13, %s2887_s13   ;;  %s2211_s12 = sphi %s2248_s12, %s2886_s12   ;;  %s2207_s11 = sphi %s2246_s11, %s2885_s11   ;;  %s2203_s10 = sphi %s2244_s10, %s2884_s10   ;;  %s2199_s9 = sphi %s2242_s9, %s2883_s9  }
   0x9   : > { %s33_s17 = sadd.s32 1, %s2215_s13  ;;  %s42_s18 = sadd.s32 1, %s2207_s11 }
   0xa   : > { %p35_p0 = scmp.ge.s32.totalorder %s33_s17, 2  ;;  %p49_p1 = scmp.ne.s32.totalorder %s2207_s11, %s2203_s10 }
   0xb   : > { %p50_p2 = scmp.eq.s32.totalorder %s2219_s14, 0  ;;  %p55_p3 = scmp.ne.s32.totalorder %s2203_s10, %s2199_s9 }
   0xc   : > { %s2889_s17 = smov (%p35_p0, %s33_s17), 0  ;;  %p56_p5 = scmp.eq.s32.totalorder %s1686_s15, 0 }
   0xd   : > { %p2283_p4 = por %p50_p2, %p49_p1  ;;  %s37_s20 = ssub.s32 %s2215_s13, %s2889_s17 }
   0xe   : > { %p105_p6 = scmp.eq.s32.totalorder %s1686_s15, 1  ;;  %p40_p7 = scmp.eq.s32.totalorder %s37_s20, 0 }
   0xf   : > { %p2289_p8 = por %p56_p5, %p55_p3  ;;  %p111_p10 = scmp.eq.s32.totalorder %s1687_s16, 1 }
  0x10   : > { %p2293_p9 = por %p105_p6, %p49_p1  ;;  %p2019_p13 = scmp.lt.s32.totalorder %s2219_s14, 2 }
  0x11   : > { %s2871_s21 = scalar_select %p2289_p8, 1, 0 }
  0x12   : > { %s2872_s22 = scalar_select %p2293_p9, 1, 0 }
  0x13   : > { %s2298_s23 = scalar_select %p40_p7, %s2207_s11, %s42_s18  }
  0x14   : > { %p2300_p11 = por %p111_p10, %p55_p3  ;;  %s2307_s25 = sand.u32 1, %s2207_s11  }
  0x15   : > { %s1690_s26 = sshll.u32 %s2307_s25, 3  ;;  %s1691_s27 = sshll.u32 %s2215_s13, 7 }
  0x16   : > { %s2873_s24 = scalar_select %p2300_p11, 1, 0 }
  0x17   : > { %s2316_s30 = scalar_lea.hbm %s2865_s0, %s1691_s27  ;;  %s135_s3 = scalar_lea.vmem [#allocation2], %s1690_s26 }
  0x18   : > { %s143_s4 = sshll.u32 %s135_s3, 4  ;;  %p2324_p0 = pnand %p2019_p13, %p2283_p4  ;;  %s2320_s4 = int_to_ptr.vmem [resolvable:$true] %s143_s4 }
  0x19   : > { %s132_s6 = scalar_lea.sflag [#allocation3], %s2307_s25  ;;  %s2073_s7 = scalar_lea.hbm %s2316_s30, 128 }
  0x1a   : > { %p2074_p3 = scmp.ne.s32.totalorder %s2316_s30, %s2073_s7  ;;  %p2075_p5 = pneg %p2324_p0 }
  0x1b   : > { %s2078_s16 = scalar_lea.hbm %s2865_s0, 256  ;;  %p2079_p4 = scmp.lt.u32.totalorder %s2316_s30, %s2865_s0 }
  0x1c   : > { %p2076_p6 = pnand %p2075_p5, %p2074_p3  ;;  %p2080_p10 = scmp.lt.u32.totalorder %s2078_s16, %s2073_s7 }
  0x1d   : > { %p2082_p12 = scmp.lt.u32.totalorder %s2073_s7, %s2316_s30 }
  0x1e   : > { %p2077_p7 = pneg %p2076_p6  ;;  %p2081_p13 = por %p2080_p10, %p2079_p4 }
  0x20   : > { %p2083_p1 = por %p2082_p12, %p2081_p13 }
  0x22   : > { %p2084_p2 = pnand %p2083_p1, %p2077_p7 }
  0x24   : > { %2087 = shalt.err (!%p2084_p2)
}
  0x25   : > { %s2088_s20 = scalar_lea.vmem %s2320_s4, 128  ;;  %s2221_s28 = smov [#allocation2]  }
  0x26   : > { %p2089_p3 = scmp.ne.s32.totalorder %s2320_s4, %s2088_s20  ;;  %s2093_s29 = sshll.u32 %s2221_s28, 4  ;;  %s2094_s29 = int_to_ptr.vmem [resolvable:$false] %s2093_s29 }
  0x27   : > { %s2095_s3 = scalar_lea.vmem %s2094_s29, 256  ;;  %p2096_p9 = scmp.lt.s32.totalorder %s2320_s4, %s2094_s29 }
  0x28   : > { %p2091_p6 = pnand %p2089_p3, %p2075_p5  ;;  %p2097_p4 = scmp.lt.s32.totalorder %s2095_s3, %s2088_s20 }
  0x2a   : > { %p2092_p11 = pneg %p2091_p6  ;;  %p2098_p10 = por %p2097_p4, %p2096_p9 }
  0x2c   : > { %p2099_p12 = pnand %p2098_p10, %p2092_p11 }
  0x2e   : > { %2102 = shalt.err (!%p2099_p12)
}
  0x2f   : > { %2011 = dma.hbm_to_vmem [thread:$0]  (!%p2324_p0), %s2316_s30, 128, %s2320_s4, %s132_s6  }
  0x30   : > { %p2875_p1 = scmp.lt.s32.totalorder %s2219_s14, 3  ;;  %p2876_p2 = scmp.ge.s32.totalorder %s2219_s14, 1 }
  0x31   : > { %s2369_s16 = scalar_lea.hbm %s2866_s1, %s1691_s27  ;;  %s154_s18 = scalar_lea.vmem [#allocation5], %s1690_s26 }
  0x32   : > { %p2360_p7 = pnand %p2876_p2, %p2875_p1  ;;  %s161_s19 = sshll.u32 %s154_s18, 4  ;;  %s162_s19 = int_to_ptr.vmem [resolvable:$true] %s161_s19 }
  0x33   : > { %s151_s30 = scalar_lea.sflag [#allocation6], %s2307_s25  ;;  %s2103_s4 = scalar_lea.hbm %s2369_s16, 128 }
  0x34   : > { %s2877_s7 = scalar_select %p2360_p7, 1, 0 }
  0x35   : > { %p2104_p9 = scmp.ne.s32.totalorder %s2369_s16, %s2103_s4  ;;  %s2108_s27 = scalar_lea.hbm %s2866_s1, 256 }
  0x36   : > { %p2109_p3 = scmp.lt.u32.totalorder %s2369_s16, %s2866_s1  ;;  %p2110_p6 = scmp.lt.u32.totalorder %s2108_s27, %s2103_s4 }
  0x37   : > { %p2106_p11 = pnand %p2104_p9, %p2075_p5  ;;  %p2112_p10 = scmp.lt.u32.totalorder %s2103_s4, %s2369_s16 }
  0x38   : > { %p2111_p4 = por %p2110_p6, %p2109_p3 }
  0x39   : > { %p2107_p13 = pneg %p2106_p11 }
  0x3a   : > { %p2113_p12 = por %p2112_p10, %p2111_p4 }
  0x3c   : > { %p2114_p1 = pnand %p2113_p12, %p2107_p13 }
  0x3e   : > { %2117 = shalt.err (!%p2114_p1)
}
  0x3f   : > { %s2118_s25 = scalar_lea.vmem %s162_s19, 128  ;;  %s2222_s26 = smov [#allocation5]  }
  0x40   : > { %p2119_p2 = scmp.ne.s32.totalorder %s162_s19, %s2118_s25  ;;  %s2123_s3 = sshll.u32 %s2222_s26, 4  ;;  %s2124_s3 = int_to_ptr.vmem [resolvable:$false] %s2123_s3 }
  0x41   : > { %s2125_s8 = scalar_lea.vmem %s2124_s3, 256  ;;  %p2126_p8 = scmp.lt.s32.totalorder %s162_s19, %s2124_s3 }
  0x42   : > { %p2121_p9 = pnand %p2119_p2, %p2075_p5  ;;  %p2127_p7 = scmp.lt.s32.totalorder %s2125_s8, %s2118_s25 }
  0x44   : > { %p2122_p11 = pneg %p2121_p9  ;;  %p2128_p3 = por %p2127_p7, %p2126_p8 }
  0x46   : > { %p2129_p6 = pnand %p2128_p3, %p2122_p11 }
  0x48   : > { %2132 = shalt.err (!%p2129_p6)
}
  0x49   : > { %2014 = dma.hbm_to_vmem [thread:$0]  (!%p2324_p0), %s2369_s16, 128, %s162_s19, %s151_s30  }
  0x4a   : > { %p2878_p13 = scmp.ne.s32.totalorder %s2877_s7, 0 }
  0x4b   : > { %s2396_s15 = sand.u32 (!%p2878_p13), 1, %s2203_s10   ;;  %p2879_p8 = scmp.ne.s32.totalorder (!%p2878_p13), %s2871_s21, 0 }
  0x4c   : > { %170 = sbr.rel (%p2878_p13) target bundleno = 303 (0x12f), region = 28  ;;  %s1695_s18 = sshll.u32 (!%p2878_p13), %s2396_s15, 3 }
  0x4d   : > { %s173_s4 = scalar_lea.sflag (!%p2878_p13), [#allocation3], %s2396_s15  ;;  %s2400_s6 = scalar_lea.vmem (!%p2878_p13), [#allocation2], %s1695_s18 }
  0x53   : > { %2186 = dma.done.wait (%p2879_p8), %s173_s4, 128  }
  0x54   : > { %2188 = vsyncadd (%p2879_p8), %s173_s4, 4294967168  ;;  %s182_s5 = scalar_lea.sflag [#allocation6], %s2396_s15  ;;  %s2407_s7 = scalar_lea.vmem [#allocation5], %s1695_s18 }
  0x55   : > { %2190 = dma.done.wait (%p2879_p8), %s182_s5, 128  }
  0x56   : > { %2192 = vsyncadd (%p2879_p8), %s182_s5, 4294967168  ;;  %s1697_s16 = sshll.u32 %s2396_s15, 10  ;;  %v2223_v0 = vmov 0.0   ;;  %v2445_v1 = vld [vmem:[%s2407_s7] sm:$0xff]  ;;  %v344_v2 = vld [vmem:[%s2400_s6] sm:$0xff]  ;;  %s1901_s21 = sshll.u32 %s2211_s12, 14 }
  0x57   : > { %s2414_s19 = scalar_lea.vmem [#allocation7], %s1697_s16  ;;  %v2449_v3 = vmul.f32 %v344_v2, %v2445_v1  ;;  %s2808_s28 = scalar_lea.hbm %s2867_s2, %s1901_s21 }
  0x58   : > { %315 = vst [vmem:[%s2414_s19 + $0x320] sm:$0xff] %v2223_v0  ;;  %316 = vst [vmem:[%s2414_s19 + $0x328] sm:$0xff] %v2223_v0  ;;  %s1581_s30 = sshll.u32 %s2414_s19, 4  ;;  %s1568_s12 = scalar_lea.sflag [#allocation4], %s2396_s15  ;;  %s2812_s30 = int_to_ptr.vmem [resolvable:$true] %s1581_s30 }
  0x59   : > { %317 = vst [vmem:[%s2414_s19 + $0x330] sm:$0xff] %v2223_v0  ;;  %318 = vst [vmem:[%s2414_s19 + $0x338] sm:$0xff] %v2223_v0  ;;  %v1902_v4 = vround.rtne.f32 %v2449_v3  ;;  %v352_v5 = vmul.f32 0.5, %v2449_v3  ;;  %v360_v6 = vmul.f32 0.33333334, %v2449_v3  ;;  %v368_v7 = vmul.f32 0.25, %v2449_v3 }
  0x5a   : > { %319 = vst [vmem:[%s2414_s19 + $0x340] sm:$0xff] %v2223_v0  ;;  %320 = vst [vmem:[%s2414_s19 + $0x348] sm:$0xff] %v2223_v0  ;;  %v376_v8 = vmul.f32 0.2, %v2449_v3  ;;  %v384_v9 = vmul.f32 0.16666667, %v2449_v3 }
  0x5b   : > { %321 = vst [vmem:[%s2414_s19 + $0x350] sm:$0xff] %v2223_v0  ;;  %322 = vst [vmem:[%s2414_s19 + $0x358] sm:$0xff] %v2223_v0  ;;  %v392_v10 = vmul.f32 0.14285715, %v2449_v3  ;;  %v347_v11 = vmax.f32 %v1902_v4, -128.0  ;;  %v1903_v12 = vround.rtne.f32 %v352_v5  ;;  %v1904_v13 = vround.rtne.f32 %v360_v6  ;;  %s2133_s29 = scalar_lea.vmem %s2812_s30, 16384 }
  0x5c   : > { %323 = vst [vmem:[%s2414_s19 + $0x360] sm:$0xff] %v2223_v0  ;;  %324 = vst [vmem:[%s2414_s19 + $0x368] sm:$0xff] %v2223_v0  ;;  %v1905_v14 = vround.rtne.f32 %v368_v7  ;;  %v1906_v15 = vround.rtne.f32 %v376_v8  ;;  %v1907_v16 = vround.rtne.f32 %v384_v9  ;;  %v400_v18 = vmul.f32 0.125, %v2449_v3  ;;  %p2134_p0 = scmp.ne.s32.totalorder %s2812_s30, %s2133_s29  ;;  %p2880_p5 = scmp.ne.s32.totalorder %s2872_s22, 0 }
  0x5d   : > { %325 = vst [vmem:[%s2414_s19 + $0x370] sm:$0xff] %v2223_v0  ;;  %326 = vst [vmem:[%s2414_s19 + $0x378] sm:$0xff] %v2223_v0  ;;  %v1908_v17 = vround.rtne.f32 %v392_v10  ;;  %v348_v19 = vmin.f32 %v347_v11, 127.0  ;;  %v354_v20 = vmax.f32 %v1903_v12, -128.0  ;;  %v362_v21 = vmax.f32 %v1904_v13, -128.0  ;;  %s2224_s25 = smov [#allocation7]  }
  0x5e   : > { %327 = vst [vmem:[%s2414_s19 + $0x380] sm:$0xff] %v2223_v0  ;;  %328 = vst [vmem:[%s2414_s19 + $0x388] sm:$0xff] %v2223_v0  ;;  %v370_v22 = vmax.f32 %v1905_v14, -128.0  ;;  %v378_v23 = vmax.f32 %v1906_v15, -128.0  ;;  %v386_v24 = vmax.f32 %v1907_v16, -128.0  ;;  %v1909_v26 = vround.rtne.f32 %v400_v18  ;;  %p2135_p7 = pnand %p2134_p0, %p2880_p5  ;;  %s2137_s26 = sshll.u32 %s2224_s25, 4  ;;  %s2138_s26 = int_to_ptr.vmem [resolvable:$false] %s2137_s26 }
  0x5f   : > { %329 = vst [vmem:[%s2414_s19 + $0x390] sm:$0xff] %v2223_v0  ;;  %330 = vst [vmem:[%s2414_s19 + $0x398] sm:$0xff] %v2223_v0  ;;  %v394_v25 = vmax.f32 %v1908_v17, -128.0  ;;  %v349_v27 = vsub.f32 %v348_v19, %v2449_v3  ;;  %v355_v28 = vmin.f32 %v354_v20, 127.0  ;;  %v363_v29 = vmin.f32 %v362_v21, 127.0  ;;  %s2139_s3 = scalar_lea.vmem %s2138_s26, 32768  ;;  %p2140_p10 = scmp.lt.s32.totalorder %s2812_s30, %s2138_s26 }
  0x60   : > { %331 = vst [vmem:[%s2414_s19 + $0x3a0] sm:$0xff] %v2223_v0  ;;  %332 = vst [vmem:[%s2414_s19 + $0x3a8] sm:$0xff] %v2223_v0  ;;  %v371_v30 = vmin.f32 %v370_v22, 127.0  ;;  %v379_v31 = vmin.f32 %v378_v23, 127.0  ;;  %v387_v32 = vmin.f32 %v386_v24, 127.0  ;;  %v402_v34 = vmax.f32 %v1909_v26, -128.0  ;;  %p2136_p4 = pneg %p2135_p7  ;;  %p2141_p12 = scmp.lt.s32.totalorder %s2139_s3, %s2133_s29 }
  0x61   : > { %333 = vst [vmem:[%s2414_s19 + $0x3b0] sm:$0xff] %v2223_v0  ;;  %334 = vst [vmem:[%s2414_s19 + $0x3b8] sm:$0xff] %v2223_v0  ;;  %v395_v33 = vmin.f32 %v394_v25, 127.0  ;;  %v350_v35 = vmul.f32 %v349_v27, %v349_v27  ;;  %v356_v36 = vmul.f32 2.0, %v355_v28  ;;  %v364_v37 = vmul.f32 3.0, %v363_v29 }
  0x62   : > { %335 = vst [vmem:[%s2414_s19 + $0x3c0] sm:$0xff] %v2223_v0  ;;  %336 = vst [vmem:[%s2414_s19 + $0x3c8] sm:$0xff] %v2223_v0  ;;  %v372_v38 = vmul.f32 4.0, %v371_v30  ;;  %v380_v39 = vmul.f32 5.0, %v379_v31  ;;  %v388_v40 = vmul.f32 6.0, %v387_v32  ;;  %v403_v42 = vmin.f32 %v402_v34, 127.0  ;;  %p2142_p1 = por %p2141_p12, %p2140_p10 }
  0x63   : > { %337 = vst [vmem:[%s2414_s19 + $0x3d0] sm:$0xff] %v2223_v0  ;;  %338 = vst [vmem:[%s2414_s19 + $0x3d8] sm:$0xff] %v2223_v0  ;;  %v396_v41 = vmul.f32 7.0, %v395_v33  ;;  %v357_v43 = vsub.f32 %v356_v36, %v2449_v3  ;;  %v365_v44 = vsub.f32 %v364_v37, %v2449_v3  ;;  %v441_v53 = vmul.f32 0.11111111, %v2449_v3 }
  0x64   : > { %339 = vst [vmem:[%s2414_s19 + $0x3e0] sm:$0xff] %v2223_v0  ;;  %340 = vst [vmem:[%s2414_s19 + $0x3e8] sm:$0xff] %v2223_v0  ;;  %v373_v45 = vsub.f32 %v372_v38, %v2449_v3  ;;  %v381_v46 = vsub.f32 %v380_v39, %v2449_v3  ;;  %v389_v47 = vsub.f32 %v388_v40, %v2449_v3  ;;  %v404_v49 = vmul.f32 8.0, %v403_v42  ;;  %p2143_p2 = pnand %p2142_p1, %p2136_p4 }
  0x65   : > { %341 = vst [vmem:[%s2414_s19 + $0x3f0] sm:$0xff] %v2223_v0  ;;  %342 = vst [vmem:[%s2414_s19 + $0x3f8] sm:$0xff] %v2223_v0  ;;  %v397_v48 = vsub.f32 %v396_v41, %v2449_v3  ;;  %v358_v50 = vmul.f32 %v357_v43, %v357_v43  ;;  %v366_v51 = vmul.f32 %v365_v44, %v365_v44  ;;  %v1910_v58 = vround.rtne.f32 %v441_v53 }
  0x66   : > { %410 = vst [vmem:[%s2414_s19] sm:$0xff] %v350_v35  ;;  %v374_v52 = vmul.f32 %v373_v45, %v373_v45  ;;  %v382_v54 = vmul.f32 %v381_v46, %v381_v46  ;;  %v390_v55 = vmul.f32 %v389_v47, %v389_v47  ;;  %v405_v57 = vsub.f32 %v404_v49, %v2449_v3 }
  0x67   : > { %v398_v56 = vmul.f32 %v397_v48, %v397_v48  ;;  %1699 = vst [vmem:[%s2414_s19 + $0x8] sm:$0xff] %v358_v50  ;;  %1701 = vst [vmem:[%s2414_s19 + $0x10] sm:$0xff] %v366_v51  ;;  %v443_v60 = vmax.f32 %v1910_v58, -128.0  ;;  %v449_v61 = vmul.f32 0.1, %v2449_v3  ;;  %v497_v63 = vmul.f32 0.0625, %v2449_v3 }
  0x68   : > { %v406_v59 = vmul.f32 %v405_v57, %v405_v57  ;;  %1703 = vst [vmem:[%s2414_s19 + $0x18] sm:$0xff] %v374_v52  ;;  %v457_v62 = vmul.f32 0.09090909, %v2449_v3  ;;  %1705 = vst [vmem:[%s2414_s19 + $0x20] sm:$0xff] %v382_v54  ;;  %v465_v0 = vmul.f32 0.083333336, %v2449_v3 }
  0x69   : > { %1707 = vst [vmem:[%s2414_s19 + $0x28] sm:$0xff] %v390_v55  ;;  %1709 = vst [vmem:[%s2414_s19 + $0x30] sm:$0xff] %v398_v56  ;;  %v473_v2 = vmul.f32 0.07692308, %v2449_v3  ;;  %v481_v4 = vmul.f32 0.071428575, %v2449_v3  ;;  %v1911_v6 = vround.rtne.f32 %v449_v61  ;;  %v1917_v12 = vround.rtne.f32 %v497_v63 }
  0x6a   : > { %v444_v5 = vmin.f32 %v443_v60, 127.0  ;;  %v1912_v7 = vround.rtne.f32 %v457_v62  ;;  %v489_v8 = vmul.f32 0.06666667, %v2449_v3  ;;  %1711 = vst [vmem:[%s2414_s19 + $0x38] sm:$0xff] %v406_v59  ;;  %v1913_v9 = vround.rtne.f32 %v465_v0  ;;  %v1027_v54 = vld [vmem:[%s2400_s6] sm:$0xff] }
  0x6b   : > { %v1914_v10 = vround.rtne.f32 %v473_v2  ;;  %v1915_v11 = vround.rtne.f32 %v481_v4  ;;  %v451_v14 = vmax.f32 %v1911_v6, -128.0  ;;  %v499_v20 = vmax.f32 %v1917_v12, -128.0 }
  0x6c   : > { %v445_v13 = vmul.f32 9.0, %v444_v5  ;;  %v459_v15 = vmax.f32 %v1912_v7, -128.0  ;;  %v1916_v16 = vround.rtne.f32 %v489_v8  ;;  %v467_v17 = vmax.f32 %v1913_v9, -128.0 }
  0x6d   : > { %v475_v18 = vmax.f32 %v1914_v10, -128.0  ;;  %v483_v19 = vmax.f32 %v1915_v11, -128.0  ;;  %v452_v22 = vmin.f32 %v451_v14, 127.0  ;;  %v500_v28 = vmin.f32 %v499_v20, 127.0 }
  0x6e   : > { %v446_v21 = vsub.f32 %v445_v13, %v2449_v3  ;;  %v460_v23 = vmin.f32 %v459_v15, 127.0  ;;  %v491_v24 = vmax.f32 %v1916_v16, -128.0  ;;  %v468_v25 = vmin.f32 %v467_v17, 127.0 }
  0x6f   : > { %v476_v26 = vmin.f32 %v475_v18, 127.0  ;;  %v484_v27 = vmin.f32 %v483_v19, 127.0  ;;  %v453_v30 = vmul.f32 10.0, %v452_v22  ;;  %v501_v36 = vmul.f32 16.0, %v500_v28 }
  0x70   : > { %v447_v29 = vmul.f32 %v446_v21, %v446_v21  ;;  %v461_v31 = vmul.f32 11.0, %v460_v23  ;;  %v492_v32 = vmin.f32 %v491_v24, 127.0  ;;  %v469_v33 = vmul.f32 12.0, %v468_v25 }
  0x71   : > { %v477_v34 = vmul.f32 13.0, %v476_v26  ;;  %v485_v35 = vmul.f32 14.0, %v484_v27  ;;  %v454_v37 = vsub.f32 %v453_v30, %v2449_v3  ;;  %v502_v43 = vsub.f32 %v501_v36, %v2449_v3 }
  0x72   : > { %v462_v38 = vsub.f32 %v461_v31, %v2449_v3  ;;  %v493_v39 = vmul.f32 15.0, %v492_v32  ;;  %v470_v40 = vsub.f32 %v469_v33, %v2449_v3  ;;  %1713 = vst [vmem:[%s2414_s19 + $0x40] sm:$0xff] %v447_v29  ;;  %v539_v47 = vmul.f32 0.05882353, %v2449_v3 }
  0x73   : > { %v478_v41 = vsub.f32 %v477_v34, %v2449_v3  ;;  %v486_v42 = vsub.f32 %v485_v35, %v2449_v3  ;;  %v455_v44 = vmul.f32 %v454_v37, %v454_v37  ;;  %v503_v51 = vmul.f32 %v502_v43, %v502_v43 }
  0x74   : > { %v463_v45 = vmul.f32 %v462_v38, %v462_v38  ;;  %v494_v46 = vsub.f32 %v493_v39, %v2449_v3  ;;  %v471_v48 = vmul.f32 %v470_v40, %v470_v40  ;;  %v1918_v53 = vround.rtne.f32 %v539_v47 }
  0x75   : > { %v479_v49 = vmul.f32 %v478_v41, %v478_v41  ;;  %v487_v50 = vmul.f32 %v486_v42, %v486_v42  ;;  %1715 = vst [vmem:[%s2414_s19 + $0x48] sm:$0xff] %v455_v44  ;;  %v547_v56 = vmul.f32 0.055555556, %v2449_v3  ;;  %v555_v57 = vmul.f32 0.05263158, %v2449_v3  ;;  %1727 = vst [vmem:[%s2414_s19 + $0x78] sm:$0xff] %v503_v51 }
  0x76   : > { %v495_v52 = vmul.f32 %v494_v46, %v494_v46  ;;  %1717 = vst [vmem:[%s2414_s19 + $0x50] sm:$0xff] %v463_v45  ;;  %v541_v55 = vmax.f32 %v1918_v53, -128.0  ;;  %1719 = vst [vmem:[%s2414_s19 + $0x58] sm:$0xff] %v471_v48  ;;  %v563_v58 = vmul.f32 0.05, %v2449_v3  ;;  %v2506_v61 = vmul.f32 %v1027_v54, %v2445_v1 }
  0x77   : > { %1721 = vst [vmem:[%s2414_s19 + $0x60] sm:$0xff] %v479_v49  ;;  %1723 = vst [vmem:[%s2414_s19 + $0x68] sm:$0xff] %v487_v50  ;;  %v571_v59 = vmul.f32 0.04761905, %v2449_v3  ;;  %v579_v60 = vmul.f32 0.045454547, %v2449_v3  ;;  %v1919_v63 = vround.rtne.f32 %v547_v56  ;;  %v1920_v0 = vround.rtne.f32 %v555_v57 }
  0x78   : > { %1725 = vst [vmem:[%s2414_s19 + $0x70] sm:$0xff] %v495_v52  ;;  %v542_v62 = vmin.f32 %v541_v55, 127.0  ;;  %v587_v2 = vmul.f32 0.04347826, %v2449_v3  ;;  %v1921_v4 = vround.rtne.f32 %v563_v58  ;;  %v595_v7 = vmul.f32 0.041666668, %v2449_v3 }
  0x79   : > { %v1922_v5 = vround.rtne.f32 %v571_v59  ;;  %v1923_v6 = vround.rtne.f32 %v579_v60  ;;  %v549_v9 = vmax.f32 %v1919_v63, -128.0  ;;  %v557_v10 = vmax.f32 %v1920_v0, -128.0 }
  0x7a   : > { %v543_v8 = vmul.f32 17.0, %v542_v62  ;;  %v1924_v11 = vround.rtne.f32 %v587_v2  ;;  %v565_v12 = vmax.f32 %v1921_v4, -128.0  ;;  %v1925_v1 = vround.rtne.f32 %v595_v7 }
  0x7b   : > { %v573_v13 = vmax.f32 %v1922_v5, -128.0  ;;  %v581_v14 = vmax.f32 %v1923_v6, -128.0  ;;  %v550_v16 = vmin.f32 %v549_v9, 127.0  ;;  %v558_v17 = vmin.f32 %v557_v10, 127.0 }
  0x7c   : > { %v544_v15 = vsub.f32 %v543_v8, %v2449_v3  ;;  %v589_v18 = vmax.f32 %v1924_v11, -128.0  ;;  %v566_v19 = vmin.f32 %v565_v12, 127.0  ;;  %v597_v22 = vmax.f32 %v1925_v1, -128.0 }
  0x7d   : > { %v574_v20 = vmin.f32 %v573_v13, 127.0  ;;  %v582_v21 = vmin.f32 %v581_v14, 127.0  ;;  %v551_v24 = vmul.f32 18.0, %v550_v16  ;;  %v559_v25 = vmul.f32 19.0, %v558_v17 }
  0x7e   : > { %v545_v23 = vmul.f32 %v544_v15, %v544_v15  ;;  %v590_v26 = vmin.f32 %v589_v18, 127.0  ;;  %v567_v27 = vmul.f32 20.0, %v566_v19  ;;  %v598_v30 = vmin.f32 %v597_v22, 127.0 }
  0x7f   : > { %v575_v28 = vmul.f32 21.0, %v574_v20  ;;  %v583_v29 = vmul.f32 22.0, %v582_v21  ;;  %v552_v31 = vsub.f32 %v551_v24, %v2449_v3  ;;  %v560_v32 = vsub.f32 %v559_v25, %v2449_v3 }
  0x80   : > { %v591_v33 = vmul.f32 23.0, %v590_v26  ;;  %v568_v34 = vsub.f32 %v567_v27, %v2449_v3  ;;  %v599_v37 = vmul.f32 24.0, %v598_v30  ;;  %1729 = vst [vmem:[%s2414_s19 + $0x80] sm:$0xff] %v545_v23  ;;  %v637_v41 = vmul.f32 0.04, %v2449_v3 }
  0x81   : > { %v576_v35 = vsub.f32 %v575_v28, %v2449_v3  ;;  %v584_v36 = vsub.f32 %v583_v29, %v2449_v3  ;;  %v553_v38 = vmul.f32 %v552_v31, %v552_v31  ;;  %v561_v39 = vmul.f32 %v560_v32, %v560_v32 }
  0x82   : > { %v592_v40 = vsub.f32 %v591_v33, %v2449_v3  ;;  %v569_v42 = vmul.f32 %v568_v34, %v568_v34  ;;  %v600_v45 = vsub.f32 %v599_v37, %v2449_v3  ;;  %v1926_v47 = vround.rtne.f32 %v637_v41 }
  0x83   : > { %v577_v43 = vmul.f32 %v576_v35, %v576_v35  ;;  %v585_v44 = vmul.f32 %v584_v36, %v584_v36  ;;  %1731 = vst [vmem:[%s2414_s19 + $0x88] sm:$0xff] %v553_v38  ;;  %1733 = vst [vmem:[%s2414_s19 + $0x90] sm:$0xff] %v561_v39  ;;  %v645_v50 = vmul.f32 0.03846154, %v2449_v3  ;;  %v653_v51 = vmul.f32 0.037037037, %v2449_v3 }
  0x84   : > { %v593_v46 = vmul.f32 %v592_v40, %v592_v40  ;;  %v601_v48 = vmul.f32 %v600_v45, %v600_v45  ;;  %v639_v49 = vmax.f32 %v1926_v47, -128.0  ;;  %1735 = vst [vmem:[%s2414_s19 + $0x98] sm:$0xff] %v569_v42  ;;  %v661_v52 = vmul.f32 0.035714287, %v2449_v3 }
  0x85   : > { %1737 = vst [vmem:[%s2414_s19 + $0xa0] sm:$0xff] %v577_v43  ;;  %1739 = vst [vmem:[%s2414_s19 + $0xa8] sm:$0xff] %v585_v44  ;;  %v669_v53 = vmul.f32 0.03448276, %v2449_v3  ;;  %v677_v54 = vmul.f32 0.033333335, %v2449_v3  ;;  %v1927_v56 = vround.rtne.f32 %v645_v50  ;;  %v1928_v57 = vround.rtne.f32 %v653_v51 }
  0x86   : > { %1741 = vst [vmem:[%s2414_s19 + $0xb0] sm:$0xff] %v593_v46  ;;  %v640_v55 = vmin.f32 %v639_v49, 127.0  ;;  %v685_v58 = vmul.f32 0.032258064, %v2449_v3  ;;  %1743 = vst [vmem:[%s2414_s19 + $0xb8] sm:$0xff] %v601_v48  ;;  %v1929_v59 = vround.rtne.f32 %v661_v52  ;;  %v693_v63 = vmul.f32 0.03125, %v2449_v3 }
  0x87   : > { %v1930_v60 = vround.rtne.f32 %v669_v53  ;;  %v1931_v62 = vround.rtne.f32 %v677_v54  ;;  %v647_v2 = vmax.f32 %v1927_v56, -128.0  ;;  %v655_v4 = vmax.f32 %v1928_v57, -128.0 }
  0x88   : > { %v641_v0 = vmul.f32 25.0, %v640_v55  ;;  %v1932_v5 = vround.rtne.f32 %v685_v58  ;;  %v663_v6 = vmax.f32 %v1929_v59, -128.0  ;;  %v1933_v9 = vround.rtne.f32 %v693_v63 }
  0x89   : > { %v671_v7 = vmax.f32 %v1930_v60, -128.0  ;;  %v679_v8 = vmax.f32 %v1931_v62, -128.0  ;;  %v648_v11 = vmin.f32 %v647_v2, 127.0  ;;  %v656_v12 = vmin.f32 %v655_v4, 127.0 }
  0x8a   : > { %v642_v10 = vsub.f32 %v641_v0, %v2449_v3  ;;  %v687_v13 = vmax.f32 %v1932_v5, -128.0  ;;  %v664_v14 = vmin.f32 %v663_v6, 127.0  ;;  %v695_v16 = vmax.f32 %v1933_v9, -128.0 }
  0x8b   : > { %v672_v1 = vmin.f32 %v671_v7, 127.0  ;;  %v680_v15 = vmin.f32 %v679_v8, 127.0  ;;  %v649_v18 = vmul.f32 26.0, %v648_v11  ;;  %v657_v19 = vmul.f32 27.0, %v656_v12 }
  0x8c   : > { %v643_v17 = vmul.f32 %v642_v10, %v642_v10  ;;  %v688_v20 = vmin.f32 %v687_v13, 127.0  ;;  %v665_v21 = vmul.f32 28.0, %v664_v14  ;;  %v696_v24 = vmin.f32 %v695_v16, 127.0 }
  0x8d   : > { %v673_v22 = vmul.f32 29.0, %v672_v1  ;;  %v681_v23 = vmul.f32 30.0, %v680_v15  ;;  %v650_v25 = vsub.f32 %v649_v18, %v2449_v3  ;;  %v658_v26 = vsub.f32 %v657_v19, %v2449_v3 }
  0x8e   : > { %v689_v27 = vmul.f32 31.0, %v688_v20  ;;  %v666_v28 = vsub.f32 %v665_v21, %v2449_v3  ;;  %v697_v31 = vmul.f32 32.0, %v696_v24  ;;  %1745 = vst [vmem:[%s2414_s19 + $0xc0] sm:$0xff] %v643_v17  ;;  %v735_v35 = vmul.f32 0.030303031, %v2449_v3 }
  0x8f   : > { %v674_v29 = vsub.f32 %v673_v22, %v2449_v3  ;;  %v682_v30 = vsub.f32 %v681_v23, %v2449_v3  ;;  %v651_v32 = vmul.f32 %v650_v25, %v650_v25  ;;  %v659_v33 = vmul.f32 %v658_v26, %v658_v26 }
  0x90   : > { %v690_v34 = vsub.f32 %v689_v27, %v2449_v3  ;;  %v667_v36 = vmul.f32 %v666_v28, %v666_v28  ;;  %v698_v39 = vsub.f32 %v697_v31, %v2449_v3  ;;  %v1934_v41 = vround.rtne.f32 %v735_v35 }
  0x91   : > { %v675_v37 = vmul.f32 %v674_v29, %v674_v29  ;;  %v683_v38 = vmul.f32 %v682_v30, %v682_v30  ;;  %1747 = vst [vmem:[%s2414_s19 + $0xc8] sm:$0xff] %v651_v32  ;;  %1749 = vst [vmem:[%s2414_s19 + $0xd0] sm:$0xff] %v659_v33  ;;  %v743_v44 = vmul.f32 0.029411765, %v2449_v3  ;;  %v751_v45 = vmul.f32 0.028571429, %v2449_v3 }
  0x92   : > { %v691_v40 = vmul.f32 %v690_v34, %v690_v34  ;;  %v699_v42 = vmul.f32 %v698_v39, %v698_v39  ;;  %v737_v43 = vmax.f32 %v1934_v41, -128.0  ;;  %1751 = vst [vmem:[%s2414_s19 + $0xd8] sm:$0xff] %v667_v36  ;;  %v759_v46 = vmul.f32 0.027777778, %v2449_v3 }
  0x93   : > { %1753 = vst [vmem:[%s2414_s19 + $0xe0] sm:$0xff] %v675_v37  ;;  %1755 = vst [vmem:[%s2414_s19 + $0xe8] sm:$0xff] %v683_v38  ;;  %v767_v47 = vmul.f32 0.027027028, %v2449_v3  ;;  %v775_v48 = vmul.f32 0.02631579, %v2449_v3  ;;  %v1935_v50 = vround.rtne.f32 %v743_v44  ;;  %v1936_v51 = vround.rtne.f32 %v751_v45 }
  0x94   : > { %1757 = vst [vmem:[%s2414_s19 + $0xf0] sm:$0xff] %v691_v40  ;;  %v738_v49 = vmin.f32 %v737_v43, 127.0  ;;  %v783_v52 = vmul.f32 0.025641026, %v2449_v3  ;;  %1759 = vst [vmem:[%s2414_s19 + $0xf8] sm:$0xff] %v699_v42  ;;  %v1937_v53 = vround.rtne.f32 %v759_v46 }
  0x95   : > { %v1938_v54 = vround.rtne.f32 %v767_v47  ;;  %v1939_v55 = vround.rtne.f32 %v775_v48  ;;  %v791_v56 = vmul.f32 0.025, %v2449_v3  ;;  %v745_v58 = vmax.f32 %v1935_v50, -128.0 }
  0x96   : > { %v739_v57 = vmul.f32 33.0, %v738_v49  ;;  %v753_v59 = vmax.f32 %v1936_v51, -128.0  ;;  %v1940_v60 = vround.rtne.f32 %v783_v52  ;;  %v761_v62 = vmax.f32 %v1937_v53, -128.0 }
  0x97   : > { %v769_v63 = vmax.f32 %v1938_v54, -128.0  ;;  %v777_v0 = vmax.f32 %v1939_v55, -128.0  ;;  %v1941_v2 = vround.rtne.f32 %v791_v56  ;;  %v746_v5 = vmin.f32 %v745_v58, 127.0 }
  0x98   : > { %v740_v4 = vsub.f32 %v739_v57, %v2449_v3  ;;  %v754_v6 = vmin.f32 %v753_v59, 127.0  ;;  %v785_v7 = vmax.f32 %v1940_v60, -128.0  ;;  %v762_v8 = vmin.f32 %v761_v62, 127.0 }
  0x99   : > { %v770_v9 = vmin.f32 %v769_v63, 127.0  ;;  %v778_v10 = vmin.f32 %v777_v0, 127.0  ;;  %v793_v11 = vmax.f32 %v1941_v2, -128.0  ;;  %v747_v13 = vmul.f32 34.0, %v746_v5 }
  0x9a   : > { %v741_v12 = vmul.f32 %v740_v4, %v740_v4  ;;  %v755_v14 = vmul.f32 35.0, %v754_v6  ;;  %v786_v1 = vmin.f32 %v785_v7, 127.0  ;;  %v763_v15 = vmul.f32 36.0, %v762_v8 }
  0x9b   : > { %v771_v16 = vmul.f32 37.0, %v770_v9  ;;  %v779_v17 = vmul.f32 38.0, %v778_v10  ;;  %v794_v18 = vmin.f32 %v793_v11, 127.0  ;;  %v748_v19 = vsub.f32 %v747_v13, %v2449_v3 }
  0x9c   : > { %v756_v20 = vsub.f32 %v755_v14, %v2449_v3  ;;  %v787_v21 = vmul.f32 39.0, %v786_v1  ;;  %v764_v22 = vsub.f32 %v763_v15, %v2449_v3  ;;  %1761 = vst [vmem:[%s2414_s19 + $0x100] sm:$0xff] %v741_v12  ;;  %v833_v29 = vmul.f32 0.024390243, %v2449_v3 }
  0x9d   : > { %v772_v23 = vsub.f32 %v771_v16, %v2449_v3  ;;  %v780_v24 = vsub.f32 %v779_v17, %v2449_v3  ;;  %v795_v25 = vmul.f32 40.0, %v794_v18  ;;  %v749_v26 = vmul.f32 %v748_v19, %v748_v19 }
  0x9e   : > { %v757_v27 = vmul.f32 %v756_v20, %v756_v20  ;;  %v788_v28 = vsub.f32 %v787_v21, %v2449_v3  ;;  %v765_v30 = vmul.f32 %v764_v22, %v764_v22  ;;  %v1942_v35 = vround.rtne.f32 %v833_v29 }
  0x9f   : > { %v773_v31 = vmul.f32 %v772_v23, %v772_v23  ;;  %v781_v32 = vmul.f32 %v780_v24, %v780_v24  ;;  %v796_v33 = vsub.f32 %v795_v25, %v2449_v3  ;;  %1763 = vst [vmem:[%s2414_s19 + $0x108] sm:$0xff] %v749_v26  ;;  %v841_v38 = vmul.f32 0.023809524, %v2449_v3 }
  0xa0   : > { %v789_v34 = vmul.f32 %v788_v28, %v788_v28  ;;  %1765 = vst [vmem:[%s2414_s19 + $0x110] sm:$0xff] %v757_v27  ;;  %v835_v37 = vmax.f32 %v1942_v35, -128.0  ;;  %v849_v39 = vmul.f32 0.023255814, %v2449_v3  ;;  %1767 = vst [vmem:[%s2414_s19 + $0x118] sm:$0xff] %v765_v30 }
  0xa1   : > { %v797_v36 = vmul.f32 %v796_v33, %v796_v33  ;;  %1769 = vst [vmem:[%s2414_s19 + $0x120] sm:$0xff] %v773_v31  ;;  %1771 = vst [vmem:[%s2414_s19 + $0x128] sm:$0xff] %v781_v32  ;;  %v857_v40 = vmul.f32 0.022727273, %v2449_v3  ;;  %v865_v41 = vmul.f32 0.022222223, %v2449_v3  ;;  %v1943_v44 = vround.rtne.f32 %v841_v38 }
  0xa2   : > { %v873_v42 = vmul.f32 0.02173913, %v2449_v3  ;;  %1773 = vst [vmem:[%s2414_s19 + $0x130] sm:$0xff] %v789_v34  ;;  %v836_v43 = vmin.f32 %v835_v37, 127.0  ;;  %v1944_v45 = vround.rtne.f32 %v849_v39  ;;  %v881_v46 = vmul.f32 0.021276595, %v2449_v3 }
  0xa3   : > { %1775 = vst [vmem:[%s2414_s19 + $0x138] sm:$0xff] %v797_v36  ;;  %v1945_v47 = vround.rtne.f32 %v857_v40  ;;  %v1946_v48 = vround.rtne.f32 %v865_v41  ;;  %v889_v50 = vmul.f32 0.020833334, %v2449_v3  ;;  %v843_v52 = vmax.f32 %v1943_v44, -128.0 }
  0xa4   : > { %v1947_v49 = vround.rtne.f32 %v873_v42  ;;  %v837_v51 = vmul.f32 41.0, %v836_v43  ;;  %v851_v53 = vmax.f32 %v1944_v45, -128.0  ;;  %v1948_v54 = vround.rtne.f32 %v881_v46 }
  0xa5   : > { %v859_v55 = vmax.f32 %v1945_v47, -128.0  ;;  %v867_v56 = vmax.f32 %v1946_v48, -128.0  ;;  %v1949_v58 = vround.rtne.f32 %v889_v50  ;;  %v844_v60 = vmin.f32 %v843_v52, 127.0 }
  0xa6   : > { %v875_v57 = vmax.f32 %v1947_v49, -128.0  ;;  %v838_v59 = vsub.f32 %v837_v51, %v2449_v3  ;;  %v852_v62 = vmin.f32 %v851_v53, 127.0  ;;  %v883_v63 = vmax.f32 %v1948_v54, -128.0 }
  0xa7   : > { %v860_v0 = vmin.f32 %v859_v55, 127.0  ;;  %v868_v2 = vmin.f32 %v867_v56, 127.0  ;;  %v891_v5 = vmax.f32 %v1949_v58, -128.0  ;;  %v845_v7 = vmul.f32 42.0, %v844_v60 }
  0xa8   : > { %v876_v4 = vmin.f32 %v875_v57, 127.0  ;;  %v839_v6 = vmul.f32 %v838_v59, %v838_v59  ;;  %v853_v8 = vmul.f32 43.0, %v852_v62  ;;  %v884_v9 = vmin.f32 %v883_v63, 127.0 }
  0xa9   : > { %v861_v10 = vmul.f32 44.0, %v860_v0  ;;  %v869_v11 = vmul.f32 45.0, %v868_v2  ;;  %v892_v13 = vmin.f32 %v891_v5, 127.0  ;;  %v846_v14 = vsub.f32 %v845_v7, %v2449_v3 }
  0xaa   : > { %v877_v12 = vmul.f32 46.0, %v876_v4  ;;  %v854_v1 = vsub.f32 %v853_v8, %v2449_v3  ;;  %v885_v15 = vmul.f32 47.0, %v884_v9  ;;  %1777 = vst [vmem:[%s2414_s19 + $0x140] sm:$0xff] %v839_v6  ;;  %v931_v23 = vmul.f32 0.020408163, %v2449_v3 }
  0xab   : > { %v862_v16 = vsub.f32 %v861_v10, %v2449_v3  ;;  %v870_v17 = vsub.f32 %v869_v11, %v2449_v3  ;;  %v893_v19 = vmul.f32 48.0, %v892_v13  ;;  %v847_v20 = vmul.f32 %v846_v14, %v846_v14 }
  0xac   : > { %v878_v18 = vsub.f32 %v877_v12, %v2449_v3  ;;  %v855_v21 = vmul.f32 %v854_v1, %v854_v1  ;;  %v886_v22 = vsub.f32 %v885_v15, %v2449_v3  ;;  %v1950_v29 = vround.rtne.f32 %v931_v23 }
  0xad   : > { %v863_v24 = vmul.f32 %v862_v16, %v862_v16  ;;  %v871_v25 = vmul.f32 %v870_v17, %v870_v17  ;;  %v894_v27 = vsub.f32 %v893_v19, %v2449_v3  ;;  %1779 = vst [vmem:[%s2414_s19 + $0x148] sm:$0xff] %v847_v20  ;;  %v939_v32 = vmul.f32 0.02, %v2449_v3 }
  0xae   : > { %v879_v26 = vmul.f32 %v878_v18, %v878_v18  ;;  %v887_v28 = vmul.f32 %v886_v22, %v886_v22  ;;  %1781 = vst [vmem:[%s2414_s19 + $0x150] sm:$0xff] %v855_v21  ;;  %v933_v31 = vmax.f32 %v1950_v29, -128.0  ;;  %v947_v33 = vmul.f32 0.019607844, %v2449_v3  ;;  %v2618_v22 = vld [vmem:[%s2414_s19 + $0x320] sm:$0xff] }
  0xaf   : > { %v895_v30 = vmul.f32 %v894_v27, %v894_v27  ;;  %1783 = vst [vmem:[%s2414_s19 + $0x158] sm:$0xff] %v863_v24  ;;  %1785 = vst [vmem:[%s2414_s19 + $0x160] sm:$0xff] %v871_v25  ;;  %v955_v34 = vmul.f32 0.01923077, %v2449_v3  ;;  %v963_v35 = vmul.f32 0.018867925, %v2449_v3  ;;  %v1951_v38 = vround.rtne.f32 %v939_v32 }
  0xb0   : > { %1787 = vst [vmem:[%s2414_s19 + $0x168] sm:$0xff] %v879_v26  ;;  %v971_v36 = vmul.f32 0.018518519, %v2449_v3  ;;  %1789 = vst [vmem:[%s2414_s19 + $0x170] sm:$0xff] %v887_v28  ;;  %v934_v37 = vmin.f32 %v933_v31, 127.0  ;;  %v1952_v39 = vround.rtne.f32 %v947_v33 }
  0xb1   : > { %v979_v40 = vmul.f32 0.018181818, %v2449_v3  ;;  %1791 = vst [vmem:[%s2414_s19 + $0x178] sm:$0xff] %v895_v30  ;;  %v1953_v41 = vround.rtne.f32 %v955_v34  ;;  %v1954_v42 = vround.rtne.f32 %v963_v35  ;;  %v987_v44 = vmul.f32 0.017857144, %v2449_v3 }
  0xb2   : > { %v1955_v43 = vround.rtne.f32 %v971_v36  ;;  %v935_v45 = vmul.f32 49.0, %v934_v37  ;;  %v941_v46 = vmax.f32 %v1951_v38, -128.0  ;;  %v949_v47 = vmax.f32 %v1952_v39, -128.0 }
  0xb3   : > { %v1956_v48 = vround.rtne.f32 %v979_v40  ;;  %v957_v49 = vmax.f32 %v1953_v41, -128.0  ;;  %v965_v50 = vmax.f32 %v1954_v42, -128.0  ;;  %v1957_v52 = vround.rtne.f32 %v987_v44 }
  0xb4   : > { %v973_v51 = vmax.f32 %v1955_v43, -128.0  ;;  %v936_v53 = vsub.f32 %v935_v45, %v2449_v3  ;;  %v942_v54 = vmin.f32 %v941_v46, 127.0  ;;  %v950_v55 = vmin.f32 %v949_v47, 127.0 }
  0xb5   : > { %v981_v56 = vmax.f32 %v1956_v48, -128.0  ;;  %v958_v57 = vmin.f32 %v957_v49, 127.0  ;;  %v966_v58 = vmin.f32 %v965_v50, 127.0  ;;  %v989_v60 = vmax.f32 %v1957_v52, -128.0 }
  0xb6   : > { %v974_v59 = vmin.f32 %v973_v51, 127.0  ;;  %v937_v62 = vmul.f32 %v936_v53, %v936_v53  ;;  %v943_v63 = vmul.f32 50.0, %v942_v54  ;;  %v951_v0 = vmul.f32 51.0, %v950_v55 }
  0xb7   : > { %v982_v2 = vmin.f32 %v981_v56, 127.0  ;;  %v959_v4 = vmul.f32 52.0, %v958_v57  ;;  %v967_v5 = vmul.f32 53.0, %v966_v58  ;;  %v990_v7 = vmin.f32 %v989_v60, 127.0 }
  0xb8   : > { %v975_v6 = vmul.f32 54.0, %v974_v59  ;;  %v944_v8 = vsub.f32 %v943_v63, %v2449_v3  ;;  %v952_v9 = vsub.f32 %v951_v0, %v2449_v3  ;;  %1793 = vst [vmem:[%s2414_s19 + $0x180] sm:$0xff] %v937_v62  ;;  %v1029_v17 = vmul.f32 0.01754386, %v2506_v61 }
  0xb9   : > { %v983_v10 = vmul.f32 55.0, %v982_v2  ;;  %v960_v11 = vsub.f32 %v959_v4, %v2449_v3  ;;  %v968_v12 = vsub.f32 %v967_v5, %v2449_v3  ;;  %v991_v14 = vmul.f32 56.0, %v990_v7 }
  0xba   : > { %v976_v13 = vsub.f32 %v975_v6, %v2449_v3  ;;  %v945_v1 = vmul.f32 %v944_v8, %v944_v8  ;;  %v953_v15 = vmul.f32 %v952_v9, %v952_v9  ;;  %v1958_v26 = vround.rtne.f32 %v1029_v17 }
  0xbb   : > { %v984_v16 = vsub.f32 %v983_v10, %v2449_v3  ;;  %v961_v18 = vmul.f32 %v960_v11, %v960_v11  ;;  %v969_v19 = vmul.f32 %v968_v12, %v968_v12  ;;  %v992_v21 = vsub.f32 %v991_v14, %v2449_v3 }
  0xbc   : > { %v977_v20 = vmul.f32 %v976_v13, %v976_v13  ;;  %v1001_v23 = vadd.f32 %v2618_v22, %v945_v1  ;;  %v1005_v24 = vadd.f32 %v2618_v22, %v953_v15  ;;  %v1031_v31 = vmax.f32 %v1958_v26, -128.0 }
  0xbd   : > { %v985_v25 = vmul.f32 %v984_v16, %v984_v16  ;;  %v1009_v27 = vadd.f32 %v2618_v22, %v961_v18  ;;  %v1013_v28 = vadd.f32 %v2618_v22, %v969_v19  ;;  %v993_v30 = vmul.f32 %v992_v21, %v992_v21 }
  0xbe   : > { %v1017_v29 = vadd.f32 %v2618_v22, %v977_v20  ;;  %1795 = vst [vmem:[%s2414_s19 + $0x188] sm:$0xff] %v1001_v23  ;;  %1797 = vst [vmem:[%s2414_s19 + $0x190] sm:$0xff] %v1005_v24  ;;  %v1037_v32 = vmul.f32 0.01724138, %v2506_v61  ;;  %v1045_v33 = vmul.f32 0.016949153, %v2506_v61 }
  0xbf   : > { %v1021_v3 = vadd.f32 %v2618_v22, %v985_v25  ;;  %1799 = vst [vmem:[%s2414_s19 + $0x198] sm:$0xff] %v1009_v27  ;;  %1801 = vst [vmem:[%s2414_s19 + $0x1a0] sm:$0xff] %v1013_v28  ;;  %v1025_v34 = vadd.f32 %v2618_v22, %v993_v30  ;;  %v1053_v35 = vmul.f32 0.016666668, %v2506_v61  ;;  %v1061_v36 = vmul.f32 0.016393442, %v2506_v61 }
  0xc0   : > { %1803 = vst [vmem:[%s2414_s19 + $0x1a8] sm:$0xff] %v1017_v29  ;;  %v1069_v37 = vmul.f32 0.016129032, %v2506_v61  ;;  %v1032_v38 = vmin.f32 %v1031_v31, 127.0  ;;  %v1959_v39 = vround.rtne.f32 %v1037_v32  ;;  %v1960_v40 = vround.rtne.f32 %v1045_v33 }
  0xc1   : > { %1805 = vst [vmem:[%s2414_s19 + $0x1b0] sm:$0xff] %v1021_v3  ;;  %v1077_v41 = vmul.f32 0.015873017, %v2506_v61  ;;  %1807 = vst [vmem:[%s2414_s19 + $0x1b8] sm:$0xff] %v1025_v34  ;;  %v1961_v42 = vround.rtne.f32 %v1053_v35  ;;  %v1962_v43 = vround.rtne.f32 %v1061_v36  ;;  %v1085_v45 = vmul.f32 0.015625, %v2506_v61 }
  0xc2   : > { %v1963_v44 = vround.rtne.f32 %v1069_v37  ;;  %v1033_v46 = vmul.f32 57.0, %v1032_v38  ;;  %v1039_v47 = vmax.f32 %v1959_v39, -128.0  ;;  %v1047_v48 = vmax.f32 %v1960_v40, -128.0 }
  0xc3   : > { %v1964_v49 = vround.rtne.f32 %v1077_v41  ;;  %v1055_v50 = vmax.f32 %v1961_v42, -128.0  ;;  %v1063_v51 = vmax.f32 %v1962_v43, -128.0  ;;  %v1965_v53 = vround.rtne.f32 %v1085_v45 }
  0xc4   : > { %v1071_v52 = vmax.f32 %v1963_v44, -128.0  ;;  %v1034_v54 = vsub.f32 %v1033_v46, %v2506_v61  ;;  %v1040_v55 = vmin.f32 %v1039_v47, 127.0  ;;  %v1048_v56 = vmin.f32 %v1047_v48, 127.0 }
  0xc5   : > { %v1079_v57 = vmax.f32 %v1964_v49, -128.0  ;;  %v1056_v58 = vmin.f32 %v1055_v50, 127.0  ;;  %v1064_v59 = vmin.f32 %v1063_v51, 127.0  ;;  %v1087_v62 = vmax.f32 %v1965_v53, -128.0 }
  0xc6   : > { %v1072_v60 = vmin.f32 %v1071_v52, 127.0  ;;  %v1035_v63 = vmul.f32 %v1034_v54, %v1034_v54  ;;  %v1041_v0 = vmul.f32 58.0, %v1040_v55  ;;  %v1049_v2 = vmul.f32 59.0, %v1048_v56 }
  0xc7   : > { %v1080_v4 = vmin.f32 %v1079_v57, 127.0  ;;  %v1057_v5 = vmul.f32 60.0, %v1056_v58  ;;  %v1065_v6 = vmul.f32 61.0, %v1064_v59  ;;  %v1088_v8 = vmin.f32 %v1087_v62, 127.0 }
  0xc8   : > { %v1073_v7 = vmul.f32 62.0, %v1072_v60  ;;  %v1095_v9 = vadd.f32 %v2618_v22, %v1035_v63  ;;  %v1042_v10 = vsub.f32 %v1041_v0, %v2506_v61  ;;  %v1050_v11 = vsub.f32 %v1049_v2, %v2506_v61 }
  0xc9   : > { %v1081_v12 = vmul.f32 63.0, %v1080_v4  ;;  %v1058_v13 = vsub.f32 %v1057_v5, %v2506_v61  ;;  %v1066_v14 = vsub.f32 %v1065_v6, %v2506_v61  ;;  %v1089_v15 = vmul.f32 64.0, %v1088_v8 }
  0xca   : > { %v1074_v1 = vsub.f32 %v1073_v7, %v2506_v61  ;;  %1809 = vst [vmem:[%s2414_s19 + $0x1c0] sm:$0xff] %v1095_v9  ;;  %v1043_v16 = vmul.f32 %v1042_v10, %v1042_v10  ;;  %v1051_v17 = vmul.f32 %v1050_v11, %v1050_v11  ;;  %v1127_v19 = vmul.f32 0.015384615, %v2506_v61 }
  0xcb   : > { %v1082_v18 = vsub.f32 %v1081_v12, %v2506_v61  ;;  %v1059_v20 = vmul.f32 %v1058_v13, %v1058_v13  ;;  %v1067_v21 = vmul.f32 %v1066_v14, %v1066_v14  ;;  %v1090_v24 = vsub.f32 %v1089_v15, %v2506_v61 }
  0xcc   : > { %v1075_v23 = vmul.f32 %v1074_v1, %v1074_v1  ;;  %v1099_v25 = vadd.f32 %v2618_v22, %v1043_v16  ;;  %v1103_v26 = vadd.f32 %v2618_v22, %v1051_v17  ;;  %v1966_v28 = vround.rtne.f32 %v1127_v19 }
  0xcd   : > { %v1083_v27 = vmul.f32 %v1082_v18, %v1082_v18  ;;  %v1107_v29 = vadd.f32 %v2618_v22, %v1059_v20  ;;  %v1111_v30 = vadd.f32 %v2618_v22, %v1067_v21  ;;  %v1091_v31 = vmul.f32 %v1090_v24, %v1090_v24 }
  0xce   : > { %v1115_v3 = vadd.f32 %v2618_v22, %v1075_v23  ;;  %1811 = vst [vmem:[%s2414_s19 + $0x1c8] sm:$0xff] %v1099_v25  ;;  %1813 = vst [vmem:[%s2414_s19 + $0x1d0] sm:$0xff] %v1103_v26  ;;  %v1129_v33 = vmax.f32 %v1966_v28, -128.0  ;;  %v1135_v34 = vmul.f32 0.015151516, %v2506_v61 }
  0xcf   : > { %v1119_v32 = vadd.f32 %v2618_v22, %v1083_v27  ;;  %v1143_v35 = vmul.f32 0.014925373, %v2506_v61  ;;  %1815 = vst [vmem:[%s2414_s19 + $0x1d8] sm:$0xff] %v1107_v29  ;;  %1817 = vst [vmem:[%s2414_s19 + $0x1e0] sm:$0xff] %v1111_v30  ;;  %v1123_v36 = vadd.f32 %v2618_v22, %v1091_v31  ;;  %v1151_v37 = vmul.f32 0.014705882, %v2506_v61 }
  0xd0   : > { %1819 = vst [vmem:[%s2414_s19 + $0x1e8] sm:$0xff] %v1115_v3  ;;  %v1159_v38 = vmul.f32 0.014492754, %v2506_v61  ;;  %v1167_v39 = vmul.f32 0.014285714, %v2506_v61  ;;  %v1130_v40 = vmin.f32 %v1129_v33, 127.0  ;;  %v1967_v41 = vround.rtne.f32 %v1135_v34 }
  0xd1   : > { %1821 = vst [vmem:[%s2414_s19 + $0x1f0] sm:$0xff] %v1119_v32  ;;  %v1968_v42 = vround.rtne.f32 %v1143_v35  ;;  %v1175_v43 = vmul.f32 0.014084507, %v2506_v61  ;;  %1823 = vst [vmem:[%s2414_s19 + $0x1f8] sm:$0xff] %v1123_v36  ;;  %v1969_v44 = vround.rtne.f32 %v1151_v37  ;;  %v1183_v47 = vmul.f32 0.013888889, %v2506_v61 }
  0xd2   : > { %v1970_v45 = vround.rtne.f32 %v1159_v38  ;;  %v1971_v46 = vround.rtne.f32 %v1167_v39  ;;  %v1131_v48 = vmul.f32 65.0, %v1130_v40  ;;  %v1137_v49 = vmax.f32 %v1967_v41, -128.0 }
  0xd3   : > { %v1145_v50 = vmax.f32 %v1968_v42, -128.0  ;;  %v1972_v51 = vround.rtne.f32 %v1175_v43  ;;  %v1153_v52 = vmax.f32 %v1969_v44, -128.0  ;;  %v1973_v55 = vround.rtne.f32 %v1183_v47 }
  0xd4   : > { %v1161_v53 = vmax.f32 %v1970_v45, -128.0  ;;  %v1169_v54 = vmax.f32 %v1971_v46, -128.0  ;;  %v1132_v56 = vsub.f32 %v1131_v48, %v2506_v61  ;;  %v1138_v57 = vmin.f32 %v1137_v49, 127.0 }
  0xd5   : > { %v1146_v58 = vmin.f32 %v1145_v50, 127.0  ;;  %v1177_v59 = vmax.f32 %v1972_v51, -128.0  ;;  %v1154_v60 = vmin.f32 %v1153_v52, 127.0  ;;  %v1185_v0 = vmax.f32 %v1973_v55, -128.0 }
  0xd6   : > { %v1162_v62 = vmin.f32 %v1161_v53, 127.0  ;;  %v1170_v63 = vmin.f32 %v1169_v54, 127.0  ;;  %v1133_v2 = vmul.f32 %v1132_v56, %v1132_v56  ;;  %v1139_v4 = vmul.f32 66.0, %v1138_v57 }
  0xd7   : > { %v1147_v5 = vmul.f32 67.0, %v1146_v58  ;;  %v1178_v6 = vmin.f32 %v1177_v59, 127.0  ;;  %v1155_v7 = vmul.f32 68.0, %v1154_v60  ;;  %v1186_v10 = vmin.f32 %v1185_v0, 127.0 }
  0xd8   : > { %v1163_v8 = vmul.f32 69.0, %v1162_v62  ;;  %v1171_v9 = vmul.f32 70.0, %v1170_v63  ;;  %v1193_v11 = vadd.f32 %v2618_v22, %v1133_v2  ;;  %v1140_v12 = vsub.f32 %v1139_v4, %v2506_v61 }
  0xd9   : > { %v1148_v13 = vsub.f32 %v1147_v5, %v2506_v61  ;;  %v1179_v14 = vmul.f32 71.0, %v1178_v6  ;;  %v1156_v1 = vsub.f32 %v1155_v7, %v2506_v61  ;;  %v1187_v17 = vmul.f32 72.0, %v1186_v10 }
  0xda   : > { %v1164_v15 = vsub.f32 %v1163_v8, %v2506_v61  ;;  %v1172_v16 = vsub.f32 %v1171_v9, %v2506_v61  ;;  %1825 = vst [vmem:[%s2414_s19 + $0x200] sm:$0xff] %v1193_v11  ;;  %v1141_v18 = vmul.f32 %v1140_v12, %v1140_v12  ;;  %v1225_v21 = vmul.f32 0.01369863, %v2506_v61 }
  0xdb   : > { %v1149_v19 = vmul.f32 %v1148_v13, %v1148_v13  ;;  %v1180_v20 = vsub.f32 %v1179_v14, %v2506_v61  ;;  %v1157_v23 = vmul.f32 %v1156_v1, %v1156_v1  ;;  %v1188_v26 = vsub.f32 %v1187_v17, %v2506_v61 }
  0xdc   : > { %v1165_v24 = vmul.f32 %v1164_v15, %v1164_v15  ;;  %v1173_v25 = vmul.f32 %v1172_v16, %v1172_v16  ;;  %v1197_v27 = vadd.f32 %v2618_v22, %v1141_v18  ;;  %v1974_v30 = vround.rtne.f32 %v1225_v21 }
  0xdd   : > { %v1201_v28 = vadd.f32 %v2618_v22, %v1149_v19  ;;  %v1181_v29 = vmul.f32 %v1180_v20, %v1180_v20  ;;  %v1205_v3 = vadd.f32 %v2618_v22, %v1157_v23  ;;  %v1189_v33 = vmul.f32 %v1188_v26, %v1188_v26 }
  0xde   : > { %v1209_v31 = vadd.f32 %v2618_v22, %v1165_v24  ;;  %v1213_v32 = vadd.f32 %v2618_v22, %v1173_v25  ;;  %1827 = vst [vmem:[%s2414_s19 + $0x208] sm:$0xff] %v1197_v27  ;;  %v1227_v35 = vmax.f32 %v1974_v30, -128.0  ;;  %v1233_v36 = vmul.f32 0.013513514, %v2506_v61 }
  0xdf   : > { %1829 = vst [vmem:[%s2414_s19 + $0x210] sm:$0xff] %v1201_v28  ;;  %v1217_v34 = vadd.f32 %v2618_v22, %v1181_v29  ;;  %v1241_v37 = vmul.f32 0.013333334, %v2506_v61  ;;  %1831 = vst [vmem:[%s2414_s19 + $0x218] sm:$0xff] %v1205_v3  ;;  %v1221_v38 = vadd.f32 %v2618_v22, %v1189_v33  ;;  %v1249_v39 = vmul.f32 0.013157895, %v2506_v61 }
  0xe0   : > { %1833 = vst [vmem:[%s2414_s19 + $0x220] sm:$0xff] %v1209_v31  ;;  %1835 = vst [vmem:[%s2414_s19 + $0x228] sm:$0xff] %v1213_v32  ;;  %v1257_v40 = vmul.f32 0.012987013, %v2506_v61  ;;  %v1265_v41 = vmul.f32 0.012820513, %v2506_v61  ;;  %v1975_v43 = vround.rtne.f32 %v1233_v36 }
  0xe1   : > { %1837 = vst [vmem:[%s2414_s19 + $0x230] sm:$0xff] %v1217_v34  ;;  %v1228_v42 = vmin.f32 %v1227_v35, 127.0  ;;  %v1976_v44 = vround.rtne.f32 %v1241_v37  ;;  %v1273_v45 = vmul.f32 0.012658228, %v2506_v61  ;;  %1839 = vst [vmem:[%s2414_s19 + $0x238] sm:$0xff] %v1221_v38  ;;  %v1977_v46 = vround.rtne.f32 %v1249_v39 }
  0xe2   : > { %v1978_v47 = vround.rtne.f32 %v1257_v40  ;;  %v1979_v48 = vround.rtne.f32 %v1265_v41  ;;  %v1281_v49 = vmul.f32 0.0125, %v2506_v61  ;;  %v1235_v51 = vmax.f32 %v1975_v43, -128.0 }
  0xe3   : > { %v1229_v50 = vmul.f32 73.0, %v1228_v42  ;;  %v1243_v52 = vmax.f32 %v1976_v44, -128.0  ;;  %v1980_v53 = vround.rtne.f32 %v1273_v45  ;;  %v1251_v54 = vmax.f32 %v1977_v46, -128.0 }
  0xe4   : > { %v1259_v55 = vmax.f32 %v1978_v47, -128.0  ;;  %v1267_v56 = vmax.f32 %v1979_v48, -128.0  ;;  %v1981_v57 = vround.rtne.f32 %v1281_v49  ;;  %v1236_v59 = vmin.f32 %v1235_v51, 127.0 }
  0xe5   : > { %v1230_v58 = vsub.f32 %v1229_v50, %v2506_v61  ;;  %v1244_v60 = vmin.f32 %v1243_v52, 127.0  ;;  %v1275_v62 = vmax.f32 %v1980_v53, -128.0  ;;  %v1252_v63 = vmin.f32 %v1251_v54, 127.0 }
  0xe6   : > { %v1260_v0 = vmin.f32 %v1259_v55, 127.0  ;;  %v1268_v2 = vmin.f32 %v1267_v56, 127.0  ;;  %v1283_v4 = vmax.f32 %v1981_v57, -128.0  ;;  %v1237_v6 = vmul.f32 74.0, %v1236_v59 }
  0xe7   : > { %v1231_v5 = vmul.f32 %v1230_v58, %v1230_v58  ;;  %v1245_v7 = vmul.f32 75.0, %v1244_v60  ;;  %v1276_v8 = vmin.f32 %v1275_v62, 127.0  ;;  %v1253_v9 = vmul.f32 76.0, %v1252_v63 }
  0xe8   : > { %v1261_v10 = vmul.f32 77.0, %v1260_v0  ;;  %v1269_v11 = vmul.f32 78.0, %v1268_v2  ;;  %v1284_v12 = vmin.f32 %v1283_v4, 127.0  ;;  %v1238_v14 = vsub.f32 %v1237_v6, %v2506_v61 }
  0xe9   : > { %v1291_v13 = vadd.f32 %v2618_v22, %v1231_v5  ;;  %v1246_v1 = vsub.f32 %v1245_v7, %v2506_v61  ;;  %v1277_v15 = vmul.f32 79.0, %v1276_v8  ;;  %v1254_v16 = vsub.f32 %v1253_v9, %v2506_v61 }
  0xea   : > { %v1262_v17 = vsub.f32 %v1261_v10, %v2506_v61  ;;  %v1270_v18 = vsub.f32 %v1269_v11, %v2506_v61  ;;  %v1285_v19 = vmul.f32 80.0, %v1284_v12  ;;  %v1239_v20 = vmul.f32 %v1238_v14, %v1238_v14 }
  0xeb   : > { %1841 = vst [vmem:[%s2414_s19 + $0x240] sm:$0xff] %v1291_v13  ;;  %v1247_v21 = vmul.f32 %v1246_v1, %v1246_v1  ;;  %v1278_v23 = vsub.f32 %v1277_v15, %v2506_v61  ;;  %v1323_v24 = vmul.f32 0.012345679, %v2506_v61  ;;  %v1255_v25 = vmul.f32 %v1254_v16, %v1254_v16 }
  0xec   : > { %v1263_v26 = vmul.f32 %v1262_v17, %v1262_v17  ;;  %v1271_v27 = vmul.f32 %v1270_v18, %v1270_v18  ;;  %v1286_v28 = vsub.f32 %v1285_v19, %v2506_v61  ;;  %v1295_v29 = vadd.f32 %v2618_v22, %v1239_v20 }
  0xed   : > { %v1299_v30 = vadd.f32 %v2618_v22, %v1247_v21  ;;  %v1279_v3 = vmul.f32 %v1278_v23, %v1278_v23  ;;  %v1982_v31 = vround.rtne.f32 %v1323_v24  ;;  %v1303_v32 = vadd.f32 %v2618_v22, %v1255_v25 }
  0xee   : > { %v1307_v33 = vadd.f32 %v2618_v22, %v1263_v26  ;;  %v1311_v34 = vadd.f32 %v2618_v22, %v1271_v27  ;;  %v1287_v35 = vmul.f32 %v1286_v28, %v1286_v28  ;;  %1843 = vst [vmem:[%s2414_s19 + $0x248] sm:$0xff] %v1295_v29  ;;  %v1331_v38 = vmul.f32 0.0121951215, %v2506_v61 }
  0xef   : > { %1845 = vst [vmem:[%s2414_s19 + $0x250] sm:$0xff] %v1299_v30  ;;  %v1315_v36 = vadd.f32 %v2618_v22, %v1279_v3  ;;  %v1325_v37 = vmax.f32 %v1982_v31, -128.0  ;;  %v1339_v39 = vmul.f32 0.012048192, %v2506_v61  ;;  %1847 = vst [vmem:[%s2414_s19 + $0x258] sm:$0xff] %v1303_v32 }
  0xf0   : > { %1849 = vst [vmem:[%s2414_s19 + $0x260] sm:$0xff] %v1307_v33  ;;  %1851 = vst [vmem:[%s2414_s19 + $0x268] sm:$0xff] %v1311_v34  ;;  %v1319_v40 = vadd.f32 %v2618_v22, %v1287_v35  ;;  %v1347_v41 = vmul.f32 0.011904762, %v2506_v61  ;;  %v1355_v42 = vmul.f32 0.011764706, %v2506_v61  ;;  %v1983_v45 = vround.rtne.f32 %v1331_v38 }
  0xf1   : > { %v1363_v43 = vmul.f32 0.011627907, %v2506_v61  ;;  %1853 = vst [vmem:[%s2414_s19 + $0x270] sm:$0xff] %v1315_v36  ;;  %v1326_v44 = vmin.f32 %v1325_v37, 127.0  ;;  %v1984_v46 = vround.rtne.f32 %v1339_v39  ;;  %v1371_v47 = vmul.f32 0.011494253, %v2506_v61 }
  0xf2   : > { %1855 = vst [vmem:[%s2414_s19 + $0x278] sm:$0xff] %v1319_v40  ;;  %v1985_v48 = vround.rtne.f32 %v1347_v41  ;;  %v1986_v49 = vround.rtne.f32 %v1355_v42  ;;  %v1379_v51 = vmul.f32 0.011363637, %v2506_v61  ;;  %v1333_v53 = vmax.f32 %v1983_v45, -128.0 }
  0xf3   : > { %v1987_v50 = vround.rtne.f32 %v1363_v43  ;;  %v1327_v52 = vmul.f32 81.0, %v1326_v44  ;;  %v1341_v54 = vmax.f32 %v1984_v46, -128.0  ;;  %v1988_v55 = vround.rtne.f32 %v1371_v47 }
  0xf4   : > { %v1349_v56 = vmax.f32 %v1985_v48, -128.0  ;;  %v1357_v57 = vmax.f32 %v1986_v49, -128.0  ;;  %v1989_v59 = vround.rtne.f32 %v1379_v51  ;;  %v1334_v62 = vmin.f32 %v1333_v53, 127.0 }
  0xf5   : > { %v1365_v58 = vmax.f32 %v1987_v50, -128.0  ;;  %v1328_v60 = vsub.f32 %v1327_v52, %v2506_v61  ;;  %v1342_v63 = vmin.f32 %v1341_v54, 127.0  ;;  %v1373_v0 = vmax.f32 %v1988_v55, -128.0 }
  0xf6   : > { %v1350_v2 = vmin.f32 %v1349_v56, 127.0  ;;  %v1358_v4 = vmin.f32 %v1357_v57, 127.0  ;;  %v1381_v6 = vmax.f32 %v1989_v59, -128.0  ;;  %v1335_v8 = vmul.f32 82.0, %v1334_v62 }
  0xf7   : > { %v1366_v5 = vmin.f32 %v1365_v58, 127.0  ;;  %v1329_v7 = vmul.f32 %v1328_v60, %v1328_v60  ;;  %v1343_v9 = vmul.f32 83.0, %v1342_v63  ;;  %v1374_v10 = vmin.f32 %v1373_v0, 127.0 }
  0xf8   : > { %v1351_v11 = vmul.f32 84.0, %v1350_v2  ;;  %v1359_v12 = vmul.f32 85.0, %v1358_v4  ;;  %v1382_v14 = vmin.f32 %v1381_v6, 127.0  ;;  %v1336_v15 = vsub.f32 %v1335_v8, %v2506_v61 }
  0xf9   : > { %v1367_v13 = vmul.f32 86.0, %v1366_v5  ;;  %v1389_v1 = vadd.f32 %v2618_v22, %v1329_v7  ;;  %v1344_v16 = vsub.f32 %v1343_v9, %v2506_v61  ;;  %v1375_v17 = vmul.f32 87.0, %v1374_v10 }
  0xfa   : > { %v1352_v18 = vsub.f32 %v1351_v11, %v2506_v61  ;;  %v1360_v19 = vsub.f32 %v1359_v12, %v2506_v61  ;;  %v1383_v21 = vmul.f32 88.0, %v1382_v14  ;;  %v1337_v23 = vmul.f32 %v1336_v15, %v1336_v15 }
  0xfb   : > { %v1368_v20 = vsub.f32 %v1367_v13, %v2506_v61  ;;  %1857 = vst [vmem:[%s2414_s19 + $0x280] sm:$0xff] %v1389_v1  ;;  %v1345_v24 = vmul.f32 %v1344_v16, %v1344_v16  ;;  %v1376_v25 = vsub.f32 %v1375_v17, %v2506_v61  ;;  %v1421_v26 = vmul.f32 0.011235955, %v2506_v61 }
  0xfc   : > { %v1353_v27 = vmul.f32 %v1352_v18, %v1352_v18  ;;  %v1361_v28 = vmul.f32 %v1360_v19, %v1360_v19  ;;  %v1384_v30 = vsub.f32 %v1383_v21, %v2506_v61  ;;  %v1393_v3 = vadd.f32 %v2618_v22, %v1337_v23 }
  0xfd   : > { %v1369_v29 = vmul.f32 %v1368_v20, %v1368_v20  ;;  %v1397_v31 = vadd.f32 %v2618_v22, %v1345_v24  ;;  %v1377_v32 = vmul.f32 %v1376_v25, %v1376_v25  ;;  %v1990_v33 = vround.rtne.f32 %v1421_v26 }
  0xfe   : > { %v1401_v34 = vadd.f32 %v2618_v22, %v1353_v27  ;;  %v1405_v35 = vadd.f32 %v2618_v22, %v1361_v28  ;;  %v1385_v37 = vmul.f32 %v1384_v30, %v1384_v30  ;;  %1859 = vst [vmem:[%s2414_s19 + $0x288] sm:$0xff] %v1393_v3  ;;  %v1429_v40 = vmul.f32 0.011111111, %v2506_v61 }
  0xff   : > { %v1409_v36 = vadd.f32 %v2618_v22, %v1369_v29  ;;  %1861 = vst [vmem:[%s2414_s19 + $0x290] sm:$0xff] %v1397_v31  ;;  %v1413_v38 = vadd.f32 %v2618_v22, %v1377_v32  ;;  %v1423_v39 = vmax.f32 %v1990_v33, -128.0  ;;  %v1437_v41 = vmul.f32 0.010989011, %v2506_v61 }
 0x100   : > { %1863 = vst [vmem:[%s2414_s19 + $0x298] sm:$0xff] %v1401_v34  ;;  %1865 = vst [vmem:[%s2414_s19 + $0x2a0] sm:$0xff] %v1405_v35  ;;  %v1417_v42 = vadd.f32 %v2618_v22, %v1385_v37  ;;  %v1445_v43 = vmul.f32 0.010869565, %v2506_v61  ;;  %v1453_v44 = vmul.f32 0.010752688, %v2506_v61  ;;  %v1991_v47 = vround.rtne.f32 %v1429_v40 }
 0x101   : > { %1867 = vst [vmem:[%s2414_s19 + $0x2a8] sm:$0xff] %v1409_v36  ;;  %v1461_v45 = vmul.f32 0.010638298, %v2506_v61  ;;  %1869 = vst [vmem:[%s2414_s19 + $0x2b0] sm:$0xff] %v1413_v38  ;;  %v1424_v46 = vmin.f32 %v1423_v39, 127.0  ;;  %v1992_v48 = vround.rtne.f32 %v1437_v41 }
 0x102   : > { %v1469_v49 = vmul.f32 0.010526316, %v2506_v61  ;;  %1871 = vst [vmem:[%s2414_s19 + $0x2b8] sm:$0xff] %v1417_v42  ;;  %v1993_v50 = vround.rtne.f32 %v1445_v43  ;;  %v1994_v51 = vround.rtne.f32 %v1453_v44  ;;  %v1477_v53 = vmul.f32 0.010416667, %v2506_v61 }
 0x103   : > { %v1995_v52 = vround.rtne.f32 %v1461_v45  ;;  %v1425_v54 = vmul.f32 89.0, %v1424_v46  ;;  %v1431_v55 = vmax.f32 %v1991_v47, -128.0  ;;  %v1439_v56 = vmax.f32 %v1992_v48, -128.0 }
 0x104   : > { %v1996_v57 = vround.rtne.f32 %v1469_v49  ;;  %v1447_v58 = vmax.f32 %v1993_v50, -128.0  ;;  %v1455_v59 = vmax.f32 %v1994_v51, -128.0  ;;  %v1997_v62 = vround.rtne.f32 %v1477_v53 }
 0x105   : > { %v1463_v60 = vmax.f32 %v1995_v52, -128.0  ;;  %v1426_v63 = vsub.f32 %v1425_v54, %v2506_v61  ;;  %v1432_v0 = vmin.f32 %v1431_v55, 127.0  ;;  %v1440_v2 = vmin.f32 %v1439_v56, 127.0 }
 0x106   : > { %v1471_v4 = vmax.f32 %v1996_v57, -128.0  ;;  %v1448_v5 = vmin.f32 %v1447_v58, 127.0  ;;  %v1456_v6 = vmin.f32 %v1455_v59, 127.0  ;;  %v1479_v8 = vmax.f32 %v1997_v62, -128.0 }
 0x107   : > { %v1464_v7 = vmin.f32 %v1463_v60, 127.0  ;;  %v1427_v9 = vmul.f32 %v1426_v63, %v1426_v63  ;;  %v1433_v10 = vmul.f32 90.0, %v1432_v0  ;;  %v1441_v11 = vmul.f32 91.0, %v1440_v2 }
 0x108   : > { %v1472_v12 = vmin.f32 %v1471_v4, 127.0  ;;  %v1449_v13 = vmul.f32 92.0, %v1448_v5  ;;  %v1457_v14 = vmul.f32 93.0, %v1456_v6  ;;  %v1480_v15 = vmin.f32 %v1479_v8, 127.0 }
 0x109   : > { %v1465_v1 = vmul.f32 94.0, %v1464_v7  ;;  %v1487_v16 = vadd.f32 %v2618_v22, %v1427_v9  ;;  %v1434_v17 = vsub.f32 %v1433_v10, %v2506_v61  ;;  %v1442_v18 = vsub.f32 %v1441_v11, %v2506_v61 }
 0x10a   : > { %v1473_v19 = vmul.f32 95.0, %v1472_v12  ;;  %v1450_v20 = vsub.f32 %v1449_v13, %v2506_v61  ;;  %v1458_v21 = vsub.f32 %v1457_v14, %v2506_v61  ;;  %v1481_v24 = vmul.f32 96.0, %v1480_v15 }
 0x10b   : > { %v1466_v23 = vsub.f32 %v1465_v1, %v2506_v61  ;;  %1873 = vst [vmem:[%s2414_s19 + $0x2c0] sm:$0xff] %v1487_v16  ;;  %v1435_v25 = vmul.f32 %v1434_v17, %v1434_v17  ;;  %v1443_v26 = vmul.f32 %v1442_v18, %v1442_v18  ;;  %v1519_v28 = vmul.f32 0.010309278, %v2506_v61 }
 0x10c   : > { %v1474_v27 = vsub.f32 %v1473_v19, %v2506_v61  ;;  %v1451_v29 = vmul.f32 %v1450_v20, %v1450_v20  ;;  %v1459_v30 = vmul.f32 %v1458_v21, %v1458_v21  ;;  %v1482_v31 = vsub.f32 %v1481_v24, %v2506_v61 }
 0x10d   : > { %v1467_v3 = vmul.f32 %v1466_v23, %v1466_v23  ;;  %v1491_v32 = vadd.f32 %v2618_v22, %v1435_v25  ;;  %v1495_v33 = vadd.f32 %v2618_v22, %v1443_v26  ;;  %v1998_v35 = vround.rtne.f32 %v1519_v28 }
 0x10e   : > { %v1475_v34 = vmul.f32 %v1474_v27, %v1474_v27  ;;  %v1499_v36 = vadd.f32 %v2618_v22, %v1451_v29  ;;  %v1503_v37 = vadd.f32 %v2618_v22, %v1459_v30  ;;  %v1483_v39 = vmul.f32 %v1482_v31, %v1482_v31 }
 0x10f   : > { %v1507_v38 = vadd.f32 %v2618_v22, %v1467_v3  ;;  %1875 = vst [vmem:[%s2414_s19 + $0x2c8] sm:$0xff] %v1491_v32  ;;  %1877 = vst [vmem:[%s2414_s19 + $0x2d0] sm:$0xff] %v1495_v33  ;;  %v1521_v41 = vmax.f32 %v1998_v35, -128.0  ;;  %v1527_v42 = vmul.f32 0.010204081, %v2506_v61 }
 0x110   : > { %v1511_v40 = vadd.f32 %v2618_v22, %v1475_v34  ;;  %v1535_v43 = vmul.f32 0.01010101, %v2506_v61  ;;  %1879 = vst [vmem:[%s2414_s19 + $0x2d8] sm:$0xff] %v1499_v36  ;;  %1881 = vst [vmem:[%s2414_s19 + $0x2e0] sm:$0xff] %v1503_v37  ;;  %v1515_v44 = vadd.f32 %v2618_v22, %v1483_v39  ;;  %v1543_v45 = vmul.f32 0.01, %v2506_v61 }
 0x111   : > { %1883 = vst [vmem:[%s2414_s19 + $0x2e8] sm:$0xff] %v1507_v38  ;;  %v1522_v46 = vmin.f32 %v1521_v41, 127.0  ;;  %v1999_v47 = vround.rtne.f32 %v1527_v42 }
 0x112   : > { %1885 = vst [vmem:[%s2414_s19 + $0x2f0] sm:$0xff] %v1511_v40  ;;  %v2000_v48 = vround.rtne.f32 %v1535_v43  ;;  %1887 = vst [vmem:[%s2414_s19 + $0x2f8] sm:$0xff] %v1515_v44  ;;  %v2001_v49 = vround.rtne.f32 %v1543_v45 }
 0x113   : > { %v1523_v50 = vmul.f32 97.0, %v1522_v46  ;;  %v1529_v51 = vmax.f32 %v1999_v47, -128.0 }
 0x114   : > { %v1537_v52 = vmax.f32 %v2000_v48, -128.0  ;;  %v1545_v53 = vmax.f32 %v2001_v49, -128.0 }
 0x115   : > { %v1524_v54 = vsub.f32 %v1523_v50, %v2506_v61  ;;  %v1530_v55 = vmin.f32 %v1529_v51, 127.0 }
 0x116   : > { %v1538_v56 = vmin.f32 %v1537_v52, 127.0  ;;  %v1546_v57 = vmin.f32 %v1545_v53, 127.0 }
 0x117   : > { %v1525_v58 = vmul.f32 %v1524_v54, %v1524_v54  ;;  %v1531_v59 = vmul.f32 98.0, %v1530_v55 }
 0x118   : > { %v1539_v60 = vmul.f32 99.0, %v1538_v56  ;;  %v1547_v62 = vmul.f32 100.0, %v1546_v57 }
 0x119   : > { %v1553_v63 = vadd.f32 %v2618_v22, %v1525_v58  ;;  %v1532_v0 = vsub.f32 %v1531_v59, %v2506_v61 }
 0x11a   : > { %v1540_v2 = vsub.f32 %v1539_v60, %v2506_v61  ;;  %v1548_v4 = vsub.f32 %v1547_v62, %v2506_v61 }
 0x11b   : > { %1889 = vst [vmem:[%s2414_s19 + $0x300] sm:$0xff] %v1553_v63  ;;  %v1533_v5 = vmul.f32 %v1532_v0, %v1532_v0 }
 0x11c   : > { %v1541_v6 = vmul.f32 %v1540_v2, %v1540_v2  ;;  %v1549_v7 = vmul.f32 %v1548_v4, %v1548_v4 }
 0x11d   : > { %v1557_v8 = vadd.f32 %v2618_v22, %v1533_v5 }
 0x11e   : > { %v1561_v9 = vadd.f32 %v2618_v22, %v1541_v6  ;;  %v1565_v61 = vadd.f32 %v2618_v22, %v1549_v7 }
 0x11f   : > { %1891 = vst [vmem:[%s2414_s19 + $0x308] sm:$0xff] %v1557_v8 }
 0x120   : > { %1893 = vst [vmem:[%s2414_s19 + $0x310] sm:$0xff] %v1561_v9  ;;  %1895 = vst [vmem:[%s2414_s19 + $0x318] sm:$0xff] %v1565_v61 }
 0x121   : > { %2146 = shalt.err (!%p2143_p2)
}
 0x122   : > { %s2147_s8 = scalar_lea.hbm %s2808_s28, 16384  ;;  %s2151_s6 = scalar_lea.hbm %s2867_s2, 32768 }
 0x123   : > { %p2148_p9 = scmp.ne.s32.totalorder %s2808_s28, %s2147_s8  ;;  %p2152_p6 = scmp.lt.u32.totalorder %s2808_s28, %s2867_s2 }
 0x124   : > { %p2153_p13 = scmp.lt.u32.totalorder %s2151_s6, %s2147_s8  ;;  %p2155_p0 = scmp.lt.u32.totalorder %s2147_s8, %s2808_s28 }
 0x125   : > { %p2149_p11 = pnand %p2148_p9, %p2880_p5 }
 0x126   : > { %p2154_p8 = por %p2153_p13, %p2152_p6 }
 0x127   : > { %p2150_p3 = pneg %p2149_p11 }
 0x128   : > { %p2156_p7 = por %p2155_p0, %p2154_p8 }
 0x12a   : > { %p2157_p4 = pnand %p2156_p7, %p2150_p3 }
 0x12c   : > { %2160 = shalt.err (!%p2157_p4)
}
 0x12d   : > { %s2225_s16 = smov 128   ;;  %s2226_s19 = smov 8  }
 0x12e   : > { %2006 = dma.vmem_to_hbm [thread:$0]  (%p2880_p5), %s2812_s30, 16384, %s2808_s28, %s1568_s12, %s2225_s16, %s2225_s16, %s2226_s19  }
 0x12f PF: > { %s1596_s21 = sand.u32 1, %s2199_s9   ;;  %p2881_p10 = scmp.ne.s32.totalorder %s2873_s24, 0 }
 0x130   : > { %p2882_p12 = scmp.ge.s32.totalorder %s2219_s14, 2  ;;  %s1597_s20 = scalar_lea.sflag [#allocation4], %s1596_s21 }
 0x132   : > { %p2016_p1 = pnand %p2882_p12, %p2881_p10 }
 0x134   : > { %2194 = dma.done.wait (!%p2016_p1), %s1597_s20, 16384  }
 0x135   : > { %2196 = vsyncadd (!%p2016_p1), %s1597_s20, 4294950912  ;;  %s21_s14 = sadd.s32 1, %s2219_s14   ;;  %s2883_s9 = smov %s2203_s10 }
 0x136   : > { %p18_p2 = scmp.ge.s32.totalorder %s21_s14, 4   ;;  %s2884_s10 = smov %s2207_s11 }
 0x137   : > { %s2885_s11 = smov %s2298_s23  ;;  %s2886_s12 = smov %s2215_s13 }
 0x138   : > { %s2887_s13 = smov %s2889_s17  ;;  %20 = sbr.rel (!%p18_p2) target bundleno = 8 (0x8), region = 189 }
 0x13f   :  { %1602 = vsyncpa [#allocation3], 1 }
 0x140   :  { %1604 = vsyncpa [#allocation3 + $0x1], 1 }
 0x141   :  { %1605 = vsyncpa [#allocation6], 1 }
 0x142   :  { %1607 = vsyncpa [#allocation6 + $0x1], 1 }
 0x143   :  { %1608 = vsyncpa [#allocation4], 1 }
 0x144   :  { %1610 = vsyncpa [#allocation4 + $0x1], 1 }

</bundles_post_ra>
